<compile_context>
chip_gen: v5e
topology: v5e:2x2
jax: 0.10.0
libtpu: 0.0.40
codegen_flags: <defaults>
</compile_context>

<pallas_src>
import jax
import jax.numpy as jnp
from jax.experimental import pallas as pl
from jax.experimental.pallas import tpu as pltpu


def bilstm_kernel(x_ref, wih_ref, whh_f_ref, whh_b_ref, b_ref, out_ref, xg):
    """Bidirectional single-layer LSTM + fused residual for one batch tile.

    x_ref:    (S, Bt, E)   time-major inputs (f32)
    wih_ref:  (E, 8H)      fused [fwd | bwd] input->gate weights (bf16)
    whh_*:    (H, 4H)      hidden->gate weights, fwd / bwd (bf16)
    b_ref:    (1, 8H)      fused [fwd | bwd] combined bias b_ih + b_hh (f32)
    out_ref:  (S, Bt, E)   output (= lstm output + residual), time-major
    xg:       (S, Bt, 8H)  scratch: fused input-gate projections (f32)
    Gate order follows PyTorch: [i, f, g, o].
    """
    S, B, E = x_ref.shape
    H = E // 2

    # One fused (S*B, E) x (E, 8H) MXU GEMM for ALL timesteps and BOTH
    # directions: bf16 operands, f32 accumulation.  Leading-dim merge only
    # (no lane crossing), cast after the f32 reshape.
    x2d = x_ref[...].reshape(S * B, E)
    xg[...] = (
        jnp.dot(x2d.astype(jnp.bfloat16), wih_ref[...],
                preferred_element_type=jnp.float32)
        + b_ref[...]
    ).reshape(S, B, 8 * H)

    whh_f = whh_f_ref[...]   # (H, 4H) bf16, stays resident across the loop
    whh_b = whh_b_ref[...]

    def cell(gates, c):
        # Gate math / cell state in f32 (v5e has no bf16 VPU/EUP anyway).
        i = jax.nn.sigmoid(gates[:, 0 * H:1 * H])
        f = jax.nn.sigmoid(gates[:, 1 * H:2 * H])
        g = jnp.tanh(gates[:, 2 * H:3 * H])
        o = jax.nn.sigmoid(gates[:, 3 * H:4 * H])
        c_new = f * c + i * g
        h_new = o * jnp.tanh(c_new)
        return h_new, c_new

    z = jnp.zeros((B, H), jnp.float32)

    # Forward and backward recurrences advanced in ONE loop so the two
    # independent serial chains interleave on MXU / EUP / VALU slots.
    # Residual add is fused into the per-step stores (no h_all scratch,
    # no epilogue pass).  H is a multiple of 128 -> lane-aligned stores.
    def body(t, carry):
        hf, cf, hb, cb = carry
        tt = S - 1 - t
        gf = xg[t, :, 0:4 * H] + jnp.dot(
            hf.astype(jnp.bfloat16), whh_f, preferred_element_type=jnp.float32)
        gb = xg[tt, :, 4 * H:8 * H] + jnp.dot(
            hb.astype(jnp.bfloat16), whh_b, preferred_element_type=jnp.float32)
        hf, cf = cell(gf, cf)
        hb, cb = cell(gb, cb)
        out_ref[t, :, 0:H] = (hf + x_ref[t, :, 0:H]).astype(out_ref.dtype)
        out_ref[tt, :, H:2 * H] = (hb + x_ref[tt, :, H:2 * H]).astype(out_ref.dtype)
        return (hf, cf, hb, cb)

    # Full unroll only for short sequences; bounded unroll keeps the two
    # chains interleaved without vreg spills for long prompts.
    unroll = S if S <= 16 else 8
    jax.lax.fori_loop(0, S, body, (z, z, z, z), unroll=unroll)


def _vmem_plan():
    """(per-tile byte budget, cap for vmem_limit_bytes) for this chip."""
    try:
        phys = int(pltpu.get_tpu_info().vmem_capacity_bytes)
    except Exception:
        phys = 64 << 20  # conservative fallback: v7x per-TC VMEM
    # Leave headroom for double-buffering slack and compiler-internal scratch:
    # ~45% of physical, capped at 48 MiB (=> ~28 MiB on v7x, 48 MiB on v5e/v6e).
    tile_budget = min(int(phys * 0.45), 48 << 20)
    limit_cap = phys - (8 << 20)
    return tile_budget, limit_cap


def _tile_bytes(bt, S, E):
    """Approximate per-tile VMEM footprint in bytes."""
    H = E // 2
    io = 2 * (S * bt * E * 4) * 2                 # x + out blocks, f32, double-buffered
    xg = S * bt * 8 * H * 4                       # fused gate-projection scratch, f32
    w = 2 * (E * 8 * H * 2 + 2 * H * 4 * H * 2 + 8 * H * 4)  # bf16 weights + f32 bias, dbl-buf
    return io + xg + w


def _pick_batch_tile(B, S, E, budget):
    """VMEM-aware batch tile: largest sublane-aligned divisor of B that fits
    the budget; prefer >=2 grid tiles (v7x megacore) when bt can stay >=128."""
    cands = [c for c in (512, 256, 128, 64, 32, 16, 8) if c <= B and B % c == 0]
    if not cands:
        cands = [B]   # single block: block dims equal full array dims -> legal
    fitting = [c for c in cands if _tile_bytes(c, S, E) <= budget]
    if not fitting:
        fitting = [cands[-1]]   # smallest candidate; rely on vmem_limit_bytes
    bt = fitting[0]
    if B // bt < 2:
        alt = [c for c in fitting if B // c >= 2 and c >= 128]
        if alt:
            bt = alt[0]          # shard across TensorCores without starving MXU rows
    return bt


def prompt_encoder_lstm1(x, params):
    """PromptEncoder forward (LSTM1 branch, residual=True)."""
    B, S, E = x.shape
    assert E % 2 == 0
    H = E // 2
    # Per-step lane-slice stores ([0:H] / [H:2H]) must stay 128-lane aligned.
    assert E % 256 == 0, "emb_dimension must be a multiple of 256 (H % 128 == 0)"

    # Fuse fwd|bwd input->gate weights / biases; bf16 MXU operands.
    wih = jnp.concatenate([params["wih_f"], params["wih_b"]], axis=1).astype(jnp.bfloat16)
    whh_f = params["whh_f"].astype(jnp.bfloat16)
    whh_b = params["whh_b"].astype(jnp.bfloat16)
    b = jnp.concatenate([params["b_f"], params["b_b"]], axis=1)   # (1, 8H) f32

    # Layout plumbing OUTSIDE the kernel: time-major (S, B, E) in and out.
    xt = jnp.transpose(x, (1, 0, 2))

    tile_budget, limit_cap = _vmem_plan()
    bt = _pick_batch_tile(B, S, E, tile_budget)
    grid = (B // bt,)
    vmem_limit = int(min(limit_cap,
                         max(32 << 20, int(_tile_bytes(bt, S, E) * 1.3))))

    cost = pl.CostEstimate(
        flops=2 * S * B * (E * 8 * H + 2 * H * 4 * H),
        transcendentals=10 * S * B * H,
        bytes_accessed=4 * (2 * S * B * E) + 2 * (E * 8 * H + 2 * H * 4 * H) + 4 * 8 * H,
    )

    out_t = pl.pallas_call(
        bilstm_kernel,
        out_shape=jax.ShapeDtypeStruct((S, B, E), x.dtype),
        grid=grid,
        in_specs=[
            pl.BlockSpec((S, bt, E), lambda i: (0, i, 0)),      # x (time-major)
            pl.BlockSpec((E, 8 * H), lambda i: (0, 0)),         # fused W_ih (bf16)
            pl.BlockSpec((H, 4 * H), lambda i: (0, 0)),         # W_hh fwd  (bf16)
            pl.BlockSpec((H, 4 * H), lambda i: (0, 0)),         # W_hh bwd  (bf16)
            pl.BlockSpec((1, 8 * H), lambda i: (0, 0)),         # fused bias (f32)
        ],
        out_specs=pl.BlockSpec((S, bt, E), lambda i: (0, i, 0)),
        scratch_shapes=[
            pltpu.VMEM((S, bt, 8 * H), jnp.float32),  # fused input-gate projections
        ],
        compiler_params=pltpu.CompilerParams(
            dimension_semantics=("parallel",),
            vmem_limit_bytes=vmem_limit,
        ),
        cost_estimate=cost,
    )(xt, wih, whh_f, whh_b, b)

    out = jnp.transpose(out_t, (1, 0, 2))  # back to batch-first (B, S, E)
    # PyTorch: .squeeze() (no-op for B > 1 and S > 1); residual already added.
    return jnp.squeeze(out)


def bilstm_reference(x, params):
    """Pure-JAX reference with the SAME numerics as the kernel
    (bf16 matmul operands, f32 accumulation, f32 gate math + residual)."""
    B, S, E = x.shape
    H = E // 2

    def run_dir(wih, whh, b, reverse):
        wih = wih.astype(jnp.bfloat16)
        whh = whh.astype(jnp.bfloat16)
        xs = jnp.flip(x, axis=1) if reverse else x
        xs_t = jnp.transpose(xs, (1, 0, 2))  # (S, B, E)

        def step(carry, xt):
            h, c = carry
            gates = (jnp.dot(xt.astype(jnp.bfloat16), wih,
                             preferred_element_type=jnp.float32)
                     + jnp.dot(h.astype(jnp.bfloat16), whh,
                               preferred_element_type=jnp.float32)
                     + b[0])
            i = jax.nn.sigmoid(gates[:, 0 * H:1 * H])
            f = jax.nn.sigmoid(gates[:, 1 * H:2 * H])
            g = jnp.tanh(gates[:, 2 * H:3 * H])
            o = jax.nn.sigmoid(gates[:, 3 * H:4 * H])
            c = f * c + i * g
            h = o * jnp.tanh(c)
            return (h, c), h

        init = (jnp.zeros((B, H), jnp.float32), jnp.zeros((B, H), jnp.float32))
        _, hs = jax.lax.scan(step, init, xs_t)  # (S, B, H)
        hs = jnp.transpose(hs, (1, 0, 2))       # (B, S, H)
        return jnp.flip(hs, axis=1) if reverse else hs

    hf = run_dir(params["wih_f"], params["whh_f"], params["b_f"], False)
    hb = run_dir(params["wih_b"], params["whh_b"], params["b_b"], True)
    return jnp.concatenate([hf, hb], axis=-1) + x


def init_params(key, emb_dim):
    """Deterministic synthetic LSTM params (PyTorch-style uniform init)."""
    H = emb_dim // 2
    bound = 1.0 / (H ** 0.5)
    ks = jax.random.split(key, 10)

    def u(k, shape):
        return jax.random.uniform(k, shape, jnp.float32, -bound, bound)

    # Stored transposed relative to torch (weight_ih_l0 is (4H, E) in torch).
    return {
        "wih_f": u(ks[0], (emb_dim, 4 * H)),
        "whh_f": u(ks[1], (H, 4 * H)),
        "b_f":   u(ks[2], (1, 4 * H)) + u(ks[3], (1, 4 * H)),   # b_ih + b_hh
        "wih_b": u(ks[4], (emb_dim, 4 * H)),
        "whh_b": u(ks[5], (H, 4 * H)),
        "b_b":   u(ks[6], (1, 4 * H)) + u(ks[7], (1, 4 * H)),
    }


if __name__ == "__main__":
    # Small but vreg-aligned shapes consistent with the module
    # (emb_dimension default is 512; use 256 so H = 128 lanes, B = 8 sublanes).
    B, S, E = 8, 8, 256

    key = jax.random.PRNGKey(0)
    k_param, k_x = jax.random.split(key)
    params = init_params(k_param, E)
    x = jax.random.normal(k_x, (B, S, E), jnp.float32)

    out = jax.block_until_ready(prompt_encoder_lstm1(x, params))
    ref = jax.block_until_ready(bilstm_reference(x, params))

    assert out.shape == (B, S, E)
    assert jnp.allclose(out, ref, atol=5e-3, rtol=5e-3), "mismatch vs JAX reference"

    # TODO(synk): MLP1/MLP2/transformer branches of PromptEncoder are not
    # exercised by the default constructor (module_type='LSTM1') and are not
    # implemented here.
    print("KERNEL_OK")
</pallas_src>

<mosaic_0001>
module attributes {stable_mosaic.version = 11 : i64} {
  func.func @bilstm_kernel(%arg0: i32, %arg1: memref<8x8x256xf32, #tpu.memory_space<vmem>>, %arg2: memref<256x1024xbf16, #tpu.memory_space<vmem>>, %arg3: memref<128x512xbf16, #tpu.memory_space<vmem>>, %arg4: memref<128x512xbf16, #tpu.memory_space<vmem>>, %arg5: memref<1x1024xf32, #tpu.memory_space<vmem>>, %arg6: memref<8x8x256xf32, #tpu.memory_space<vmem>>, %arg7: memref<8x8x1024xf32, #tpu.memory_space<vmem>>) attributes {dimension_semantics = [#tpu.dimension_semantics<parallel>], iteration_bounds = array<i64: 1>, scalar_prefetch = 0 : i64, scratch_operands = 1 : i64, tpu.core_type = #tpu.core_type<tc>, window_params = [{transform_indices = @transform_0, window_bounds = array<i64: 8, 8, 256>}, {pipeline_mode = #tpu.pipeline_mode<synchronous>, transform_indices = @transform_1, window_bounds = array<i64: 256, 1024>}, {pipeline_mode = #tpu.pipeline_mode<synchronous>, transform_indices = @transform_2, window_bounds = array<i64: 128, 512>}, {pipeline_mode = #tpu.pipeline_mode<synchronous>, transform_indices = @transform_3, window_bounds = array<i64: 128, 512>}, {pipeline_mode = #tpu.pipeline_mode<synchronous>, transform_indices = @transform_4, window_bounds = array<i64: 1, 1024>}, {transform_indices = @transform_5, window_bounds = array<i64: 8, 8, 256>}]} {
    %c0 = arith.constant 0 : index
    %c0_0 = arith.constant 0 : index
    %c0_1 = arith.constant 0 : index
    %0 = vector.load %arg1[%c0, %c0_0, %c0_1] : memref<8x8x256xf32, #tpu.memory_space<vmem>>, vector<8x8x256xf32>
    %1 = vector.shape_cast %0 : vector<8x8x256xf32> to vector<64x256xf32>
    %2 = arith.truncf %1 : vector<64x256xf32> to vector<64x256xbf16>
    %c0_2 = arith.constant 0 : index
    %c0_3 = arith.constant 0 : index
    %3 = vector.load %arg2[%c0_2, %c0_3] : memref<256x1024xbf16, #tpu.memory_space<vmem>>, vector<256x1024xbf16>
    %cst = arith.constant dense<0.000000e+00> : vector<64x1024xf32>
    %4 = tpu.matmul %2, %3, %cst {dimension_numbers = #tpu.dot_dimension_numbers<[1], [0], [0], [1], [0, 0, 1, 1], [], []>} : vector<64x256xbf16>, vector<256x1024xbf16>, vector<64x1024xf32> -> vector<64x1024xf32>
    %c0_4 = arith.constant 0 : index
    %c0_5 = arith.constant 0 : index
    %5 = vector.load %arg5[%c0_4, %c0_5] : memref<1x1024xf32, #tpu.memory_space<vmem>>, vector<1x1024xf32>
    %6 = vector.broadcast %5 : vector<1x1024xf32> to vector<64x1024xf32>
    %7 = arith.addf %4, %6 : vector<64x1024xf32>
    %8 = vector.shape_cast %7 : vector<64x1024xf32> to vector<8x8x1024xf32>
    %c0_6 = arith.constant 0 : index
    %c0_7 = arith.constant 0 : index
    %c0_8 = arith.constant 0 : index
    %9 = vector.load %arg7[%c0_6, %c0_7, %c0_8] : memref<8x8x1024xf32, #tpu.memory_space<vmem>>, vector<8x8x1024xf32>
    tpu.vector_store %arg7[%c0_6, %c0_7, %c0_8], %8 {strides = array<i32>} : memref<8x8x1024xf32, #tpu.memory_space<vmem>>, vector<8x8x1024xf32>,
    %c0_9 = arith.constant 0 : index
    %c0_10 = arith.constant 0 : index
    %10 = vector.load %arg3[%c0_9, %c0_10] : memref<128x512xbf16, #tpu.memory_space<vmem>>, vector<128x512xbf16>
    %c0_11 = arith.constant 0 : index
    %c0_12 = arith.constant 0 : index
    %11 = vector.load %arg4[%c0_11, %c0_12] : memref<128x512xbf16, #tpu.memory_space<vmem>>, vector<128x512xbf16>
    %cst_13 = arith.constant 0.000000e+00 : f32
    %12 = vector.broadcast %cst_13 : f32 to vector<8x128xf32>
    %c0_i32 = arith.constant 0 : i32
    %c7_i32 = arith.constant 7 : i32
    %13 = arith.subi %c7_i32, %c0_i32 : i32
    %14 = arith.index_cast %c0_i32 : i32 to index
    %c0_14 = arith.constant 0 : index
    %c0_15 = arith.constant 0 : index
    %15 = vector.load %arg7[%14, %c0_14, %c0_15] : memref<8x8x1024xf32, #tpu.memory_space<vmem>>, vector<1x8x512xf32>
    %16 = vector.shape_cast %15 : vector<1x8x512xf32> to vector<8x512xf32>
    %17 = arith.truncf %12 : vector<8x128xf32> to vector<8x128xbf16>
    %cst_16 = arith.constant dense<0.000000e+00> : vector<8x512xf32>
    %18 = tpu.matmul %17, %10, %cst_16 {dimension_numbers = #tpu.dot_dimension_numbers<[1], [0], [0], [1], [0, 0, 1, 1], [], []>} : vector<8x128xbf16>, vector<128x512xbf16>, vector<8x512xf32> -> vector<8x512xf32>
    %19 = arith.addf %16, %18 : vector<8x512xf32>
    %20 = arith.index_cast %13 : i32 to index
    %c0_17 = arith.constant 0 : index
    %c512 = arith.constant 512 : index
    %21 = vector.load %arg7[%20, %c0_17, %c512] : memref<8x8x1024xf32, #tpu.memory_space<vmem>>, vector<1x8x512xf32>
    %22 = vector.shape_cast %21 : vector<1x8x512xf32> to vector<8x512xf32>
    %23 = arith.truncf %12 : vector<8x128xf32> to vector<8x128xbf16>
    %cst_18 = arith.constant dense<0.000000e+00> : vector<8x512xf32>
    %24 = tpu.matmul %23, %11, %cst_18 {dimension_numbers = #tpu.dot_dimension_numbers<[1], [0], [0], [1], [0, 0, 1, 1], [], []>} : vector<8x128xbf16>, vector<128x512xbf16>, vector<8x512xf32> -> vector<8x512xf32>
    %25 = arith.addf %22, %24 : vector<8x512xf32>
    %26 = vector.extract_strided_slice %19 {offsets = [0, 0], sizes = [8, 128], strides = [1, 1]} : vector<8x512xf32> to vector<8x128xf32>
    %27 = arith.negf %26 : vector<8x128xf32>
    %28 = math.exp %27 : vector<8x128xf32>
    %cst_19 = arith.constant 1.000000e+00 : f32
    %29 = vector.broadcast %cst_19 : f32 to vector<8x128xf32>
    %30 = arith.addf %29, %28 : vector<8x128xf32>
    %31 = arith.divf %29, %30 : vector<8x128xf32>
    %32 = vector.extract_strided_slice %19 {offsets = [0, 128], sizes = [8, 128], strides = [1, 1]} : vector<8x512xf32> to vector<8x128xf32>
    %33 = arith.negf %32 : vector<8x128xf32>
    %34 = math.exp %33 : vector<8x128xf32>
    %cst_20 = arith.constant 1.000000e+00 : f32
    %35 = vector.broadcast %cst_20 : f32 to vector<8x128xf32>
    %36 = arith.addf %35, %34 : vector<8x128xf32>
    %37 = arith.divf %35, %36 : vector<8x128xf32>
    %38 = vector.extract_strided_slice %19 {offsets = [0, 256], sizes = [8, 128], strides = [1, 1]} : vector<8x512xf32> to vector<8x128xf32>
    %39 = math.tanh %38 : vector<8x128xf32>
    %40 = vector.extract_strided_slice %19 {offsets = [0, 384], sizes = [8, 128], strides = [1, 1]} : vector<8x512xf32> to vector<8x128xf32>
    %41 = arith.negf %40 : vector<8x128xf32>
    %42 = math.exp %41 : vector<8x128xf32>
    %cst_21 = arith.constant 1.000000e+00 : f32
    %43 = vector.broadcast %cst_21 : f32 to vector<8x128xf32>
    %44 = arith.addf %43, %42 : vector<8x128xf32>
    %45 = arith.divf %43, %44 : vector<8x128xf32>
    %46 = arith.mulf %37, %12 : vector<8x128xf32>
    %47 = arith.mulf %31, %39 : vector<8x128xf32>
    %48 = arith.addf %46, %47 : vector<8x128xf32>
    %49 = math.tanh %48 : vector<8x128xf32>
    %50 = arith.mulf %45, %49 : vector<8x128xf32>
    %51 = vector.extract_strided_slice %25 {offsets = [0, 0], sizes = [8, 128], strides = [1, 1]} : vector<8x512xf32> to vector<8x128xf32>
    %52 = arith.negf %51 : vector<8x128xf32>
    %53 = math.exp %52 : vector<8x128xf32>
    %cst_22 = arith.constant 1.000000e+00 : f32
    %54 = vector.broadcast %cst_22 : f32 to vector<8x128xf32>
    %55 = arith.addf %54, %53 : vector<8x128xf32>
    %56 = arith.divf %54, %55 : vector<8x128xf32>
    %57 = vector.extract_strided_slice %25 {offsets = [0, 128], sizes = [8, 128], strides = [1, 1]} : vector<8x512xf32> to vector<8x128xf32>
    %58 = arith.negf %57 : vector<8x128xf32>
    %59 = math.exp %58 : vector<8x128xf32>
    %cst_23 = arith.constant 1.000000e+00 : f32
    %60 = vector.broadcast %cst_23 : f32 to vector<8x128xf32>
    %61 = arith.addf %60, %59 : vector<8x128xf32>
    %62 = arith.divf %60, %61 : vector<8x128xf32>
    %63 = vector.extract_strided_slice %25 {offsets = [0, 256], sizes = [8, 128], strides = [1, 1]} : vector<8x512xf32> to vector<8x128xf32>
    %64 = math.tanh %63 : vector<8x128xf32>
    %65 = vector.extract_strided_slice %25 {offsets = [0, 384], sizes = [8, 128], strides = [1, 1]} : vector<8x512xf32> to vector<8x128xf32>
    %66 = arith.negf %65 : vector<8x128xf32>
    %67 = math.exp %66 : vector<8x128xf32>
    %cst_24 = arith.constant 1.000000e+00 : f32
    %68 = vector.broadcast %cst_24 : f32 to vector<8x128xf32>
    %69 = arith.addf %68, %67 : vector<8x128xf32>
    %70 = arith.divf %68, %69 : vector<8x128xf32>
    %71 = arith.mulf %62, %12 : vector<8x128xf32>
    %72 = arith.mulf %56, %64 : vector<8x128xf32>
    %73 = arith.addf %71, %72 : vector<8x128xf32>
    %74 = math.tanh %73 : vector<8x128xf32>
    %75 = arith.mulf %70, %74 : vector<8x128xf32>
    %76 = arith.index_cast %c0_i32 : i32 to index
    %c0_25 = arith.constant 0 : index
    %c0_26 = arith.constant 0 : index
    %77 = vector.load %arg1[%76, %c0_25, %c0_26] : memref<8x8x256xf32, #tpu.memory_space<vmem>>, vector<1x8x128xf32>
    %78 = vector.shape_cast %77 : vector<1x8x128xf32> to vector<8x128xf32>
    %79 = arith.addf %50, %78 : vector<8x128xf32>
    %80 = arith.index_cast %c0_i32 : i32 to index
    %c0_27 = arith.constant 0 : index
    %c0_28 = arith.constant 0 : index
    %81 = vector.load %arg6[%80, %c0_27, %c0_28] : memref<8x8x256xf32, #tpu.memory_space<vmem>>, vector<1x8x128xf32>
    %82 = vector.shape_cast %81 : vector<1x8x128xf32> to vector<8x128xf32>
    %83 = vector.shape_cast %79 : vector<8x128xf32> to vector<1x8x128xf32>
    tpu.vector_store %arg6[%80, %c0_27, %c0_28], %83 {strides = array<i32>} : memref<8x8x256xf32, #tpu.memory_space<vmem>>, vector<1x8x128xf32>,
    %84 = arith.index_cast %13 : i32 to index
    %c0_29 = arith.constant 0 : index
    %c128 = arith.constant 128 : index
    %85 = vector.load %arg1[%84, %c0_29, %c128] : memref<8x8x256xf32, #tpu.memory_space<vmem>>, vector<1x8x128xf32>
    %86 = vector.shape_cast %85 : vector<1x8x128xf32> to vector<8x128xf32>
    %87 = arith.addf %75, %86 : vector<8x128xf32>
    %88 = arith.index_cast %13 : i32 to index
    %c0_30 = arith.constant 0 : index
    %c128_31 = arith.constant 128 : index
    %89 = vector.load %arg6[%88, %c0_30, %c128_31] : memref<8x8x256xf32, #tpu.memory_space<vmem>>, vector<1x8x128xf32>
    %90 = vector.shape_cast %89 : vector<1x8x128xf32> to vector<8x128xf32>
    %91 = vector.shape_cast %87 : vector<8x128xf32> to vector<1x8x128xf32>
    tpu.vector_store %arg6[%88, %c0_30, %c128_31], %91 {strides = array<i32>} : memref<8x8x256xf32, #tpu.memory_space<vmem>>, vector<1x8x128xf32>,
    %c1_i32 = arith.constant 1 : i32
    %c7_i32_32 = arith.constant 7 : i32
    %92 = arith.subi %c7_i32_32, %c1_i32 : i32
    %93 = arith.index_cast %c1_i32 : i32 to index
    %c0_33 = arith.constant 0 : index
    %c0_34 = arith.constant 0 : index
    %94 = vector.load %arg7[%93, %c0_33, %c0_34] : memref<8x8x1024xf32, #tpu.memory_space<vmem>>, vector<1x8x512xf32>
    %95 = vector.shape_cast %94 : vector<1x8x512xf32> to vector<8x512xf32>
    %96 = arith.truncf %50 : vector<8x128xf32> to vector<8x128xbf16>
    %cst_35 = arith.constant dense<0.000000e+00> : vector<8x512xf32>
    %97 = tpu.matmul %96, %10, %cst_35 {dimension_numbers = #tpu.dot_dimension_numbers<[1], [0], [0], [1], [0, 0, 1, 1], [], []>} : vector<8x128xbf16>, vector<128x512xbf16>, vector<8x512xf32> -> vector<8x512xf32>
    %98 = arith.addf %95, %97 : vector<8x512xf32>
    %99 = arith.index_cast %92 : i32 to index
    %c0_36 = arith.constant 0 : index
    %c512_37 = arith.constant 512 : index
    %100 = vector.load %arg7[%99, %c0_36, %c512_37] : memref<8x8x1024xf32, #tpu.memory_space<vmem>>, vector<1x8x512xf32>
    %101 = vector.shape_cast %100 : vector<1x8x512xf32> to vector<8x512xf32>
    %102 = arith.truncf %75 : vector<8x128xf32> to vector<8x128xbf16>
    %cst_38 = arith.constant dense<0.000000e+00> : vector<8x512xf32>
    %103 = tpu.matmul %102, %11, %cst_38 {dimension_numbers = #tpu.dot_dimension_numbers<[1], [0], [0], [1], [0, 0, 1, 1], [], []>} : vector<8x128xbf16>, vector<128x512xbf16>, vector<8x512xf32> -> vector<8x512xf32>
    %104 = arith.addf %101, %103 : vector<8x512xf32>
    %105 = vector.extract_strided_slice %98 {offsets = [0, 0], sizes = [8, 128], strides = [1, 1]} : vector<8x512xf32> to vector<8x128xf32>
    %106 = arith.negf %105 : vector<8x128xf32>
    %107 = math.exp %106 : vector<8x128xf32>
    %cst_39 = arith.constant 1.000000e+00 : f32
    %108 = vector.broadcast %cst_39 : f32 to vector<8x128xf32>
    %109 = arith.addf %108, %107 : vector<8x128xf32>
    %110 = arith.divf %108, %109 : vector<8x128xf32>
    %111 = vector.extract_strided_slice %98 {offsets = [0, 128], sizes = [8, 128], strides = [1, 1]} : vector<8x512xf32> to vector<8x128xf32>
    %112 = arith.negf %111 : vector<8x128xf32>
    %113 = math.exp %112 : vector<8x128xf32>
    %cst_40 = arith.constant 1.000000e+00 : f32
    %114 = vector.broadcast %cst_40 : f32 to vector<8x128xf32>
    %115 = arith.addf %114, %113 : vector<8x128xf32>
    %116 = arith.divf %114, %115 : vector<8x128xf32>
    %117 = vector.extract_strided_slice %98 {offsets = [0, 256], sizes = [8, 128], strides = [1, 1]} : vector<8x512xf32> to vector<8x128xf32>
    %118 = math.tanh %117 : vector<8x128xf32>
    %119 = vector.extract_strided_slice %98 {offsets = [0, 384], sizes = [8, 128], strides = [1, 1]} : vector<8x512xf32> to vector<8x128xf32>
    %120 = arith.negf %119 : vector<8x128xf32>
    %121 = math.exp %120 : vector<8x128xf32>
    %cst_41 = arith.constant 1.000000e+00 : f32
    %122 = vector.broadcast %cst_41 : f32 to vector<8x128xf32>
    %123 = arith.addf %122, %121 : vector<8x128xf32>
    %124 = arith.divf %122, %123 : vector<8x128xf32>
    %125 = arith.mulf %116, %48 : vector<8x128xf32>
    %126 = arith.mulf %110, %118 : vector<8x128xf32>
    %127 = arith.addf %125, %126 : vector<8x128xf32>
    %128 = math.tanh %127 : vector<8x128xf32>
    %129 = arith.mulf %124, %128 : vector<8x128xf32>
    %130 = vector.extract_strided_slice %104 {offsets = [0, 0], sizes = [8, 128], strides = [1, 1]} : vector<8x512xf32> to vector<8x128xf32>
    %131 = arith.negf %130 : vector<8x128xf32>
    %132 = math.exp %131 : vector<8x128xf32>
    %cst_42 = arith.constant 1.000000e+00 : f32
    %133 = vector.broadcast %cst_42 : f32 to vector<8x128xf32>
    %134 = arith.addf %133, %132 : vector<8x128xf32>
    %135 = arith.divf %133, %134 : vector<8x128xf32>
    %136 = vector.extract_strided_slice %104 {offsets = [0, 128], sizes = [8, 128], strides = [1, 1]} : vector<8x512xf32> to vector<8x128xf32>
    %137 = arith.negf %136 : vector<8x128xf32>
    %138 = math.exp %137 : vector<8x128xf32>
    %cst_43 = arith.constant 1.000000e+00 : f32
    %139 = vector.broadcast %cst_43 : f32 to vector<8x128xf32>
    %140 = arith.addf %139, %138 : vector<8x128xf32>
    %141 = arith.divf %139, %140 : vector<8x128xf32>
    %142 = vector.extract_strided_slice %104 {offsets = [0, 256], sizes = [8, 128], strides = [1, 1]} : vector<8x512xf32> to vector<8x128xf32>
    %143 = math.tanh %142 : vector<8x128xf32>
    %144 = vector.extract_strided_slice %104 {offsets = [0, 384], sizes = [8, 128], strides = [1, 1]} : vector<8x512xf32> to vector<8x128xf32>
    %145 = arith.negf %144 : vector<8x128xf32>
    %146 = math.exp %145 : vector<8x128xf32>
    %cst_44 = arith.constant 1.000000e+00 : f32
    %147 = vector.broadcast %cst_44 : f32 to vector<8x128xf32>
    %148 = arith.addf %147, %146 : vector<8x128xf32>
    %149 = arith.divf %147, %148 : vector<8x128xf32>
    %150 = arith.mulf %141, %73 : vector<8x128xf32>
    %151 = arith.mulf %135, %143 : vector<8x128xf32>
    %152 = arith.addf %150, %151 : vector<8x128xf32>
    %153 = math.tanh %152 : vector<8x128xf32>
    %154 = arith.mulf %149, %153 : vector<8x128xf32>
    %155 = arith.index_cast %c1_i32 : i32 to index
    %c0_45 = arith.constant 0 : index
    %c0_46 = arith.constant 0 : index
    %156 = vector.load %arg1[%155, %c0_45, %c0_46] : memref<8x8x256xf32, #tpu.memory_space<vmem>>, vector<1x8x128xf32>
    %157 = vector.shape_cast %156 : vector<1x8x128xf32> to vector<8x128xf32>
    %158 = arith.addf %129, %157 : vector<8x128xf32>
    %159 = arith.index_cast %c1_i32 : i32 to index
    %c0_47 = arith.constant 0 : index
    %c0_48 = arith.constant 0 : index
    %160 = vector.load %arg6[%159, %c0_47, %c0_48] : memref<8x8x256xf32, #tpu.memory_space<vmem>>, vector<1x8x128xf32>
    %161 = vector.shape_cast %160 : vector<1x8x128xf32> to vector<8x128xf32>
    %162 = vector.shape_cast %158 : vector<8x128xf32> to vector<1x8x128xf32>
    tpu.vector_store %arg6[%159, %c0_47, %c0_48], %162 {strides = array<i32>} : memref<8x8x256xf32, #tpu.memory_space<vmem>>, vector<1x8x128xf32>,
    %163 = arith.index_cast %92 : i32 to index
    %c0_49 = arith.constant 0 : index
    %c128_50 = arith.constant 128 : index
    %164 = vector.load %arg1[%163, %c0_49, %c128_50] : memref<8x8x256xf32, #tpu.memory_space<vmem>>, vector<1x8x128xf32>
    %165 = vector.shape_cast %164 : vector<1x8x128xf32> to vector<8x128xf32>
    %166 = arith.addf %154, %165 : vector<8x128xf32>
    %167 = arith.index_cast %92 : i32 to index
    %c0_51 = arith.constant 0 : index
    %c128_52 = arith.constant 128 : index
    %168 = vector.load %arg6[%167, %c0_51, %c128_52] : memref<8x8x256xf32, #tpu.memory_space<vmem>>, vector<1x8x128xf32>
    %169 = vector.shape_cast %168 : vector<1x8x128xf32> to vector<8x128xf32>
    %170 = vector.shape_cast %166 : vector<8x128xf32> to vector<1x8x128xf32>
    tpu.vector_store %arg6[%167, %c0_51, %c128_52], %170 {strides = array<i32>} : memref<8x8x256xf32, #tpu.memory_space<vmem>>, vector<1x8x128xf32>,
    %c2_i32 = arith.constant 2 : i32
    %c7_i32_53 = arith.constant 7 : i32
    %171 = arith.subi %c7_i32_53, %c2_i32 : i32
    %172 = arith.index_cast %c2_i32 : i32 to index
    %c0_54 = arith.constant 0 : index
    %c0_55 = arith.constant 0 : index
    %173 = vector.load %arg7[%172, %c0_54, %c0_55] : memref<8x8x1024xf32, #tpu.memory_space<vmem>>, vector<1x8x512xf32>
    %174 = vector.shape_cast %173 : vector<1x8x512xf32> to vector<8x512xf32>
    %175 = arith.truncf %129 : vector<8x128xf32> to vector<8x128xbf16>
    %cst_56 = arith.constant dense<0.000000e+00> : vector<8x512xf32>
    %176 = tpu.matmul %175, %10, %cst_56 {dimension_numbers = #tpu.dot_dimension_numbers<[1], [0], [0], [1], [0, 0, 1, 1], [], []>} : vector<8x128xbf16>, vector<128x512xbf16>, vector<8x512xf32> -> vector<8x512xf32>
    %177 = arith.addf %174, %176 : vector<8x512xf32>
    %178 = arith.index_cast %171 : i32 to index
    %c0_57 = arith.constant 0 : index
    %c512_58 = arith.constant 512 : index
    %179 = vector.load %arg7[%178, %c0_57, %c512_58] : memref<8x8x1024xf32, #tpu.memory_space<vmem>>, vector<1x8x512xf32>
    %180 = vector.shape_cast %179 : vector<1x8x512xf32> to vector<8x512xf32>
    %181 = arith.truncf %154 : vector<8x128xf32> to vector<8x128xbf16>
    %cst_59 = arith.constant dense<0.000000e+00> : vector<8x512xf32>
    %182 = tpu.matmul %181, %11, %cst_59 {dimension_numbers = #tpu.dot_dimension_numbers<[1], [0], [0], [1], [0, 0, 1, 1], [], []>} : vector<8x128xbf16>, vector<128x512xbf16>, vector<8x512xf32> -> vector<8x512xf32>
    %183 = arith.addf %180, %182 : vector<8x512xf32>
    %184 = vector.extract_strided_slice %177 {offsets = [0, 0], sizes = [8, 128], strides = [1, 1]} : vector<8x512xf32> to vector<8x128xf32>
    %185 = arith.negf %184 : vector<8x128xf32>
    %186 = math.exp %185 : vector<8x128xf32>
    %cst_60 = arith.constant 1.000000e+00 : f32
    %187 = vector.broadcast %cst_60 : f32 to vector<8x128xf32>
    %188 = arith.addf %187, %186 : vector<8x128xf32>
    %189 = arith.divf %187, %188 : vector<8x128xf32>
    %190 = vector.extract_strided_slice %177 {offsets = [0, 128], sizes = [8, 128], strides = [1, 1]} : vector<8x512xf32> to vector<8x128xf32>
    %191 = arith.negf %190 : vector<8x128xf32>
    %192 = math.exp %191 : vector<8x128xf32>
    %cst_61 = arith.constant 1.000000e+00 : f32
    %193 = vector.broadcast %cst_61 : f32 to vector<8x128xf32>
    %194 = arith.addf %193, %192 : vector<8x128xf32>
    %195 = arith.divf %193, %194 : vector<8x128xf32>
    %196 = vector.extract_strided_slice %177 {offsets = [0, 256], sizes = [8, 128], strides = [1, 1]} : vector<8x512xf32> to vector<8x128xf32>
    %197 = math.tanh %196 : vector<8x128xf32>
    %198 = vector.extract_strided_slice %177 {offsets = [0, 384], sizes = [8, 128], strides = [1, 1]} : vector<8x512xf32> to vector<8x128xf32>
    %199 = arith.negf %198 : vector<8x128xf32>
    %200 = math.exp %199 : vector<8x128xf32>
    %cst_62 = arith.constant 1.000000e+00 : f32
    %201 = vector.broadcast %cst_62 : f32 to vector<8x128xf32>
    %202 = arith.addf %201, %200 : vector<8x128xf32>
    %203 = arith.divf %201, %202 : vector<8x128xf32>
    %204 = arith.mulf %195, %127 : vector<8x128xf32>
    %205 = arith.mulf %189, %197 : vector<8x128xf32>
    %206 = arith.addf %204, %205 : vector<8x128xf32>
    %207 = math.tanh %206 : vector<8x128xf32>
    %208 = arith.mulf %203, %207 : vector<8x128xf32>
    %209 = vector.extract_strided_slice %183 {offsets = [0, 0], sizes = [8, 128], strides = [1, 1]} : vector<8x512xf32> to vector<8x128xf32>
    %210 = arith.negf %209 : vector<8x128xf32>
    %211 = math.exp %210 : vector<8x128xf32>
    %cst_63 = arith.constant 1.000000e+00 : f32
    %212 = vector.broadcast %cst_63 : f32 to vector<8x128xf32>
    %213 = arith.addf %212, %211 : vector<8x128xf32>
    %214 = arith.divf %212, %213 : vector<8x128xf32>
    %215 = vector.extract_strided_slice %183 {offsets = [0, 128], sizes = [8, 128], strides = [1, 1]} : vector<8x512xf32> to vector<8x128xf32>
    %216 = arith.negf %215 : vector<8x128xf32>
    %217 = math.exp %216 : vector<8x128xf32>
    %cst_64 = arith.constant 1.000000e+00 : f32
    %218 = vector.broadcast %cst_64 : f32 to vector<8x128xf32>
    %219 = arith.addf %218, %217 : vector<8x128xf32>
    %220 = arith.divf %218, %219 : vector<8x128xf32>
    %221 = vector.extract_strided_slice %183 {offsets = [0, 256], sizes = [8, 128], strides = [1, 1]} : vector<8x512xf32> to vector<8x128xf32>
    %222 = math.tanh %221 : vector<8x128xf32>
    %223 = vector.extract_strided_slice %183 {offsets = [0, 384], sizes = [8, 128], strides = [1, 1]} : vector<8x512xf32> to vector<8x128xf32>
    %224 = arith.negf %223 : vector<8x128xf32>
    %225 = math.exp %224 : vector<8x128xf32>
    %cst_65 = arith.constant 1.000000e+00 : f32
    %226 = vector.broadcast %cst_65 : f32 to vector<8x128xf32>
    %227 = arith.addf %226, %225 : vector<8x128xf32>
    %228 = arith.divf %226, %227 : vector<8x128xf32>
    %229 = arith.mulf %220, %152 : vector<8x128xf32>
    %230 = arith.mulf %214, %222 : vector<8x128xf32>
    %231 = arith.addf %229, %230 : vector<8x128xf32>
    %232 = math.tanh %231 : vector<8x128xf32>
    %233 = arith.mulf %228, %232 : vector<8x128xf32>
    %234 = arith.index_cast %c2_i32 : i32 to index
    %c0_66 = arith.constant 0 : index
    %c0_67 = arith.constant 0 : index
    %235 = vector.load %arg1[%234, %c0_66, %c0_67] : memref<8x8x256xf32, #tpu.memory_space<vmem>>, vector<1x8x128xf32>
    %236 = vector.shape_cast %235 : vector<1x8x128xf32> to vector<8x128xf32>
    %237 = arith.addf %208, %236 : vector<8x128xf32>
    %238 = arith.index_cast %c2_i32 : i32 to index
    %c0_68 = arith.constant 0 : index
    %c0_69 = arith.constant 0 : index
    %239 = vector.load %arg6[%238, %c0_68, %c0_69] : memref<8x8x256xf32, #tpu.memory_space<vmem>>, vector<1x8x128xf32>
    %240 = vector.shape_cast %239 : vector<1x8x128xf32> to vector<8x128xf32>
    %241 = vector.shape_cast %237 : vector<8x128xf32> to vector<1x8x128xf32>
    tpu.vector_store %arg6[%238, %c0_68, %c0_69], %241 {strides = array<i32>} : memref<8x8x256xf32, #tpu.memory_space<vmem>>, vector<1x8x128xf32>,
    %242 = arith.index_cast %171 : i32 to index
    %c0_70 = arith.constant 0 : index
    %c128_71 = arith.constant 128 : index
    %243 = vector.load %arg1[%242, %c0_70, %c128_71] : memref<8x8x256xf32, #tpu.memory_space<vmem>>, vector<1x8x128xf32>
    %244 = vector.shape_cast %243 : vector<1x8x128xf32> to vector<8x128xf32>
    %245 = arith.addf %233, %244 : vector<8x128xf32>
    %246 = arith.index_cast %171 : i32 to index
    %c0_72 = arith.constant 0 : index
    %c128_73 = arith.constant 128 : index
    %247 = vector.load %arg6[%246, %c0_72, %c128_73] : memref<8x8x256xf32, #tpu.memory_space<vmem>>, vector<1x8x128xf32>
    %248 = vector.shape_cast %247 : vector<1x8x128xf32> to vector<8x128xf32>
    %249 = vector.shape_cast %245 : vector<8x128xf32> to vector<1x8x128xf32>
    tpu.vector_store %arg6[%246, %c0_72, %c128_73], %249 {strides = array<i32>} : memref<8x8x256xf32, #tpu.memory_space<vmem>>, vector<1x8x128xf32>,
    %c3_i32 = arith.constant 3 : i32
    %c7_i32_74 = arith.constant 7 : i32
    %250 = arith.subi %c7_i32_74, %c3_i32 : i32
    %251 = arith.index_cast %c3_i32 : i32 to index
    %c0_75 = arith.constant 0 : index
    %c0_76 = arith.constant 0 : index
    %252 = vector.load %arg7[%251, %c0_75, %c0_76] : memref<8x8x1024xf32, #tpu.memory_space<vmem>>, vector<1x8x512xf32>
    %253 = vector.shape_cast %252 : vector<1x8x512xf32> to vector<8x512xf32>
    %254 = arith.truncf %208 : vector<8x128xf32> to vector<8x128xbf16>
    %cst_77 = arith.constant dense<0.000000e+00> : vector<8x512xf32>
    %255 = tpu.matmul %254, %10, %cst_77 {dimension_numbers = #tpu.dot_dimension_numbers<[1], [0], [0], [1], [0, 0, 1, 1], [], []>} : vector<8x128xbf16>, vector<128x512xbf16>, vector<8x512xf32> -> vector<8x512xf32>
    %256 = arith.addf %253, %255 : vector<8x512xf32>
    %257 = arith.index_cast %250 : i32 to index
    %c0_78 = arith.constant 0 : index
    %c512_79 = arith.constant 512 : index
    %258 = vector.load %arg7[%257, %c0_78, %c512_79] : memref<8x8x1024xf32, #tpu.memory_space<vmem>>, vector<1x8x512xf32>
    %259 = vector.shape_cast %258 : vector<1x8x512xf32> to vector<8x512xf32>
    %260 = arith.truncf %233 : vector<8x128xf32> to vector<8x128xbf16>
    %cst_80 = arith.constant dense<0.000000e+00> : vector<8x512xf32>
    %261 = tpu.matmul %260, %11, %cst_80 {dimension_numbers = #tpu.dot_dimension_numbers<[1], [0], [0], [1], [0, 0, 1, 1], [], []>} : vector<8x128xbf16>, vector<128x512xbf16>, vector<8x512xf32> -> vector<8x512xf32>
    %262 = arith.addf %259, %261 : vector<8x512xf32>
    %263 = vector.extract_strided_slice %256 {offsets = [0, 0], sizes = [8, 128], strides = [1, 1]} : vector<8x512xf32> to vector<8x128xf32>
    %264 = arith.negf %263 : vector<8x128xf32>
    %265 = math.exp %264 : vector<8x128xf32>
    %cst_81 = arith.constant 1.000000e+00 : f32
    %266 = vector.broadcast %cst_81 : f32 to vector<8x128xf32>
    %267 = arith.addf %266, %265 : vector<8x128xf32>
    %268 = arith.divf %266, %267 : vector<8x128xf32>
    %269 = vector.extract_strided_slice %256 {offsets = [0, 128], sizes = [8, 128], strides = [1, 1]} : vector<8x512xf32> to vector<8x128xf32>
    %270 = arith.negf %269 : vector<8x128xf32>
    %271 = math.exp %270 : vector<8x128xf32>
    %cst_82 = arith.constant 1.000000e+00 : f32
    %272 = vector.broadcast %cst_82 : f32 to vector<8x128xf32>
    %273 = arith.addf %272, %271 : vector<8x128xf32>
    %274 = arith.divf %272, %273 : vector<8x128xf32>
    %275 = vector.extract_strided_slice %256 {offsets = [0, 256], sizes = [8, 128], strides = [1, 1]} : vector<8x512xf32> to vector<8x128xf32>
    %276 = math.tanh %275 : vector<8x128xf32>
    %277 = vector.extract_strided_slice %256 {offsets = [0, 384], sizes = [8, 128], strides = [1, 1]} : vector<8x512xf32> to vector<8x128xf32>
    %278 = arith.negf %277 : vector<8x128xf32>
    %279 = math.exp %278 : vector<8x128xf32>
    %cst_83 = arith.constant 1.000000e+00 : f32
    %280 = vector.broadcast %cst_83 : f32 to vector<8x128xf32>
    %281 = arith.addf %280, %279 : vector<8x128xf32>
    %282 = arith.divf %280, %281 : vector<8x128xf32>
    %283 = arith.mulf %274, %206 : vector<8x128xf32>
    %284 = arith.mulf %268, %276 : vector<8x128xf32>
    %285 = arith.addf %283, %284 : vector<8x128xf32>
    %286 = math.tanh %285 : vector<8x128xf32>
    %287 = arith.mulf %282, %286 : vector<8x128xf32>
    %288 = vector.extract_strided_slice %262 {offsets = [0, 0], sizes = [8, 128], strides = [1, 1]} : vector<8x512xf32> to vector<8x128xf32>
    %289 = arith.negf %288 : vector<8x128xf32>
    %290 = math.exp %289 : vector<8x128xf32>
    %cst_84 = arith.constant 1.000000e+00 : f32
    %291 = vector.broadcast %cst_84 : f32 to vector<8x128xf32>
    %292 = arith.addf %291, %290 : vector<8x128xf32>
    %293 = arith.divf %291, %292 : vector<8x128xf32>
    %294 = vector.extract_strided_slice %262 {offsets = [0, 128], sizes = [8, 128], strides = [1, 1]} : vector<8x512xf32> to vector<8x128xf32>
    %295 = arith.negf %294 : vector<8x128xf32>
    %296 = math.exp %295 : vector<8x128xf32>
    %cst_85 = arith.constant 1.000000e+00 : f32
    %297 = vector.broadcast %cst_85 : f32 to vector<8x128xf32>
    %298 = arith.addf %297, %296 : vector<8x128xf32>
    %299 = arith.divf %297, %298 : vector<8x128xf32>
    %300 = vector.extract_strided_slice %262 {offsets = [0, 256], sizes = [8, 128], strides = [1, 1]} : vector<8x512xf32> to vector<8x128xf32>
    %301 = math.tanh %300 : vector<8x128xf32>
    %302 = vector.extract_strided_slice %262 {offsets = [0, 384], sizes = [8, 128], strides = [1, 1]} : vector<8x512xf32> to vector<8x128xf32>
    %303 = arith.negf %302 : vector<8x128xf32>
    %304 = math.exp %303 : vector<8x128xf32>
    %cst_86 = arith.constant 1.000000e+00 : f32
    %305 = vector.broadcast %cst_86 : f32 to vector<8x128xf32>
    %306 = arith.addf %305, %304 : vector<8x128xf32>
    %307 = arith.divf %305, %306 : vector<8x128xf32>
    %308 = arith.mulf %299, %231 : vector<8x128xf32>
    %309 = arith.mulf %293, %301 : vector<8x128xf32>
    %310 = arith.addf %308, %309 : vector<8x128xf32>
    %311 = math.tanh %310 : vector<8x128xf32>
    %312 = arith.mulf %307, %311 : vector<8x128xf32>
    %313 = arith.index_cast %c3_i32 : i32 to index
    %c0_87 = arith.constant 0 : index
    %c0_88 = arith.constant 0 : index
    %314 = vector.load %arg1[%313, %c0_87, %c0_88] : memref<8x8x256xf32, #tpu.memory_space<vmem>>, vector<1x8x128xf32>
    %315 = vector.shape_cast %314 : vector<1x8x128xf32> to vector<8x128xf32>
    %316 = arith.addf %287, %315 : vector<8x128xf32>
    %317 = arith.index_cast %c3_i32 : i32 to index
    %c0_89 = arith.constant 0 : index
    %c0_90 = arith.constant 0 : index
    %318 = vector.load %arg6[%317, %c0_89, %c0_90] : memref<8x8x256xf32, #tpu.memory_space<vmem>>, vector<1x8x128xf32>
    %319 = vector.shape_cast %318 : vector<1x8x128xf32> to vector<8x128xf32>
    %320 = vector.shape_cast %316 : vector<8x128xf32> to vector<1x8x128xf32>
    tpu.vector_store %arg6[%317, %c0_89, %c0_90], %320 {strides = array<i32>} : memref<8x8x256xf32, #tpu.memory_space<vmem>>, vector<1x8x128xf32>,
    %321 = arith.index_cast %250 : i32 to index
    %c0_91 = arith.constant 0 : index
    %c128_92 = arith.constant 128 : index
    %322 = vector.load %arg1[%321, %c0_91, %c128_92] : memref<8x8x256xf32, #tpu.memory_space<vmem>>, vector<1x8x128xf32>
    %323 = vector.shape_cast %322 : vector<1x8x128xf32> to vector<8x128xf32>
    %324 = arith.addf %312, %323 : vector<8x128xf32>
    %325 = arith.index_cast %250 : i32 to index
    %c0_93 = arith.constant 0 : index
    %c128_94 = arith.constant 128 : index
    %326 = vector.load %arg6[%325, %c0_93, %c128_94] : memref<8x8x256xf32, #tpu.memory_space<vmem>>, vector<1x8x128xf32>
    %327 = vector.shape_cast %326 : vector<1x8x128xf32> to vector<8x128xf32>
    %328 = vector.shape_cast %324 : vector<8x128xf32> to vector<1x8x128xf32>
    tpu.vector_store %arg6[%325, %c0_93, %c128_94], %328 {strides = array<i32>} : memref<8x8x256xf32, #tpu.memory_space<vmem>>, vector<1x8x128xf32>,
    %c4_i32 = arith.constant 4 : i32
    %c7_i32_95 = arith.constant 7 : i32
    %329 = arith.subi %c7_i32_95, %c4_i32 : i32
    %330 = arith.index_cast %c4_i32 : i32 to index
    %c0_96 = arith.constant 0 : index
    %c0_97 = arith.constant 0 : index
    %331 = vector.load %arg7[%330, %c0_96, %c0_97] : memref<8x8x1024xf32, #tpu.memory_space<vmem>>, vector<1x8x512xf32>
    %332 = vector.shape_cast %331 : vector<1x8x512xf32> to vector<8x512xf32>
    %333 = arith.truncf %287 : vector<8x128xf32> to vector<8x128xbf16>
    %cst_98 = arith.constant dense<0.000000e+00> : vector<8x512xf32>
    %334 = tpu.matmul %333, %10, %cst_98 {dimension_numbers = #tpu.dot_dimension_numbers<[1], [0], [0], [1], [0, 0, 1, 1], [], []>} : vector<8x128xbf16>, vector<128x512xbf16>, vector<8x512xf32> -> vector<8x512xf32>
    %335 = arith.addf %332, %334 : vector<8x512xf32>
    %336 = arith.index_cast %329 : i32 to index
    %c0_99 = arith.constant 0 : index
    %c512_100 = arith.constant 512 : index
    %337 = vector.load %arg7[%336, %c0_99, %c512_100] : memref<8x8x1024xf32, #tpu.memory_space<vmem>>, vector<1x8x512xf32>
    %338 = vector.shape_cast %337 : vector<1x8x512xf32> to vector<8x512xf32>
    %339 = arith.truncf %312 : vector<8x128xf32> to vector<8x128xbf16>
    %cst_101 = arith.constant dense<0.000000e+00> : vector<8x512xf32>
    %340 = tpu.matmul %339, %11, %cst_101 {dimension_numbers = #tpu.dot_dimension_numbers<[1], [0], [0], [1], [0, 0, 1, 1], [], []>} : vector<8x128xbf16>, vector<128x512xbf16>, vector<8x512xf32> -> vector<8x512xf32>
    %341 = arith.addf %338, %340 : vector<8x512xf32>
    %342 = vector.extract_strided_slice %335 {offsets = [0, 0], sizes = [8, 128], strides = [1, 1]} : vector<8x512xf32> to vector<8x128xf32>
    %343 = arith.negf %342 : vector<8x128xf32>
    %344 = math.exp %343 : vector<8x128xf32>
    %cst_102 = arith.constant 1.000000e+00 : f32
    %345 = vector.broadcast %cst_102 : f32 to vector<8x128xf32>
    %346 = arith.addf %345, %344 : vector<8x128xf32>
    %347 = arith.divf %345, %346 : vector<8x128xf32>
    %348 = vector.extract_strided_slice %335 {offsets = [0, 128], sizes = [8, 128], strides = [1, 1]} : vector<8x512xf32> to vector<8x128xf32>
    %349 = arith.negf %348 : vector<8x128xf32>
    %350 = math.exp %349 : vector<8x128xf32>
    %cst_103 = arith.constant 1.000000e+00 : f32
    %351 = vector.broadcast %cst_103 : f32 to vector<8x128xf32>
    %352 = arith.addf %351, %350 : vector<8x128xf32>
    %353 = arith.divf %351, %352 : vector<8x128xf32>
    %354 = vector.extract_strided_slice %335 {offsets = [0, 256], sizes = [8, 128], strides = [1, 1]} : vector<8x512xf32> to vector<8x128xf32>
    %355 = math.tanh %354 : vector<8x128xf32>
    %356 = vector.extract_strided_slice %335 {offsets = [0, 384], sizes = [8, 128], strides = [1, 1]} : vector<8x512xf32> to vector<8x128xf32>
    %357 = arith.negf %356 : vector<8x128xf32>
    %358 = math.exp %357 : vector<8x128xf32>
    %cst_104 = arith.constant 1.000000e+00 : f32
    %359 = vector.broadcast %cst_104 : f32 to vector<8x128xf32>
    %360 = arith.addf %359, %358 : vector<8x128xf32>
    %361 = arith.divf %359, %360 : vector<8x128xf32>
    %362 = arith.mulf %353, %285 : vector<8x128xf32>
    %363 = arith.mulf %347, %355 : vector<8x128xf32>
    %364 = arith.addf %362, %363 : vector<8x128xf32>
    %365 = math.tanh %364 : vector<8x128xf32>
    %366 = arith.mulf %361, %365 : vector<8x128xf32>
    %367 = vector.extract_strided_slice %341 {offsets = [0, 0], sizes = [8, 128], strides = [1, 1]} : vector<8x512xf32> to vector<8x128xf32>
    %368 = arith.negf %367 : vector<8x128xf32>
    %369 = math.exp %368 : vector<8x128xf32>
    %cst_105 = arith.constant 1.000000e+00 : f32
    %370 = vector.broadcast %cst_105 : f32 to vector<8x128xf32>
    %371 = arith.addf %370, %369 : vector<8x128xf32>
    %372 = arith.divf %370, %371 : vector<8x128xf32>
    %373 = vector.extract_strided_slice %341 {offsets = [0, 128], sizes = [8, 128], strides = [1, 1]} : vector<8x512xf32> to vector<8x128xf32>
    %374 = arith.negf %373 : vector<8x128xf32>
    %375 = math.exp %374 : vector<8x128xf32>
    %cst_106 = arith.constant 1.000000e+00 : f32
    %376 = vector.broadcast %cst_106 : f32 to vector<8x128xf32>
    %377 = arith.addf %376, %375 : vector<8x128xf32>
    %378 = arith.divf %376, %377 : vector<8x128xf32>
    %379 = vector.extract_strided_slice %341 {offsets = [0, 256], sizes = [8, 128], strides = [1, 1]} : vector<8x512xf32> to vector<8x128xf32>
    %380 = math.tanh %379 : vector<8x128xf32>
    %381 = vector.extract_strided_slice %341 {offsets = [0, 384], sizes = [8, 128], strides = [1, 1]} : vector<8x512xf32> to vector<8x128xf32>
    %382 = arith.negf %381 : vector<8x128xf32>
    %383 = math.exp %382 : vector<8x128xf32>
    %cst_107 = arith.constant 1.000000e+00 : f32
    %384 = vector.broadcast %cst_107 : f32 to vector<8x128xf32>
    %385 = arith.addf %384, %383 : vector<8x128xf32>
    %386 = arith.divf %384, %385 : vector<8x128xf32>
    %387 = arith.mulf %378, %310 : vector<8x128xf32>
    %388 = arith.mulf %372, %380 : vector<8x128xf32>
    %389 = arith.addf %387, %388 : vector<8x128xf32>
    %390 = math.tanh %389 : vector<8x128xf32>
    %391 = arith.mulf %386, %390 : vector<8x128xf32>
    %392 = arith.index_cast %c4_i32 : i32 to index
    %c0_108 = arith.constant 0 : index
    %c0_109 = arith.constant 0 : index
    %393 = vector.load %arg1[%392, %c0_108, %c0_109] : memref<8x8x256xf32, #tpu.memory_space<vmem>>, vector<1x8x128xf32>
    %394 = vector.shape_cast %393 : vector<1x8x128xf32> to vector<8x128xf32>
    %395 = arith.addf %366, %394 : vector<8x128xf32>
    %396 = arith.index_cast %c4_i32 : i32 to index
    %c0_110 = arith.constant 0 : index
    %c0_111 = arith.constant 0 : index
    %397 = vector.load %arg6[%396, %c0_110, %c0_111] : memref<8x8x256xf32, #tpu.memory_space<vmem>>, vector<1x8x128xf32>
    %398 = vector.shape_cast %397 : vector<1x8x128xf32> to vector<8x128xf32>
    %399 = vector.shape_cast %395 : vector<8x128xf32> to vector<1x8x128xf32>
    tpu.vector_store %arg6[%396, %c0_110, %c0_111], %399 {strides = array<i32>} : memref<8x8x256xf32, #tpu.memory_space<vmem>>, vector<1x8x128xf32>,
    %400 = arith.index_cast %329 : i32 to index
    %c0_112 = arith.constant 0 : index
    %c128_113 = arith.constant 128 : index
    %401 = vector.load %arg1[%400, %c0_112, %c128_113] : memref<8x8x256xf32, #tpu.memory_space<vmem>>, vector<1x8x128xf32>
    %402 = vector.shape_cast %401 : vector<1x8x128xf32> to vector<8x128xf32>
    %403 = arith.addf %391, %402 : vector<8x128xf32>
    %404 = arith.index_cast %329 : i32 to index
    %c0_114 = arith.constant 0 : index
    %c128_115 = arith.constant 128 : index
    %405 = vector.load %arg6[%404, %c0_114, %c128_115] : memref<8x8x256xf32, #tpu.memory_space<vmem>>, vector<1x8x128xf32>
    %406 = vector.shape_cast %405 : vector<1x8x128xf32> to vector<8x128xf32>
    %407 = vector.shape_cast %403 : vector<8x128xf32> to vector<1x8x128xf32>
    tpu.vector_store %arg6[%404, %c0_114, %c128_115], %407 {strides = array<i32>} : memref<8x8x256xf32, #tpu.memory_space<vmem>>, vector<1x8x128xf32>,
    %c5_i32 = arith.constant 5 : i32
    %c7_i32_116 = arith.constant 7 : i32
    %408 = arith.subi %c7_i32_116, %c5_i32 : i32
    %409 = arith.index_cast %c5_i32 : i32 to index
    %c0_117 = arith.constant 0 : index
    %c0_118 = arith.constant 0 : index
    %410 = vector.load %arg7[%409, %c0_117, %c0_118] : memref<8x8x1024xf32, #tpu.memory_space<vmem>>, vector<1x8x512xf32>
    %411 = vector.shape_cast %410 : vector<1x8x512xf32> to vector<8x512xf32>
    %412 = arith.truncf %366 : vector<8x128xf32> to vector<8x128xbf16>
    %cst_119 = arith.constant dense<0.000000e+00> : vector<8x512xf32>
    %413 = tpu.matmul %412, %10, %cst_119 {dimension_numbers = #tpu.dot_dimension_numbers<[1], [0], [0], [1], [0, 0, 1, 1], [], []>} : vector<8x128xbf16>, vector<128x512xbf16>, vector<8x512xf32> -> vector<8x512xf32>
    %414 = arith.addf %411, %413 : vector<8x512xf32>
    %415 = arith.index_cast %408 : i32 to index
    %c0_120 = arith.constant 0 : index
    %c512_121 = arith.constant 512 : index
    %416 = vector.load %arg7[%415, %c0_120, %c512_121] : memref<8x8x1024xf32, #tpu.memory_space<vmem>>, vector<1x8x512xf32>
    %417 = vector.shape_cast %416 : vector<1x8x512xf32> to vector<8x512xf32>
    %418 = arith.truncf %391 : vector<8x128xf32> to vector<8x128xbf16>
    %cst_122 = arith.constant dense<0.000000e+00> : vector<8x512xf32>
    %419 = tpu.matmul %418, %11, %cst_122 {dimension_numbers = #tpu.dot_dimension_numbers<[1], [0], [0], [1], [0, 0, 1, 1], [], []>} : vector<8x128xbf16>, vector<128x512xbf16>, vector<8x512xf32> -> vector<8x512xf32>
    %420 = arith.addf %417, %419 : vector<8x512xf32>
    %421 = vector.extract_strided_slice %414 {offsets = [0, 0], sizes = [8, 128], strides = [1, 1]} : vector<8x512xf32> to vector<8x128xf32>
    %422 = arith.negf %421 : vector<8x128xf32>
    %423 = math.exp %422 : vector<8x128xf32>
    %cst_123 = arith.constant 1.000000e+00 : f32
    %424 = vector.broadcast %cst_123 : f32 to vector<8x128xf32>
    %425 = arith.addf %424, %423 : vector<8x128xf32>
    %426 = arith.divf %424, %425 : vector<8x128xf32>
    %427 = vector.extract_strided_slice %414 {offsets = [0, 128], sizes = [8, 128], strides = [1, 1]} : vector<8x512xf32> to vector<8x128xf32>
    %428 = arith.negf %427 : vector<8x128xf32>
    %429 = math.exp %428 : vector<8x128xf32>
    %cst_124 = arith.constant 1.000000e+00 : f32
    %430 = vector.broadcast %cst_124 : f32 to vector<8x128xf32>
    %431 = arith.addf %430, %429 : vector<8x128xf32>
    %432 = arith.divf %430, %431 : vector<8x128xf32>
    %433 = vector.extract_strided_slice %414 {offsets = [0, 256], sizes = [8, 128], strides = [1, 1]} : vector<8x512xf32> to vector<8x128xf32>
    %434 = math.tanh %433 : vector<8x128xf32>
    %435 = vector.extract_strided_slice %414 {offsets = [0, 384], sizes = [8, 128], strides = [1, 1]} : vector<8x512xf32> to vector<8x128xf32>
    %436 = arith.negf %435 : vector<8x128xf32>
    %437 = math.exp %436 : vector<8x128xf32>
    %cst_125 = arith.constant 1.000000e+00 : f32
    %438 = vector.broadcast %cst_125 : f32 to vector<8x128xf32>
    %439 = arith.addf %438, %437 : vector<8x128xf32>
    %440 = arith.divf %438, %439 : vector<8x128xf32>
    %441 = arith.mulf %432, %364 : vector<8x128xf32>
    %442 = arith.mulf %426, %434 : vector<8x128xf32>
    %443 = arith.addf %441, %442 : vector<8x128xf32>
    %444 = math.tanh %443 : vector<8x128xf32>
    %445 = arith.mulf %440, %444 : vector<8x128xf32>
    %446 = vector.extract_strided_slice %420 {offsets = [0, 0], sizes = [8, 128], strides = [1, 1]} : vector<8x512xf32> to vector<8x128xf32>
    %447 = arith.negf %446 : vector<8x128xf32>
    %448 = math.exp %447 : vector<8x128xf32>
    %cst_126 = arith.constant 1.000000e+00 : f32
    %449 = vector.broadcast %cst_126 : f32 to vector<8x128xf32>
    %450 = arith.addf %449, %448 : vector<8x128xf32>
    %451 = arith.divf %449, %450 : vector<8x128xf32>
    %452 = vector.extract_strided_slice %420 {offsets = [0, 128], sizes = [8, 128], strides = [1, 1]} : vector<8x512xf32> to vector<8x128xf32>
    %453 = arith.negf %452 : vector<8x128xf32>
    %454 = math.exp %453 : vector<8x128xf32>
    %cst_127 = arith.constant 1.000000e+00 : f32
    %455 = vector.broadcast %cst_127 : f32 to vector<8x128xf32>
    %456 = arith.addf %455, %454 : vector<8x128xf32>
    %457 = arith.divf %455, %456 : vector<8x128xf32>
    %458 = vector.extract_strided_slice %420 {offsets = [0, 256], sizes = [8, 128], strides = [1, 1]} : vector<8x512xf32> to vector<8x128xf32>
    %459 = math.tanh %458 : vector<8x128xf32>
    %460 = vector.extract_strided_slice %420 {offsets = [0, 384], sizes = [8, 128], strides = [1, 1]} : vector<8x512xf32> to vector<8x128xf32>
    %461 = arith.negf %460 : vector<8x128xf32>
    %462 = math.exp %461 : vector<8x128xf32>
    %cst_128 = arith.constant 1.000000e+00 : f32
    %463 = vector.broadcast %cst_128 : f32 to vector<8x128xf32>
    %464 = arith.addf %463, %462 : vector<8x128xf32>
    %465 = arith.divf %463, %464 : vector<8x128xf32>
    %466 = arith.mulf %457, %389 : vector<8x128xf32>
    %467 = arith.mulf %451, %459 : vector<8x128xf32>
    %468 = arith.addf %466, %467 : vector<8x128xf32>
    %469 = math.tanh %468 : vector<8x128xf32>
    %470 = arith.mulf %465, %469 : vector<8x128xf32>
    %471 = arith.index_cast %c5_i32 : i32 to index
    %c0_129 = arith.constant 0 : index
    %c0_130 = arith.constant 0 : index
    %472 = vector.load %arg1[%471, %c0_129, %c0_130] : memref<8x8x256xf32, #tpu.memory_space<vmem>>, vector<1x8x128xf32>
    %473 = vector.shape_cast %472 : vector<1x8x128xf32> to vector<8x128xf32>
    %474 = arith.addf %445, %473 : vector<8x128xf32>
    %475 = arith.index_cast %c5_i32 : i32 to index
    %c0_131 = arith.constant 0 : index
    %c0_132 = arith.constant 0 : index
    %476 = vector.load %arg6[%475, %c0_131, %c0_132] : memref<8x8x256xf32, #tpu.memory_space<vmem>>, vector<1x8x128xf32>
    %477 = vector.shape_cast %476 : vector<1x8x128xf32> to vector<8x128xf32>
    %478 = vector.shape_cast %474 : vector<8x128xf32> to vector<1x8x128xf32>
    tpu.vector_store %arg6[%475, %c0_131, %c0_132], %478 {strides = array<i32>} : memref<8x8x256xf32, #tpu.memory_space<vmem>>, vector<1x8x128xf32>,
    %479 = arith.index_cast %408 : i32 to index
    %c0_133 = arith.constant 0 : index
    %c128_134 = arith.constant 128 : index
    %480 = vector.load %arg1[%479, %c0_133, %c128_134] : memref<8x8x256xf32, #tpu.memory_space<vmem>>, vector<1x8x128xf32>
    %481 = vector.shape_cast %480 : vector<1x8x128xf32> to vector<8x128xf32>
    %482 = arith.addf %470, %481 : vector<8x128xf32>
    %483 = arith.index_cast %408 : i32 to index
    %c0_135 = arith.constant 0 : index
    %c128_136 = arith.constant 128 : index
    %484 = vector.load %arg6[%483, %c0_135, %c128_136] : memref<8x8x256xf32, #tpu.memory_space<vmem>>, vector<1x8x128xf32>
    %485 = vector.shape_cast %484 : vector<1x8x128xf32> to vector<8x128xf32>
    %486 = vector.shape_cast %482 : vector<8x128xf32> to vector<1x8x128xf32>
    tpu.vector_store %arg6[%483, %c0_135, %c128_136], %486 {strides = array<i32>} : memref<8x8x256xf32, #tpu.memory_space<vmem>>, vector<1x8x128xf32>,
    %c6_i32 = arith.constant 6 : i32
    %c7_i32_137 = arith.constant 7 : i32
    %487 = arith.subi %c7_i32_137, %c6_i32 : i32
    %488 = arith.index_cast %c6_i32 : i32 to index
    %c0_138 = arith.constant 0 : index
    %c0_139 = arith.constant 0 : index
    %489 = vector.load %arg7[%488, %c0_138, %c0_139] : memref<8x8x1024xf32, #tpu.memory_space<vmem>>, vector<1x8x512xf32>
    %490 = vector.shape_cast %489 : vector<1x8x512xf32> to vector<8x512xf32>
    %491 = arith.truncf %445 : vector<8x128xf32> to vector<8x128xbf16>
    %cst_140 = arith.constant dense<0.000000e+00> : vector<8x512xf32>
    %492 = tpu.matmul %491, %10, %cst_140 {dimension_numbers = #tpu.dot_dimension_numbers<[1], [0], [0], [1], [0, 0, 1, 1], [], []>} : vector<8x128xbf16>, vector<128x512xbf16>, vector<8x512xf32> -> vector<8x512xf32>
    %493 = arith.addf %490, %492 : vector<8x512xf32>
    %494 = arith.index_cast %487 : i32 to index
    %c0_141 = arith.constant 0 : index
    %c512_142 = arith.constant 512 : index
    %495 = vector.load %arg7[%494, %c0_141, %c512_142] : memref<8x8x1024xf32, #tpu.memory_space<vmem>>, vector<1x8x512xf32>
    %496 = vector.shape_cast %495 : vector<1x8x512xf32> to vector<8x512xf32>
    %497 = arith.truncf %470 : vector<8x128xf32> to vector<8x128xbf16>
    %cst_143 = arith.constant dense<0.000000e+00> : vector<8x512xf32>
    %498 = tpu.matmul %497, %11, %cst_143 {dimension_numbers = #tpu.dot_dimension_numbers<[1], [0], [0], [1], [0, 0, 1, 1], [], []>} : vector<8x128xbf16>, vector<128x512xbf16>, vector<8x512xf32> -> vector<8x512xf32>
    %499 = arith.addf %496, %498 : vector<8x512xf32>
    %500 = vector.extract_strided_slice %493 {offsets = [0, 0], sizes = [8, 128], strides = [1, 1]} : vector<8x512xf32> to vector<8x128xf32>
    %501 = arith.negf %500 : vector<8x128xf32>
    %502 = math.exp %501 : vector<8x128xf32>
    %cst_144 = arith.constant 1.000000e+00 : f32
    %503 = vector.broadcast %cst_144 : f32 to vector<8x128xf32>
    %504 = arith.addf %503, %502 : vector<8x128xf32>
    %505 = arith.divf %503, %504 : vector<8x128xf32>
    %506 = vector.extract_strided_slice %493 {offsets = [0, 128], sizes = [8, 128], strides = [1, 1]} : vector<8x512xf32> to vector<8x128xf32>
    %507 = arith.negf %506 : vector<8x128xf32>
    %508 = math.exp %507 : vector<8x128xf32>
    %cst_145 = arith.constant 1.000000e+00 : f32
    %509 = vector.broadcast %cst_145 : f32 to vector<8x128xf32>
    %510 = arith.addf %509, %508 : vector<8x128xf32>
    %511 = arith.divf %509, %510 : vector<8x128xf32>
    %512 = vector.extract_strided_slice %493 {offsets = [0, 256], sizes = [8, 128], strides = [1, 1]} : vector<8x512xf32> to vector<8x128xf32>
    %513 = math.tanh %512 : vector<8x128xf32>
    %514 = vector.extract_strided_slice %493 {offsets = [0, 384], sizes = [8, 128], strides = [1, 1]} : vector<8x512xf32> to vector<8x128xf32>
    %515 = arith.negf %514 : vector<8x128xf32>
    %516 = math.exp %515 : vector<8x128xf32>
    %cst_146 = arith.constant 1.000000e+00 : f32
    %517 = vector.broadcast %cst_146 : f32 to vector<8x128xf32>
    %518 = arith.addf %517, %516 : vector<8x128xf32>
    %519 = arith.divf %517, %518 : vector<8x128xf32>
    %520 = arith.mulf %511, %443 : vector<8x128xf32>
    %521 = arith.mulf %505, %513 : vector<8x128xf32>
    %522 = arith.addf %520, %521 : vector<8x128xf32>
    %523 = math.tanh %522 : vector<8x128xf32>
    %524 = arith.mulf %519, %523 : vector<8x128xf32>
    %525 = vector.extract_strided_slice %499 {offsets = [0, 0], sizes = [8, 128], strides = [1, 1]} : vector<8x512xf32> to vector<8x128xf32>
    %526 = arith.negf %525 : vector<8x128xf32>
    %527 = math.exp %526 : vector<8x128xf32>
    %cst_147 = arith.constant 1.000000e+00 : f32
    %528 = vector.broadcast %cst_147 : f32 to vector<8x128xf32>
    %529 = arith.addf %528, %527 : vector<8x128xf32>
    %530 = arith.divf %528, %529 : vector<8x128xf32>
    %531 = vector.extract_strided_slice %499 {offsets = [0, 128], sizes = [8, 128], strides = [1, 1]} : vector<8x512xf32> to vector<8x128xf32>
    %532 = arith.negf %531 : vector<8x128xf32>
    %533 = math.exp %532 : vector<8x128xf32>
    %cst_148 = arith.constant 1.000000e+00 : f32
    %534 = vector.broadcast %cst_148 : f32 to vector<8x128xf32>
    %535 = arith.addf %534, %533 : vector<8x128xf32>
    %536 = arith.divf %534, %535 : vector<8x128xf32>
    %537 = vector.extract_strided_slice %499 {offsets = [0, 256], sizes = [8, 128], strides = [1, 1]} : vector<8x512xf32> to vector<8x128xf32>
    %538 = math.tanh %537 : vector<8x128xf32>
    %539 = vector.extract_strided_slice %499 {offsets = [0, 384], sizes = [8, 128], strides = [1, 1]} : vector<8x512xf32> to vector<8x128xf32>
    %540 = arith.negf %539 : vector<8x128xf32>
    %541 = math.exp %540 : vector<8x128xf32>
    %cst_149 = arith.constant 1.000000e+00 : f32
    %542 = vector.broadcast %cst_149 : f32 to vector<8x128xf32>
    %543 = arith.addf %542, %541 : vector<8x128xf32>
    %544 = arith.divf %542, %543 : vector<8x128xf32>
    %545 = arith.mulf %536, %468 : vector<8x128xf32>
    %546 = arith.mulf %530, %538 : vector<8x128xf32>
    %547 = arith.addf %545, %546 : vector<8x128xf32>
    %548 = math.tanh %547 : vector<8x128xf32>
    %549 = arith.mulf %544, %548 : vector<8x128xf32>
    %550 = arith.index_cast %c6_i32 : i32 to index
    %c0_150 = arith.constant 0 : index
    %c0_151 = arith.constant 0 : index
    %551 = vector.load %arg1[%550, %c0_150, %c0_151] : memref<8x8x256xf32, #tpu.memory_space<vmem>>, vector<1x8x128xf32>
    %552 = vector.shape_cast %551 : vector<1x8x128xf32> to vector<8x128xf32>
    %553 = arith.addf %524, %552 : vector<8x128xf32>
    %554 = arith.index_cast %c6_i32 : i32 to index
    %c0_152 = arith.constant 0 : index
    %c0_153 = arith.constant 0 : index
    %555 = vector.load %arg6[%554, %c0_152, %c0_153] : memref<8x8x256xf32, #tpu.memory_space<vmem>>, vector<1x8x128xf32>
    %556 = vector.shape_cast %555 : vector<1x8x128xf32> to vector<8x128xf32>
    %557 = vector.shape_cast %553 : vector<8x128xf32> to vector<1x8x128xf32>
    tpu.vector_store %arg6[%554, %c0_152, %c0_153], %557 {strides = array<i32>} : memref<8x8x256xf32, #tpu.memory_space<vmem>>, vector<1x8x128xf32>,
    %558 = arith.index_cast %487 : i32 to index
    %c0_154 = arith.constant 0 : index
    %c128_155 = arith.constant 128 : index
    %559 = vector.load %arg1[%558, %c0_154, %c128_155] : memref<8x8x256xf32, #tpu.memory_space<vmem>>, vector<1x8x128xf32>
    %560 = vector.shape_cast %559 : vector<1x8x128xf32> to vector<8x128xf32>
    %561 = arith.addf %549, %560 : vector<8x128xf32>
    %562 = arith.index_cast %487 : i32 to index
    %c0_156 = arith.constant 0 : index
    %c128_157 = arith.constant 128 : index
    %563 = vector.load %arg6[%562, %c0_156, %c128_157] : memref<8x8x256xf32, #tpu.memory_space<vmem>>, vector<1x8x128xf32>
    %564 = vector.shape_cast %563 : vector<1x8x128xf32> to vector<8x128xf32>
    %565 = vector.shape_cast %561 : vector<8x128xf32> to vector<1x8x128xf32>
    tpu.vector_store %arg6[%562, %c0_156, %c128_157], %565 {strides = array<i32>} : memref<8x8x256xf32, #tpu.memory_space<vmem>>, vector<1x8x128xf32>,
    %c7_i32_158 = arith.constant 7 : i32
    %c7_i32_159 = arith.constant 7 : i32
    %566 = arith.subi %c7_i32_159, %c7_i32_158 : i32
    %567 = arith.index_cast %c7_i32_158 : i32 to index
    %c0_160 = arith.constant 0 : index
    %c0_161 = arith.constant 0 : index
    %568 = vector.load %arg7[%567, %c0_160, %c0_161] : memref<8x8x1024xf32, #tpu.memory_space<vmem>>, vector<1x8x512xf32>
    %569 = vector.shape_cast %568 : vector<1x8x512xf32> to vector<8x512xf32>
    %570 = arith.truncf %524 : vector<8x128xf32> to vector<8x128xbf16>
    %cst_162 = arith.constant dense<0.000000e+00> : vector<8x512xf32>
    %571 = tpu.matmul %570, %10, %cst_162 {dimension_numbers = #tpu.dot_dimension_numbers<[1], [0], [0], [1], [0, 0, 1, 1], [], []>} : vector<8x128xbf16>, vector<128x512xbf16>, vector<8x512xf32> -> vector<8x512xf32>
    %572 = arith.addf %569, %571 : vector<8x512xf32>
    %573 = arith.index_cast %566 : i32 to index
    %c0_163 = arith.constant 0 : index
    %c512_164 = arith.constant 512 : index
    %574 = vector.load %arg7[%573, %c0_163, %c512_164] : memref<8x8x1024xf32, #tpu.memory_space<vmem>>, vector<1x8x512xf32>
    %575 = vector.shape_cast %574 : vector<1x8x512xf32> to vector<8x512xf32>
    %576 = arith.truncf %549 : vector<8x128xf32> to vector<8x128xbf16>
    %cst_165 = arith.constant dense<0.000000e+00> : vector<8x512xf32>
    %577 = tpu.matmul %576, %11, %cst_165 {dimension_numbers = #tpu.dot_dimension_numbers<[1], [0], [0], [1], [0, 0, 1, 1], [], []>} : vector<8x128xbf16>, vector<128x512xbf16>, vector<8x512xf32> -> vector<8x512xf32>
    %578 = arith.addf %575, %577 : vector<8x512xf32>
    %579 = vector.extract_strided_slice %572 {offsets = [0, 0], sizes = [8, 128], strides = [1, 1]} : vector<8x512xf32> to vector<8x128xf32>
    %580 = arith.negf %579 : vector<8x128xf32>
    %581 = math.exp %580 : vector<8x128xf32>
    %cst_166 = arith.constant 1.000000e+00 : f32
    %582 = vector.broadcast %cst_166 : f32 to vector<8x128xf32>
    %583 = arith.addf %582, %581 : vector<8x128xf32>
    %584 = arith.divf %582, %583 : vector<8x128xf32>
    %585 = vector.extract_strided_slice %572 {offsets = [0, 128], sizes = [8, 128], strides = [1, 1]} : vector<8x512xf32> to vector<8x128xf32>
    %586 = arith.negf %585 : vector<8x128xf32>
    %587 = math.exp %586 : vector<8x128xf32>
    %cst_167 = arith.constant 1.000000e+00 : f32
    %588 = vector.broadcast %cst_167 : f32 to vector<8x128xf32>
    %589 = arith.addf %588, %587 : vector<8x128xf32>
    %590 = arith.divf %588, %589 : vector<8x128xf32>
    %591 = vector.extract_strided_slice %572 {offsets = [0, 256], sizes = [8, 128], strides = [1, 1]} : vector<8x512xf32> to vector<8x128xf32>
    %592 = math.tanh %591 : vector<8x128xf32>
    %593 = vector.extract_strided_slice %572 {offsets = [0, 384], sizes = [8, 128], strides = [1, 1]} : vector<8x512xf32> to vector<8x128xf32>
    %594 = arith.negf %593 : vector<8x128xf32>
    %595 = math.exp %594 : vector<8x128xf32>
    %cst_168 = arith.constant 1.000000e+00 : f32
    %596 = vector.broadcast %cst_168 : f32 to vector<8x128xf32>
    %597 = arith.addf %596, %595 : vector<8x128xf32>
    %598 = arith.divf %596, %597 : vector<8x128xf32>
    %599 = arith.mulf %590, %522 : vector<8x128xf32>
    %600 = arith.mulf %584, %592 : vector<8x128xf32>
    %601 = arith.addf %599, %600 : vector<8x128xf32>
    %602 = math.tanh %601 : vector<8x128xf32>
    %603 = arith.mulf %598, %602 : vector<8x128xf32>
    %604 = vector.extract_strided_slice %578 {offsets = [0, 0], sizes = [8, 128], strides = [1, 1]} : vector<8x512xf32> to vector<8x128xf32>
    %605 = arith.negf %604 : vector<8x128xf32>
    %606 = math.exp %605 : vector<8x128xf32>
    %cst_169 = arith.constant 1.000000e+00 : f32
    %607 = vector.broadcast %cst_169 : f32 to vector<8x128xf32>
    %608 = arith.addf %607, %606 : vector<8x128xf32>
    %609 = arith.divf %607, %608 : vector<8x128xf32>
    %610 = vector.extract_strided_slice %578 {offsets = [0, 128], sizes = [8, 128], strides = [1, 1]} : vector<8x512xf32> to vector<8x128xf32>
    %611 = arith.negf %610 : vector<8x128xf32>
    %612 = math.exp %611 : vector<8x128xf32>
    %cst_170 = arith.constant 1.000000e+00 : f32
    %613 = vector.broadcast %cst_170 : f32 to vector<8x128xf32>
    %614 = arith.addf %613, %612 : vector<8x128xf32>
    %615 = arith.divf %613, %614 : vector<8x128xf32>
    %616 = vector.extract_strided_slice %578 {offsets = [0, 256], sizes = [8, 128], strides = [1, 1]} : vector<8x512xf32> to vector<8x128xf32>
    %617 = math.tanh %616 : vector<8x128xf32>
    %618 = vector.extract_strided_slice %578 {offsets = [0, 384], sizes = [8, 128], strides = [1, 1]} : vector<8x512xf32> to vector<8x128xf32>
    %619 = arith.negf %618 : vector<8x128xf32>
    %620 = math.exp %619 : vector<8x128xf32>
    %cst_171 = arith.constant 1.000000e+00 : f32
    %621 = vector.broadcast %cst_171 : f32 to vector<8x128xf32>
    %622 = arith.addf %621, %620 : vector<8x128xf32>
    %623 = arith.divf %621, %622 : vector<8x128xf32>
    %624 = arith.mulf %615, %547 : vector<8x128xf32>
    %625 = arith.mulf %609, %617 : vector<8x128xf32>
    %626 = arith.addf %624, %625 : vector<8x128xf32>
    %627 = math.tanh %626 : vector<8x128xf32>
    %628 = arith.mulf %623, %627 : vector<8x128xf32>
    %629 = arith.index_cast %c7_i32_158 : i32 to index
    %c0_172 = arith.constant 0 : index
    %c0_173 = arith.constant 0 : index
    %630 = vector.load %arg1[%629, %c0_172, %c0_173] : memref<8x8x256xf32, #tpu.memory_space<vmem>>, vector<1x8x128xf32>
    %631 = vector.shape_cast %630 : vector<1x8x128xf32> to vector<8x128xf32>
    %632 = arith.addf %603, %631 : vector<8x128xf32>
    %633 = arith.index_cast %c7_i32_158 : i32 to index
    %c0_174 = arith.constant 0 : index
    %c0_175 = arith.constant 0 : index
    %634 = vector.load %arg6[%633, %c0_174, %c0_175] : memref<8x8x256xf32, #tpu.memory_space<vmem>>, vector<1x8x128xf32>
    %635 = vector.shape_cast %634 : vector<1x8x128xf32> to vector<8x128xf32>
    %636 = vector.shape_cast %632 : vector<8x128xf32> to vector<1x8x128xf32>
    tpu.vector_store %arg6[%633, %c0_174, %c0_175], %636 {strides = array<i32>} : memref<8x8x256xf32, #tpu.memory_space<vmem>>, vector<1x8x128xf32>,
    %637 = arith.index_cast %566 : i32 to index
    %c0_176 = arith.constant 0 : index
    %c128_177 = arith.constant 128 : index
    %638 = vector.load %arg1[%637, %c0_176, %c128_177] : memref<8x8x256xf32, #tpu.memory_space<vmem>>, vector<1x8x128xf32>
    %639 = vector.shape_cast %638 : vector<1x8x128xf32> to vector<8x128xf32>
    %640 = arith.addf %628, %639 : vector<8x128xf32>
    %641 = arith.index_cast %566 : i32 to index
    %c0_178 = arith.constant 0 : index
    %c128_179 = arith.constant 128 : index
    %642 = vector.load %arg6[%641, %c0_178, %c128_179] : memref<8x8x256xf32, #tpu.memory_space<vmem>>, vector<1x8x128xf32>
    %643 = vector.shape_cast %642 : vector<1x8x128xf32> to vector<8x128xf32>
    %644 = vector.shape_cast %640 : vector<8x128xf32> to vector<1x8x128xf32>
    tpu.vector_store %arg6[%641, %c0_178, %c128_179], %644 {strides = array<i32>} : memref<8x8x256xf32, #tpu.memory_space<vmem>>, vector<1x8x128xf32>,
    %c8_i32 = arith.constant 8 : i32
    return
  }
  func.func @transform_0(%arg0: i32) -> (i32, i32, i32) {
    %c0_i32 = arith.constant 0 : i32
    %c0_i32_0 = arith.constant 0 : i32
    %c0_i32_1 = arith.constant 0 : i32
    return %c0_i32, %arg0, %c0_i32_0 : i32, i32, i32
  }
  func.func @transform_1(%arg0: i32) -> (i32, i32) {
    %c0_i32 = arith.constant 0 : i32
    %c0_i32_0 = arith.constant 0 : i32
    %c0_i32_1 = arith.constant 0 : i32
    return %c0_i32, %c0_i32_0 : i32, i32
  }
  func.func @transform_2(%arg0: i32) -> (i32, i32) {
    %c0_i32 = arith.constant 0 : i32
    %c0_i32_0 = arith.constant 0 : i32
    %c0_i32_1 = arith.constant 0 : i32
    return %c0_i32, %c0_i32_0 : i32, i32
  }
  func.func @transform_3(%arg0: i32) -> (i32, i32) {
    %c0_i32 = arith.constant 0 : i32
    %c0_i32_0 = arith.constant 0 : i32
    %c0_i32_1 = arith.constant 0 : i32
    return %c0_i32, %c0_i32_0 : i32, i32
  }
  func.func @transform_4(%arg0: i32) -> (i32, i32) {
    %c0_i32 = arith.constant 0 : i32
    %c0_i32_0 = arith.constant 0 : i32
    %c0_i32_1 = arith.constant 0 : i32
    return %c0_i32, %c0_i32_0 : i32, i32
  }
  func.func @transform_5(%arg0: i32) -> (i32, i32, i32) {
    %c0_i32 = arith.constant 0 : i32
    %c0_i32_0 = arith.constant 0 : i32
    %c0_i32_1 = arith.constant 0 : i32
    return %c0_i32, %arg0, %c0_i32_0 : i32, i32, i32
  }
}

</mosaic_0001>

<bundles_post_ra>
// kernel: tpu_custom_call.1
= control target key start
LH: loop header
LB: loop body
LE: loop exit
PB: predicated region body
PF: predicated region fallthrough
CT: control target
= control target key end

     0   :  { %10 = vsyncpa [#allocation4], 0  ;;  %s6624_s0 = inlined_call_operand.hbm [shape: f32[8,8,256], index: 0, kind: input, shape index: {}]   ;;  %s6625_s1 = inlined_call_operand.hbm [shape: bf16[256,1024], index: 1, kind: input, shape index: {}]   ;;  %s6626_s2 = inlined_call_operand.hbm [shape: bf16[128,512], index: 2, kind: input, shape index: {}]   ;;  %s6627_s3 = inlined_call_operand.hbm [shape: bf16[128,512], index: 3, kind: input, shape index: {}]   ;;  %s6628_s4 = inlined_call_operand.hbm [shape: f32[1,1024], index: 4, kind: input, shape index: {}]   ;;  %s6629_s5 = inlined_call_operand.hbm [shape: f32[8,8,256], index: 5, kind: output, shape index: {}]  }
   0x1   :  { %11 = vsyncpa [#allocation7], 0 }
   0x2   :  { %12 = vsyncpa [#allocation10], 0  ;;  %s31_s20 = sshll.u32 %s6625_s1, 4  ;;  %s32_s20 = int_to_ptr.hbm [resolvable:$true] %s31_s20 }
   0x3   :  { %13 = vsyncpa [#allocation5], 0  ;;  %s5320_s21 = smov [#allocation6]   ;;  %s5321_s23 = smov 512  }
   0x4   :  { %s33_s22 = sshll.u32 %s5320_s21, 4  ;;  %s5322_s24 = smov 32   ;;  %s34_s22 = int_to_ptr.vmem [resolvable:$true] %s33_s22 }
   0x5   :  { %39 = dma.hbm_to_vmem [thread:$0]  %s32_s20, 16384, %s34_s22, [#allocation7], %s5321_s23, %s5321_s23, %s5322_s24  }
   0x6   :  { %s57_s27 = sshll.u32 %s6627_s3, 4  ;;  %s5323_s28 = smov [#allocation9]   ;;  %s58_s27 = int_to_ptr.hbm [resolvable:$true] %s57_s27 }
   0x7   :  { %s59_s29 = sshll.u32 %s5323_s28, 4  ;;  %s18_s7 = sshll.u32 %s6624_s0, 4  ;;  %s60_s29 = int_to_ptr.vmem [resolvable:$true] %s59_s29  ;;  %s19_s7 = int_to_ptr.hbm [resolvable:$true] %s18_s7 }
   0x8   :  { %s5324_s1 = smov 256   ;;  %s5325_s8 = smov 16  }
   0x9   :  { %65 = dma.hbm_to_vmem [thread:$0]  %s58_s27, 4096, %s60_s29, [#allocation10], %s5324_s1, %s5324_s1, %s5325_s8  }
   0xa   :  { %s44_s11 = sshll.u32 %s6626_s2, 4  ;;  %s5326_s3 = smov [#allocation3]   ;;  %s45_s11 = int_to_ptr.hbm [resolvable:$true] %s44_s11 }
   0xb   :  { %s20_s12 = sshll.u32 %s5326_s3, 4  ;;  %s5327_s0 = smov [#allocation8]   ;;  %s21_s12 = int_to_ptr.vmem [resolvable:$true] %s20_s12 }
   0xc   :  { %26 = dma.hbm_to_vmem [thread:$0]  %s19_s7, 2048, %s21_s12, [#allocation4], %s5324_s1, %s5324_s1, %s5325_s8  }
   0xd   :  { %s46_s13 = sshll.u32 %s5327_s0, 4  ;;  %s71_s16 = sshll.u32 %s6628_s4, 4  ;;  %s47_s13 = int_to_ptr.vmem [resolvable:$true] %s46_s13  ;;  %s72_s16 = int_to_ptr.hbm [resolvable:$true] %s71_s16 }
   0xe   :  { %52 = dma.hbm_to_vmem [thread:$0]  %s45_s11, 4096, %s47_s13, [#allocation7], %s5324_s1, %s5324_s1, %s5325_s8  }
   0xf   :  { %s5328_s2 = smov [#allocation11]  }
  0x10   :  { %s73_s17 = sshll.u32 %s5328_s2, 4  ;;  %s74_s17 = int_to_ptr.vmem [resolvable:$true] %s73_s17 }
  0x11   :  { %76 = dma.hbm_to_vmem [thread:$0]  %s72_s16, 128, %s74_s17, [#allocation10]  }
  0x12   :  { %5312 = dma.done.wait [#allocation4], 2048  }
  0x13   :  { %5313 = vsyncadd [#allocation4], 4294965248 }
  0x14   :  { %5314 = dma.done.wait [#allocation7], 20480  }
  0x15   :  { %5315 = vsyncadd [#allocation7], 4294946816 }
  0x16   :  { %5316 = dma.done.wait [#allocation10], 4224  }
  0x17   :  { %5317 = vsyncadd [#allocation10], 4294963072  ;;  %v4118_v0 = vld [vmem:[#allocation6 + $0x1c0] sm:$0xf]  ;;  %v4764_v5 = vld [vmem:[#allocation6 + $0x1c4] sm:$0xf] }
  0x18   :  { %v4768_v1 = vld [vmem:[#allocation6 + $0x1dc] sm:$0xf0]  ;;  %v4120_v6 = vld [vmem:[#allocation6 + $0x1e0] sm:$0xf0]  ;;  %s5330_s4 = smov [#allocation12]   ;;  %s3877_s21 = sshll.u32 %s6629_s5, 4  ;;  %s3878_s21 = int_to_ptr.hbm [resolvable:$true] %s3877_s21 }
  0x19   :  { %v4374_v2 = vld [vmem:[#allocation6 + $0x3c0] sm:$0xf]  ;;  %v4119_v3 = vor.u32 %v4768_v1, %v4118_v0  ;;  %v4123_v8 = vor.u32 %v4764_v5, %v4120_v6  ;;  %v4828_v9 = vld [vmem:[#allocation6 + $0x3c4] sm:$0xf]  ;;  %s3875_s18 = sshll.u32 %s5330_s4, 4  ;;  %s3876_s18 = int_to_ptr.vmem [resolvable:$true] %s3875_s18 }
  0x1a   :  { %v4832_v4 = vld [vmem:[#allocation6 + $0x3dc] sm:$0xf0]  ;;  %v4376_v10 = vld [vmem:[#allocation6 + $0x3e0] sm:$0xf0] }
  0x1b   :  { %v4375_v7 = vor.u32 %v4832_v4, %v4374_v2  ;;  %v4086_v11 = vld [vmem:[#allocation6 + $0x180] sm:$0xf]  ;;  %908 = vmatpush.bf16.msra.mxu0 %v4119_v3  ;;  %v4379_v12 = vor.u32 %v4828_v9, %v4376_v10  ;;  %966 = vmatpush.bf16.msra.mxu2 %v4123_v8  ;;  %v4756_v18 = vld [vmem:[#allocation6 + $0x184] sm:$0xf] }
  0x1c   :  { %v4760_v13 = vld [vmem:[#allocation6 + $0x19c] sm:$0xf0]  ;;  %v4088_v19 = vld [vmem:[#allocation6 + $0x1a0] sm:$0xf0] }
  0x1d   :  { %v4342_v14 = vld [vmem:[#allocation6 + $0x380] sm:$0xf]  ;;  %937 = vmatpush.bf16.msra.mxu1 %v4375_v7  ;;  %v4087_v16 = vor.u32 %v4760_v13, %v4086_v11  ;;  %v4820_v20 = vld [vmem:[#allocation6 + $0x384] sm:$0xf]  ;;  %995 = vmatpush.bf16.msra.mxu3 %v4379_v12  ;;  %v4091_v21 = vor.u32 %v4756_v18, %v4088_v19 }
  0x1e   :  { %v4824_v15 = vld [vmem:[#allocation6 + $0x39c] sm:$0xf0]  ;;  %v4344_v22 = vld [vmem:[#allocation6 + $0x3a0] sm:$0xf0] }
  0x1f   :  { %v4343_v17 = vor.u32 %v4824_v15, %v4342_v14  ;;  %v4054_v23 = vld [vmem:[#allocation6 + $0x140] sm:$0xf]  ;;  %v4347_v25 = vor.u32 %v4820_v20, %v4344_v22  ;;  %v4748_v28 = vld [vmem:[#allocation6 + $0x144] sm:$0xf]  ;;  %909 = vmatpush.bf16.msra.mxu0 %v4087_v16  ;;  %967 = vmatpush.bf16.msra.mxu2 %v4091_v21 }
  0x20   :  { %v4752_v24 = vld [vmem:[#allocation6 + $0x15c] sm:$0xf0]  ;;  %v4056_v30 = vld [vmem:[#allocation6 + $0x160] sm:$0xf0] }
  0x21   :  { %v4310_v26 = vld [vmem:[#allocation6 + $0x340] sm:$0xf]  ;;  %v4055_v29 = vor.u32 %v4752_v24, %v4054_v23  ;;  %v4812_v31 = vld [vmem:[#allocation6 + $0x344] sm:$0xf]  ;;  %938 = vmatpush.bf16.msra.mxu1 %v4343_v17  ;;  %v4059_v34 = vor.u32 %v4748_v28, %v4056_v30  ;;  %996 = vmatpush.bf16.msra.mxu3 %v4347_v25  ;;  %v4769_v30 = vld [vmem:[#allocation6 + $0x1e4] sm:$0xf0] }
  0x22   :  { %v4816_v27 = vld [vmem:[#allocation6 + $0x35c] sm:$0xf0]  ;;  %v4312_v32 = vld [vmem:[#allocation6 + $0x360] sm:$0xf0] }
  0x23   :  { %v4311_v33 = vor.u32 %v4816_v27, %v4310_v26  ;;  %v4022_v35 = vld [vmem:[#allocation6 + $0x100] sm:$0xf]  ;;  %v4315_v38 = vor.u32 %v4812_v31, %v4312_v32  ;;  %v4740_v40 = vld [vmem:[#allocation6 + $0x104] sm:$0xf]  ;;  %910 = vmatpush.bf16.msra.mxu0 %v4055_v29  ;;  %968 = vmatpush.bf16.msra.mxu2 %v4059_v34  ;;  %v4126_v29 = vld [vmem:[#allocation6 + $0x1c8] sm:$0xf] }
  0x24   :  { %v4744_v36 = vld [vmem:[#allocation6 + $0x11c] sm:$0xf0]  ;;  %v4024_v41 = vld [vmem:[#allocation6 + $0x120] sm:$0xf0]  ;;  %v100_v32 = vld [vmem:[#allocation3 + $0x10] sm:$0xff] }
  0x25   :  { %v4278_v37 = vld [vmem:[#allocation6 + $0x300] sm:$0xf]  ;;  %v4804_v42 = vld [vmem:[#allocation6 + $0x304] sm:$0xf]  ;;  %v4023_v44 = vor.u32 %v4744_v36, %v4022_v35  ;;  %939 = vmatpush.bf16.msra.mxu1 %v4311_v33  ;;  %v4027_v46 = vor.u32 %v4740_v40, %v4024_v41  ;;  %997 = vmatpush.bf16.msra.mxu3 %v4315_v38  ;;  %v4382_v33 = vld [vmem:[#allocation6 + $0x3c8] sm:$0xf]  ;;  %v4127_v40 = vor.u32 %v4769_v30, %v4126_v29 }
  0x26   :  { %v4808_v39 = vld [vmem:[#allocation6 + $0x31c] sm:$0xf0]  ;;  %v4280_v43 = vld [vmem:[#allocation6 + $0x320] sm:$0xf0]  ;;  %v4833_v34 = vld [vmem:[#allocation6 + $0x3e4] sm:$0xf0] }
  0x27   :  { %v4279_v45 = vor.u32 %v4808_v39, %v4278_v37  ;;  %v3990_v47 = vld [vmem:[#allocation6 + $0xc0] sm:$0xf]  ;;  %v4283_v50 = vor.u32 %v4804_v42, %v4280_v43  ;;  %v4732_v52 = vld [vmem:[#allocation6 + $0xc4] sm:$0xf]  ;;  %911 = vmatpush.bf16.msra.mxu0 %v4023_v44  ;;  %969 = vmatpush.bf16.msra.mxu2 %v4027_v46  ;;  %v99_v37 = vld [vmem:[#allocation3 + $0x8] sm:$0xff] }
  0x28   :  { %v4736_v48 = vld [vmem:[#allocation6 + $0xdc] sm:$0xf0]  ;;  %v3992_v53 = vld [vmem:[#allocation6 + $0xe0] sm:$0xf0]  ;;  %v101_v38 = vld [vmem:[#allocation3 + $0x18] sm:$0xff] }
  0x29   :  { %v4246_v49 = vld [vmem:[#allocation6 + $0x2c0] sm:$0xf]  ;;  %v4796_v54 = vld [vmem:[#allocation6 + $0x2c4] sm:$0xf]  ;;  %v3991_v56 = vor.u32 %v4736_v48, %v3990_v47  ;;  %940 = vmatpush.bf16.msra.mxu1 %v4279_v45  ;;  %v3995_v58 = vor.u32 %v4732_v52, %v3992_v53  ;;  %998 = vmatpush.bf16.msra.mxu3 %v4283_v50  ;;  %v4829_v41 = vld [vmem:[#allocation6 + $0x3cc] sm:$0xf]  ;;  %v4383_v45 = vor.u32 %v4833_v34, %v4382_v33 }
  0x2a   :  { %v4800_v51 = vld [vmem:[#allocation6 + $0x2dc] sm:$0xf0]  ;;  %v4248_v55 = vld [vmem:[#allocation6 + $0x2e0] sm:$0xf0]  ;;  %v4765_v42 = vld [vmem:[#allocation6 + $0x1cc] sm:$0xf] }
  0x2b   :  { %v4247_v57 = vor.u32 %v4800_v51, %v4246_v49  ;;  %v3958_v59 = vld [vmem:[#allocation6 + $0x80] sm:$0xf]  ;;  %v4251_v62 = vor.u32 %v4796_v54, %v4248_v55  ;;  %v4724_v0 = vld [vmem:[#allocation6 + $0x84] sm:$0xf]  ;;  %912 = vmatpush.bf16.msra.mxu0 %v3991_v56  ;;  %970 = vmatpush.bf16.msra.mxu2 %v3995_v58  ;;  %v4128_v43 = vld [vmem:[#allocation6 + $0x1e8] sm:$0xf0]  ;;  %v5387_v49 = vpack.c.bf16 %v101_v38, %v99_v37 }
  0x2c   :  { %v4728_v60 = vld [vmem:[#allocation6 + $0x9c] sm:$0xf0]  ;;  %v3960_v1 = vld [vmem:[#allocation6 + $0xa0] sm:$0xf0]  ;;  %v4384_v46 = vld [vmem:[#allocation6 + $0x3e8] sm:$0xf0]  ;;  %v4131_v52 = vor.u32 %v4765_v42, %v4128_v43 }
  0x2d   :  { %v4214_v61 = vld [vmem:[#allocation6 + $0x280] sm:$0xf]  ;;  %v4788_v2 = vld [vmem:[#allocation6 + $0x284] sm:$0xf]  ;;  %v3959_v4 = vor.u32 %v4728_v60, %v3958_v59  ;;  %941 = vmatpush.bf16.msra.mxu1 %v4247_v57  ;;  %v3963_v6 = vor.u32 %v4724_v0, %v3960_v1  ;;  %999 = vmatpush.bf16.msra.mxu3 %v4251_v62  ;;  %v4094_v47 = vld [vmem:[#allocation6 + $0x188] sm:$0xf]  ;;  %v4387_v53 = vor.u32 %v4829_v41, %v4384_v46 }
  0x2e   :  { %v4792_v63 = vld [vmem:[#allocation6 + $0x29c] sm:$0xf0]  ;;  %v4216_v3 = vld [vmem:[#allocation6 + $0x2a0] sm:$0xf0]  ;;  %v4761_v48 = vld [vmem:[#allocation6 + $0x1a4] sm:$0xf0] }
  0x2f   :  { %v4215_v5 = vor.u32 %v4792_v63, %v4214_v61  ;;  %v3926_v7 = vld [vmem:[#allocation6 + $0x40] sm:$0xf]  ;;  %v4219_v10 = vor.u32 %v4788_v2, %v4216_v3  ;;  %v4716_v12 = vld [vmem:[#allocation6 + $0x44] sm:$0xf]  ;;  %913 = vmatpush.bf16.msra.mxu0 %v3959_v4  ;;  %971 = vmatpush.bf16.msra.mxu2 %v3963_v6  ;;  %v4350_v50 = vld [vmem:[#allocation6 + $0x388] sm:$0xf]  ;;  %v4095_v54 = vor.u32 %v4761_v48, %v4094_v47 }
  0x30   :  { %v4720_v8 = vld [vmem:[#allocation6 + $0x5c] sm:$0xf0]  ;;  %v3928_v13 = vld [vmem:[#allocation6 + $0x60] sm:$0xf0]  ;;  %v4825_v51 = vld [vmem:[#allocation6 + $0x3a4] sm:$0xf0] }
  0x31   :  { %v4182_v9 = vld [vmem:[#allocation6 + $0x240] sm:$0xf]  ;;  %v4780_v14 = vld [vmem:[#allocation6 + $0x244] sm:$0xf]  ;;  %v3927_v16 = vor.u32 %v4720_v8, %v3926_v7  ;;  %942 = vmatpush.bf16.msra.mxu1 %v4215_v5  ;;  %v3931_v20 = vor.u32 %v4716_v12, %v3928_v13  ;;  %1000 = vmatpush.bf16.msra.mxu3 %v4219_v10  ;;  %v4821_v55 = vld [vmem:[#allocation6 + $0x38c] sm:$0xf]  ;;  %v4351_v58 = vor.u32 %v4825_v51, %v4350_v50 }
  0x32   :  { %v4784_v11 = vld [vmem:[#allocation6 + $0x25c] sm:$0xf0]  ;;  %v4184_v15 = vld [vmem:[#allocation6 + $0x260] sm:$0xf0]  ;;  %v4757_v56 = vld [vmem:[#allocation6 + $0x18c] sm:$0xf] }
  0x33   :  { %v3894_v17 = vld [vmem:[#allocation6] sm:$0xf]  ;;  %v4183_v19 = vor.u32 %v4784_v11, %v4182_v9  ;;  %v4708_v23 = vld [vmem:[#allocation6 + $0x4] sm:$0xf]  ;;  %v4187_v24 = vor.u32 %v4780_v14, %v4184_v15  ;;  %914 = vmatpush.bf16.msra.mxu0 %v3927_v16  ;;  %972 = vmatpush.bf16.msra.mxu2 %v3931_v20  ;;  %v4096_v57 = vld [vmem:[#allocation6 + $0x1a8] sm:$0xf0] }
  0x34   :  { %v4712_v18 = vld [vmem:[#allocation6 + $0x1c] sm:$0xf0]  ;;  %v3896_v25 = vld [vmem:[#allocation6 + $0x20] sm:$0xf0]  ;;  %v4352_v59 = vld [vmem:[#allocation6 + $0x3a8] sm:$0xf0]  ;;  %v4099_v0 = vor.u32 %v4757_v56, %v4096_v57 }
  0x35   :  { %v4150_v21 = vld [vmem:[#allocation6 + $0x200] sm:$0xf]  ;;  %v4772_v26 = vld [vmem:[#allocation6 + $0x204] sm:$0xf]  ;;  %v3895_v31 = vor.u32 %v4712_v18, %v3894_v17  ;;  %943 = vmatpush.bf16.msra.mxu1 %v4183_v19  ;;  %v3899_v36 = vor.u32 %v4708_v23, %v3896_v25  ;;  %1001 = vmatpush.bf16.msra.mxu3 %v4187_v24  ;;  %v4062_v60 = vld [vmem:[#allocation6 + $0x148] sm:$0xf]  ;;  %v4355_v1 = vor.u32 %v4821_v55, %v4352_v59 }
  0x36   :  { %v4776_v22 = vld [vmem:[#allocation6 + $0x21c] sm:$0xf0]  ;;  %v4152_v27 = vld [vmem:[#allocation6 + $0x220] sm:$0xf0]  ;;  %v4753_v61 = vld [vmem:[#allocation6 + $0x164] sm:$0xf0] }
  0x37   :  { %v98_v28 = vld [vmem:[#allocation3] sm:$0xff]  ;;  %v4151_v35 = vor.u32 %v4776_v22, %v4150_v21  ;;  %v4155_v39 = vor.u32 %v4772_v26, %v4152_v27  ;;  %915 = vmatpush.bf16.msra.mxu0 %v3895_v31  ;;  %973 = vmatpush.bf16.msra.mxu2 %v3899_v36  ;;  %v4318_v62 = vld [vmem:[#allocation6 + $0x348] sm:$0xf]  ;;  %v4063_v2 = vor.u32 %v4753_v61, %v4062_v60  ;;  %v4813_v3 = vld [vmem:[#allocation6 + $0x34c] sm:$0xf] }
  0x38   :  { %v5385_v44 = vpack.c.bf16 %v100_v32, %v98_v28  ;;  %v4817_v63 = vld [vmem:[#allocation6 + $0x364] sm:$0xf0]  ;;  %v4749_v4 = vld [vmem:[#allocation6 + $0x14c] sm:$0xf]  ;;  %v102_v13 = vld [vmem:[#allocation3 + $0x20] sm:$0xff] }
  0x39   :  { %944 = vmatpush.bf16.msra.mxu1 %v4151_v35  ;;  %1002 = vmatpush.bf16.msra.mxu3 %v4155_v39  ;;  %v4064_v5 = vld [vmem:[#allocation6 + $0x168] sm:$0xf0]  ;;  %v4319_v6 = vor.u32 %v4817_v63, %v4318_v62  ;;  %v4030_v8 = vld [vmem:[#allocation6 + $0x108] sm:$0xf]  ;;  %v104_v23 = vld [vmem:[#allocation3 + $0x30] sm:$0xff] }
  0x3a   :  { %916 = vmatmul.bf16.vlgmr.msra.gmra.mxu0 %v5385_v44  ;;  %974 = vmatmul.bf16.vlgmr.msra.gmra.mxu2 %v5385_v44  ;;  %v4320_v7 = vld [vmem:[#allocation6 + $0x368] sm:$0xf0]  ;;  %v4745_v9 = vld [vmem:[#allocation6 + $0x124] sm:$0xf0]  ;;  %v4067_v12 = vor.u32 %v4749_v4, %v4064_v5  ;;  %v105_v27 = vld [vmem:[#allocation3 + $0x38] sm:$0xff]  ;;  %v5393_v34 = vpack.c.bf16 %v104_v23, %v102_v13 }
  0x3b   :  { %1024 = vmatpush.bf16.msrb.mxu0 %v4127_v40  ;;  %1082 = vmatpush.bf16.msrb.mxu2 %v4131_v52  ;;  %v4286_v10 = vld [vmem:[#allocation6 + $0x308] sm:$0xf]  ;;  %v4323_v14 = vor.u32 %v4813_v3, %v4320_v7  ;;  %v4031_v15 = vor.u32 %v4745_v9, %v4030_v8  ;;  %v4805_v16 = vld [vmem:[#allocation6 + $0x30c] sm:$0xf]  ;;  %v108_v13 = vld [vmem:[#allocation3 + $0x50] sm:$0xff] }
  0x3c   :  { %945 = vmatmul.bf16.vlgmr.msra.gmra.mxu1 %v5387_v49  ;;  %1003 = vmatmul.bf16.vlgmr.msra.gmra.mxu3 %v5387_v49  ;;  %v4809_v11 = vld [vmem:[#allocation6 + $0x324] sm:$0xf0]  ;;  %v4741_v17 = vld [vmem:[#allocation6 + $0x10c] sm:$0xf] }
  0x3d   :  { %1053 = vmatpush.bf16.msrb.mxu1 %v4383_v45  ;;  %1111 = vmatpush.bf16.msrb.mxu3 %v4387_v53  ;;  %v4032_v18 = vld [vmem:[#allocation6 + $0x128] sm:$0xf0]  ;;  %v4287_v19 = vor.u32 %v4809_v11, %v4286_v10  ;;  %v3998_v21 = vld [vmem:[#allocation6 + $0xc8] sm:$0xf] }
  0x3e   :  { %v4288_v20 = vld [vmem:[#allocation6 + $0x328] sm:$0xf0]  ;;  %v4737_v22 = vld [vmem:[#allocation6 + $0xe4] sm:$0xf0]  ;;  %v4035_v28 = vor.u32 %v4741_v17, %v4032_v18 }
  0x3f   :  { %1025 = vmatpush.bf16.msrb.mxu0 %v4095_v54  ;;  %1083 = vmatpush.bf16.msrb.mxu2 %v4099_v0  ;;  %v4254_v24 = vld [vmem:[#allocation6 + $0x2c8] sm:$0xf]  ;;  %v4291_v29 = vor.u32 %v4805_v16, %v4288_v20  ;;  %v3999_v30 = vor.u32 %v4737_v22, %v3998_v21  ;;  %v4797_v31 = vld [vmem:[#allocation6 + $0x2cc] sm:$0xf]  ;;  %v4134_v20 = vld [vmem:[#allocation6 + $0x1d0] sm:$0xf] }
  0x40   :  { %v4801_v25 = vld [vmem:[#allocation6 + $0x2e4] sm:$0xf0]  ;;  %v4733_v32 = vld [vmem:[#allocation6 + $0xcc] sm:$0xf]  ;;  %v4770_v21 = vld [vmem:[#allocation6 + $0x1ec] sm:$0xf0] }
  0x41   :  { %1054 = vmatpush.bf16.msrb.mxu1 %v4351_v58  ;;  %1112 = vmatpush.bf16.msrb.mxu3 %v4355_v1  ;;  %v103_v26 = vld [vmem:[#allocation3 + $0x28] sm:$0xff]  ;;  %v4255_v35 = vor.u32 %v4801_v25, %v4254_v24  ;;  %v4390_v22 = vld [vmem:[#allocation6 + $0x3d0] sm:$0xf]  ;;  %v4135_v23 = vor.u32 %v4770_v21, %v4134_v20  ;;  %v4830_v25 = vld [vmem:[#allocation6 + $0x3d4] sm:$0xf] }
  0x42   :  { %v4000_v33 = vld [vmem:[#allocation6 + $0xe8] sm:$0xf0]  ;;  %v3966_v37 = vld [vmem:[#allocation6 + $0x88] sm:$0xf]  ;;  %v5395_v39 = vpack.c.bf16 %v105_v27, %v103_v26  ;;  %v4834_v24 = vld [vmem:[#allocation6 + $0x3ec] sm:$0xf0] }
  0x43   :  { %1026 = vmatpush.bf16.msrb.mxu0 %v4063_v2  ;;  %1084 = vmatpush.bf16.msrb.mxu2 %v4067_v12  ;;  %v4256_v36 = vld [vmem:[#allocation6 + $0x2e8] sm:$0xf0]  ;;  %v4729_v38 = vld [vmem:[#allocation6 + $0xa4] sm:$0xf0]  ;;  %v4003_v42 = vor.u32 %v4733_v32, %v4000_v33  ;;  %v106_v12 = vld [vmem:[#allocation3 + $0x40] sm:$0xff]  ;;  %v4391_v27 = vor.u32 %v4834_v24, %v4390_v22 }
  0x44   :  { %v4222_v40 = vld [vmem:[#allocation6 + $0x288] sm:$0xf]  ;;  %v4259_v43 = vor.u32 %v4797_v31, %v4256_v36  ;;  %v3967_v45 = vor.u32 %v4729_v38, %v3966_v37  ;;  %v4789_v47 = vld [vmem:[#allocation6 + $0x28c] sm:$0xf]  ;;  %v5401_v18 = vpack.c.bf16 %v108_v13, %v106_v12  ;;  %v4392_v26 = vld [vmem:[#allocation6 + $0x3f0] sm:$0xf0] }
  0x45   :  { %1055 = vmatpush.bf16.msrb.mxu1 %v4319_v6  ;;  %1113 = vmatpush.bf16.msrb.mxu3 %v4323_v14  ;;  %v4793_v41 = vld [vmem:[#allocation6 + $0x2a4] sm:$0xf0]  ;;  %v4224_v48 = vld [vmem:[#allocation6 + $0x2a8] sm:$0xf0]  ;;  %v4358_v31 = vld [vmem:[#allocation6 + $0x390] sm:$0xf] }
  0x46   :  { %v4223_v46 = vor.u32 %v4793_v41, %v4222_v40  ;;  %v3934_v50 = vld [vmem:[#allocation6 + $0x48] sm:$0xf]  ;;  %v4227_v53 = vor.u32 %v4789_v47, %v4224_v48  ;;  %v4725_v56 = vld [vmem:[#allocation6 + $0x8c] sm:$0xf]  ;;  %v4826_v33 = vld [vmem:[#allocation6 + $0x3ac] sm:$0xf0] }
  0x47   :  { %1027 = vmatpush.bf16.msrb.mxu0 %v4031_v15  ;;  %1085 = vmatpush.bf16.msrb.mxu2 %v4035_v28  ;;  %v4721_v51 = vld [vmem:[#allocation6 + $0x64] sm:$0xf0]  ;;  %v3968_v57 = vld [vmem:[#allocation6 + $0xa8] sm:$0xf0]  ;;  %v109_v15 = vld [vmem:[#allocation3 + $0x58] sm:$0xff]  ;;  %v4395_v28 = vor.u32 %v4830_v25, %v4392_v26  ;;  %v4359_v37 = vor.u32 %v4826_v33, %v4358_v31 }
  0x48   :  { %v4190_v52 = vld [vmem:[#allocation6 + $0x248] sm:$0xf]  ;;  %v3935_v54 = vor.u32 %v4721_v51, %v3934_v50  ;;  %v3971_v59 = vor.u32 %v4725_v56, %v3968_v57  ;;  %v4781_v60 = vld [vmem:[#allocation6 + $0x24c] sm:$0xf]  ;;  %v4360_v36 = vld [vmem:[#allocation6 + $0x3b0] sm:$0xf0] }
  0x49   :  { %1056 = vmatpush.bf16.msrb.mxu1 %v4287_v19  ;;  %1114 = vmatpush.bf16.msrb.mxu3 %v4291_v29  ;;  %v4785_v55 = vld [vmem:[#allocation6 + $0x264] sm:$0xf0]  ;;  %v4192_v61 = vld [vmem:[#allocation6 + $0x268] sm:$0xf0]  ;;  %v4102_v29 = vld [vmem:[#allocation6 + $0x190] sm:$0xf] }
  0x4a   :  { %921 = vmatmul.bf16.gmra.mxu0 %v5393_v34  ;;  %979 = vmatmul.bf16.gmra.mxu2 %v5393_v34  ;;  %v4191_v58 = vor.u32 %v4785_v55, %v4190_v52  ;;  %v3902_v62 = vld [vmem:[#allocation6 + $0x8] sm:$0xf]  ;;  %v4717_v2 = vld [vmem:[#allocation6 + $0x4c] sm:$0xf]  ;;  %v4195_v4 = vor.u32 %v4781_v60, %v4192_v61  ;;  %v4766_v40 = vld [vmem:[#allocation6 + $0x1d4] sm:$0xf] }
  0x4b   :  { %1028 = vmatpush.bf16.msrb.mxu0 %v3999_v30  ;;  %1086 = vmatpush.bf16.msrb.mxu2 %v4003_v42  ;;  %v4713_v63 = vld [vmem:[#allocation6 + $0x24] sm:$0xf0]  ;;  %v3936_v3 = vld [vmem:[#allocation6 + $0x68] sm:$0xf0]  ;;  %v4762_v30 = vld [vmem:[#allocation6 + $0x1ac] sm:$0xf0] }
  0x4c   :  { %950 = vmatmul.bf16.gmra.mxu1 %v5395_v39  ;;  %1008 = vmatmul.bf16.gmra.mxu3 %v5395_v39  ;;  %v4158_v0 = vld [vmem:[#allocation6 + $0x208] sm:$0xf]  ;;  %v3903_v5 = vor.u32 %v4713_v63, %v3902_v62  ;;  %v3939_v6 = vor.u32 %v4717_v2, %v3936_v3  ;;  %v4709_v7 = vld [vmem:[#allocation6 + $0xc] sm:$0xf]  ;;  %v4103_v32 = vor.u32 %v4762_v30, %v4102_v29  ;;  %v4136_v41 = vld [vmem:[#allocation6 + $0x1f0] sm:$0xf0] }
  0x4d   :  { %1057 = vmatpush.bf16.msrb.mxu1 %v4255_v35  ;;  %1115 = vmatpush.bf16.msrb.mxu3 %v4259_v43  ;;  %v4777_v1 = vld [vmem:[#allocation6 + $0x224] sm:$0xf0]  ;;  %v3904_v8 = vld [vmem:[#allocation6 + $0x28] sm:$0xf0]  ;;  %v4822_v35 = vld [vmem:[#allocation6 + $0x394] sm:$0xf]  ;;  %v4139_v42 = vor.u32 %v4766_v40, %v4136_v41 }
  0x4e   :  { %v4159_v9 = vor.u32 %v4777_v1, %v4158_v0  ;;  %v4773_v10 = vld [vmem:[#allocation6 + $0x20c] sm:$0xf]  ;;  %v3907_v16 = vor.u32 %v4709_v7, %v3904_v8  ;;  %v4363_v38 = vor.u32 %v4822_v35, %v4360_v36  ;;  %v110_v43 = vld [vmem:[#allocation3 + $0x60] sm:$0xff]  ;;  %v113_v47 = vld [vmem:[#allocation3 + $0x78] sm:$0xff] }
  0x4f   :  { %1029 = vmatpush.bf16.msrb.mxu0 %v3967_v45  ;;  %1087 = vmatpush.bf16.msrb.mxu2 %v3971_v59  ;;  %v4160_v11 = vld [vmem:[#allocation6 + $0x228] sm:$0xf0]  ;;  %v112_v45 = vld [vmem:[#allocation3 + $0x70] sm:$0xff] }
  0x50   :  { %v107_v14 = vld [vmem:[#allocation3 + $0x48] sm:$0xff]  ;;  %v4163_v17 = vor.u32 %v4773_v10, %v4160_v11  ;;  %v5409_v48 = vpack.c.bf16 %v112_v45, %v110_v43  ;;  %v4070_v51 = vld [vmem:[#allocation6 + $0x150] sm:$0xf]  ;;  %v4814_v56 = vld [vmem:[#allocation6 + $0x354] sm:$0xf] }
  0x51   :  { %1058 = vmatpush.bf16.msrb.mxu1 %v4223_v46  ;;  %1116 = vmatpush.bf16.msrb.mxu3 %v4227_v53  ;;  %v5403_v19 = vpack.c.bf16 %v109_v15, %v107_v14  ;;  %v111_v46 = vld [vmem:[#allocation3 + $0x68] sm:$0xff]  ;;  %v4754_v52 = vld [vmem:[#allocation6 + $0x16c] sm:$0xf0]  ;;  %v4328_v57 = vld [vmem:[#allocation6 + $0x370] sm:$0xf0] }
  0x52   :  { %v5411_v50 = vpack.c.bf16 %v113_v47, %v111_v46  ;;  %v4326_v53 = vld [vmem:[#allocation6 + $0x350] sm:$0xf]  ;;  %v4331_v59 = vor.u32 %v4814_v56, %v4328_v57  ;;  %v4758_v60 = vld [vmem:[#allocation6 + $0x194] sm:$0xf] }
  0x53   :  { %1030 = vmatpush.bf16.msrb.mxu0 %v3935_v54  ;;  %1088 = vmatpush.bf16.msrb.mxu2 %v3939_v6  ;;  %v4071_v54 = vor.u32 %v4754_v52, %v4070_v51  ;;  %v4818_v55 = vld [vmem:[#allocation6 + $0x36c] sm:$0xf0]  ;;  %v4104_v61 = vld [vmem:[#allocation6 + $0x1b0] sm:$0xf0] }
  0x54   :  { %v4038_v62 = vld [vmem:[#allocation6 + $0x110] sm:$0xf]  ;;  %v4107_v63 = vor.u32 %v4758_v60, %v4104_v61  ;;  %v4296_v6 = vld [vmem:[#allocation6 + $0x330] sm:$0xf0] }
  0x55   :  { %1059 = vmatpush.bf16.msrb.mxu1 %v4191_v58  ;;  %1117 = vmatpush.bf16.msrb.mxu3 %v4195_v4  ;;  %v4327_v58 = vor.u32 %v4818_v55, %v4326_v53  ;;  %v4746_v0 = vld [vmem:[#allocation6 + $0x12c] sm:$0xf0]  ;;  %v4750_v7 = vld [vmem:[#allocation6 + $0x154] sm:$0xf] }
  0x56   :  { %v4294_v1 = vld [vmem:[#allocation6 + $0x310] sm:$0xf]  ;;  %v4039_v3 = vor.u32 %v4746_v0, %v4038_v62  ;;  %v4742_v22 = vld [vmem:[#allocation6 + $0x114] sm:$0xf] }
  0x57   :  { %1031 = vmatpush.bf16.msrb.mxu0 %v3903_v5  ;;  %1089 = vmatpush.bf16.msrb.mxu2 %v3907_v16  ;;  %v4810_v2 = vld [vmem:[#allocation6 + $0x32c] sm:$0xf0]  ;;  %v4806_v5 = vld [vmem:[#allocation6 + $0x314] sm:$0xf] }
  0x58   :  { %v4295_v4 = vor.u32 %v4810_v2, %v4294_v1  ;;  %v4299_v8 = vor.u32 %v4806_v5, %v4296_v6  ;;  %v4006_v11 = vld [vmem:[#allocation6 + $0xd0] sm:$0xf]  ;;  %v4798_v16 = vld [vmem:[#allocation6 + $0x2d4] sm:$0xf]  ;;  %v4142_v6 = vld [vmem:[#allocation6 + $0x1d8] sm:$0xf] }
  0x59   :  { %1060 = vmatpush.bf16.msrb.mxu1 %v4159_v9  ;;  %1118 = vmatpush.bf16.msrb.mxu3 %v4163_v17  ;;  %v4072_v9 = vld [vmem:[#allocation6 + $0x170] sm:$0xf0]  ;;  %v4738_v12 = vld [vmem:[#allocation6 + $0xec] sm:$0xf0] }
  0x5a   :  { %926 = vmatmul.bf16.gmra.mxu0 %v5401_v18  ;;  %984 = vmatmul.bf16.gmra.mxu2 %v5401_v18  ;;  %v4075_v10 = vor.u32 %v4750_v7, %v4072_v9  ;;  %v4262_v13 = vld [vmem:[#allocation6 + $0x2d0] sm:$0xf]  ;;  %v4007_v14 = vor.u32 %v4738_v12, %v4006_v11  ;;  %v4264_v17 = vld [vmem:[#allocation6 + $0x2f0] sm:$0xf0]  ;;  %v4771_v7 = vld [vmem:[#allocation6 + $0x1f4] sm:$0xf0] }
  0x5b   :  { %1140 = vmatpush.bf16.msra.mxu0 %v4135_v23  ;;  %1198 = vmatpush.bf16.msra.mxu2 %v4139_v42  ;;  %v4802_v15 = vld [vmem:[#allocation6 + $0x2ec] sm:$0xf0]  ;;  %v4267_v21 = vor.u32 %v4798_v16, %v4264_v17  ;;  %v4040_v23 = vld [vmem:[#allocation6 + $0x130] sm:$0xf0]  ;;  %v4143_v9 = vor.u32 %v4771_v7, %v4142_v6  ;;  %v4831_v12 = vld [vmem:[#allocation6 + $0x3dc] sm:$0xf] }
  0x5c   :  { %955 = vmatmul.bf16.gmra.mxu1 %v5403_v19  ;;  %1013 = vmatmul.bf16.gmra.mxu3 %v5403_v19  ;;  %v4263_v20 = vor.u32 %v4802_v15, %v4262_v13  ;;  %v3974_v24 = vld [vmem:[#allocation6 + $0x90] sm:$0xf]  ;;  %v4043_v25 = vor.u32 %v4742_v22, %v4040_v23  ;;  %v4790_v31 = vld [vmem:[#allocation6 + $0x294] sm:$0xf]  ;;  %v4400_v13 = vld [vmem:[#allocation6 + $0x3f8] sm:$0xf0] }
  0x5d   :  { %1169 = vmatpush.bf16.msra.mxu1 %v4391_v27  ;;  %1227 = vmatpush.bf16.msra.mxu3 %v4395_v28  ;;  %v4730_v26 = vld [vmem:[#allocation6 + $0xac] sm:$0xf0]  ;;  %v4734_v33 = vld [vmem:[#allocation6 + $0xd4] sm:$0xf]  ;;  %v4403_v15 = vor.u32 %v4831_v12, %v4400_v13  ;;  %v4763_v16 = vld [vmem:[#allocation6 + $0x1b4] sm:$0xf0] }
  0x5e   :  { %v4230_v27 = vld [vmem:[#allocation6 + $0x290] sm:$0xf]  ;;  %v3975_v29 = vor.u32 %v4730_v26, %v3974_v24  ;;  %v4008_v36 = vld [vmem:[#allocation6 + $0xf0] sm:$0xf0]  ;;  %v4366_v17 = vld [vmem:[#allocation6 + $0x398] sm:$0xf] }
  0x5f   :  { %1141 = vmatpush.bf16.msra.mxu0 %v4103_v32  ;;  %1199 = vmatpush.bf16.msra.mxu2 %v4107_v63  ;;  %v4794_v28 = vld [vmem:[#allocation6 + $0x2ac] sm:$0xf0]  ;;  %v4232_v32 = vld [vmem:[#allocation6 + $0x2b0] sm:$0xf0]  ;;  %v4823_v23 = vld [vmem:[#allocation6 + $0x39c] sm:$0xf] }
  0x60   :  { %v4231_v30 = vor.u32 %v4794_v28, %v4230_v27  ;;  %v4235_v35 = vor.u32 %v4790_v31, %v4232_v32  ;;  %v4722_v40 = vld [vmem:[#allocation6 + $0x6c] sm:$0xf0]  ;;  %v4726_v45 = vld [vmem:[#allocation6 + $0x94] sm:$0xf]  ;;  %v4368_v24 = vld [vmem:[#allocation6 + $0x3b8] sm:$0xf0] }
  0x61   :  { %1170 = vmatpush.bf16.msra.mxu1 %v4359_v37  ;;  %1228 = vmatpush.bf16.msra.mxu3 %v4363_v38  ;;  %v4011_v37 = vor.u32 %v4734_v33, %v4008_v36  ;;  %v3942_v38 = vld [vmem:[#allocation6 + $0x50] sm:$0xf]  ;;  %v3976_v46 = vld [vmem:[#allocation6 + $0xb0] sm:$0xf0]  ;;  %v4371_v26 = vor.u32 %v4823_v23, %v4368_v24  ;;  %v4144_v27 = vld [vmem:[#allocation6 + $0x1f8] sm:$0xf0] }
  0x62   :  { %v4198_v41 = vld [vmem:[#allocation6 + $0x250] sm:$0xf]  ;;  %v3943_v42 = vor.u32 %v4722_v40, %v3942_v38  ;;  %v3979_v51 = vor.u32 %v4726_v45, %v3976_v46  ;;  %v4782_v52 = vld [vmem:[#allocation6 + $0x254] sm:$0xf]  ;;  %v4334_v31 = vld [vmem:[#allocation6 + $0x358] sm:$0xf] }
  0x63   :  { %1142 = vmatpush.bf16.msra.mxu0 %v4071_v54  ;;  %1200 = vmatpush.bf16.msra.mxu2 %v4075_v10  ;;  %v4786_v43 = vld [vmem:[#allocation6 + $0x26c] sm:$0xf0]  ;;  %v4200_v53 = vld [vmem:[#allocation6 + $0x270] sm:$0xf0]  ;;  %v4835_v10 = vld [vmem:[#allocation6 + $0x3f4] sm:$0xf0] }
  0x64   :  { %v4199_v47 = vor.u32 %v4786_v43, %v4198_v41  ;;  %v3910_v54 = vld [vmem:[#allocation6 + $0x10] sm:$0xf]  ;;  %v4203_v55 = vor.u32 %v4782_v52, %v4200_v53  ;;  %v4718_v61 = vld [vmem:[#allocation6 + $0x54] sm:$0xf]  ;;  %v4819_v33 = vld [vmem:[#allocation6 + $0x374] sm:$0xf0] }
  0x65   :  { %1171 = vmatpush.bf16.msra.mxu1 %v4327_v58  ;;  %1229 = vmatpush.bf16.msra.mxu3 %v4331_v59  ;;  %v4714_v56 = vld [vmem:[#allocation6 + $0x2c] sm:$0xf0]  ;;  %v3944_v62 = vld [vmem:[#allocation6 + $0x70] sm:$0xf0]  ;;  %v5433_v36 = vld [vmem:[#allocation11] sm:$0xff] }
  0x66   :  { %v4166_v57 = vld [vmem:[#allocation6 + $0x210] sm:$0xf]  ;;  %v3911_v59 = vor.u32 %v4714_v56, %v3910_v54  ;;  %v3947_v63 = vor.u32 %v4718_v61, %v3944_v62  ;;  %v4710_v0 = vld [vmem:[#allocation6 + $0x14] sm:$0xf]  ;;  %v4336_v38 = vld [vmem:[#allocation6 + $0x378] sm:$0xf0] }
  0x67   :  { %1143 = vmatpush.bf16.msra.mxu0 %v4039_v3  ;;  %1201 = vmatpush.bf16.msra.mxu2 %v4043_v25  ;;  %v4778_v58 = vld [vmem:[#allocation6 + $0x22c] sm:$0xf0]  ;;  %v3912_v1 = vld [vmem:[#allocation6 + $0x30] sm:$0xf0]  ;;  %v4767_v25 = vld [vmem:[#allocation6 + $0x1dc] sm:$0xf] }
  0x68   :  { %v4167_v60 = vor.u32 %v4778_v58, %v4166_v57  ;;  %v4774_v2 = vld [vmem:[#allocation6 + $0x214] sm:$0xf]  ;;  %v3915_v3 = vor.u32 %v4710_v0, %v3912_v1  ;;  %v4147_v28 = vor.u32 %v4767_v25, %v4144_v27  ;;  %v4759_v40 = vld [vmem:[#allocation6 + $0x19c] sm:$0xf]  ;;  %v4046_v43 = vld [vmem:[#allocation6 + $0x118] sm:$0xf] }
  0x69   :  { %1172 = vmatpush.bf16.msra.mxu1 %v4295_v4  ;;  %1230 = vmatpush.bf16.msra.mxu3 %v4299_v8  ;;  %v4168_v4 = vld [vmem:[#allocation6 + $0x230] sm:$0xf0]  ;;  %v4398_v8 = vld [vmem:[#allocation6 + $0x3d8] sm:$0xf]  ;;  %v5436_v46 = vperm.slane %v5433_v36, 0  ;;  %v5445_v62 = vperm.slane %v5433_v36, 1 }
  0x6a   :  { %931 = vmatmul.bf16.gmra.mxu0 %v5409_v48  ;;  %989 = vmatmul.bf16.gmra.mxu2 %v5409_v48  ;;  %v4171_v5 = vor.u32 %v4774_v2, %v4168_v4  ;;  %v4399_v11 = vor.u32 %v4835_v10, %v4398_v8  ;;  %v4747_v45 = vld [vmem:[#allocation6 + $0x134] sm:$0xf0]  ;;  %v4751_v61 = vld [vmem:[#allocation6 + $0x15c] sm:$0xf] }
  0x6b   :  { %1144 = vmatpush.bf16.msra.mxu0 %v4007_v14  ;;  %1202 = vmatpush.bf16.msra.mxu2 %v4011_v37  ;;  %v4110_v14 = vld [vmem:[#allocation6 + $0x198] sm:$0xf]  ;;  %v4815_v37 = vld [vmem:[#allocation6 + $0x35c] sm:$0xf] }
  0x6c   :  { %960 = vmatmul.bf16.gmra.mxu1 %v5411_v50  ;;  %1018 = vmatmul.bf16.gmra.mxu3 %v5411_v50  ;;  %v4339_v41 = vor.u32 %v4815_v37, %v4336_v38  ;;  %v4302_v52 = vld [vmem:[#allocation6 + $0x318] sm:$0xf]  ;;  %v4080_v0 = vld [vmem:[#allocation6 + $0x178] sm:$0xf0] }
  0x6d   :  { %1173 = vmatpush.bf16.msra.mxu1 %v4263_v20  ;;  %1231 = vmatpush.bf16.msra.mxu3 %v4267_v21  ;;  %v4827_v20 = vld [vmem:[#allocation6 + $0x3b4] sm:$0xf0]  ;;  %v4111_v21 = vor.u32 %v4763_v16, %v4110_v14  ;;  %v4083_v1 = vor.u32 %v4751_v61, %v4080_v0  ;;  %v4799_v16 = vld [vmem:[#allocation6 + $0x2dc] sm:$0xf] }
  0x6e   :  { %v4367_v22 = vor.u32 %v4827_v20, %v4366_v17  ;;  %v4811_v53 = vld [vmem:[#allocation6 + $0x334] sm:$0xf0]  ;;  %v4272_v17 = vld [vmem:[#allocation6 + $0x2f8] sm:$0xf0] }
  0x6f   :  { %1145 = vmatpush.bf16.msra.mxu0 %v3975_v29  ;;  %1203 = vmatpush.bf16.msra.mxu2 %v3979_v51  ;;  %v4078_v29 = vld [vmem:[#allocation6 + $0x158] sm:$0xf]  ;;  %v4047_v51 = vor.u32 %v4747_v45, %v4046_v43  ;;  %v4303_v54 = vor.u32 %v4811_v53, %v4302_v52  ;;  %v4743_v20 = vld [vmem:[#allocation6 + $0x11c] sm:$0xf] }
  0x70   :  { %v4014_v2 = vld [vmem:[#allocation6 + $0xd8] sm:$0xf]  ;;  %v4735_v43 = vld [vmem:[#allocation6 + $0xdc] sm:$0xf] }
  0x71   :  { %1174 = vmatpush.bf16.msra.mxu1 %v4231_v30  ;;  %1232 = vmatpush.bf16.msra.mxu3 %v4235_v35  ;;  %v4755_v30 = vld [vmem:[#allocation6 + $0x174] sm:$0xf0]  ;;  %v4335_v35 = vor.u32 %v4819_v33, %v4334_v31  ;;  %v3984_v61 = vld [vmem:[#allocation6 + $0xb8] sm:$0xf0] }
  0x72   :  { %v4079_v32 = vor.u32 %v4755_v30, %v4078_v29  ;;  %v4270_v4 = vld [vmem:[#allocation6 + $0x2d8] sm:$0xf] }
  0x73   :  { %1146 = vmatpush.bf16.msra.mxu0 %v3943_v42  ;;  %1204 = vmatpush.bf16.msra.mxu2 %v3947_v63  ;;  %v4112_v42 = vld [vmem:[#allocation6 + $0x1b8] sm:$0xf0]  ;;  %v4803_v6 = vld [vmem:[#allocation6 + $0x2f4] sm:$0xf0] }
  0x74   :  { %v4271_v8 = vor.u32 %v4803_v6, %v4270_v4  ;;  %v3982_v23 = vld [vmem:[#allocation6 + $0x98] sm:$0xf] }
  0x75   :  { %1175 = vmatpush.bf16.msra.mxu1 %v4199_v47  ;;  %1233 = vmatpush.bf16.msra.mxu3 %v4203_v55  ;;  %v4115_v47 = vor.u32 %v4759_v40, %v4112_v42  ;;  %v4731_v24 = vld [vmem:[#allocation6 + $0xb4] sm:$0xf0]  ;;  %v4240_v42 = vld [vmem:[#allocation6 + $0x2b8] sm:$0xf0] }
  0x76   :  { %v4238_v27 = vld [vmem:[#allocation6 + $0x298] sm:$0xf] }
  0x77   :  { %1147 = vmatpush.bf16.msra.mxu0 %v3911_v59  ;;  %1205 = vmatpush.bf16.msra.mxu2 %v3915_v3  ;;  %v4807_v59 = vld [vmem:[#allocation6 + $0x31c] sm:$0xf]  ;;  %v4739_v3 = vld [vmem:[#allocation6 + $0xf4] sm:$0xf0] }
  0x78   :  { %v3950_v52 = vld [vmem:[#allocation6 + $0x58] sm:$0xf] }
  0x79   :  { %1176 = vmatpush.bf16.msra.mxu1 %v4167_v60  ;;  %1234 = vmatpush.bf16.msra.mxu3 %v4171_v5  ;;  %v4304_v60 = vld [vmem:[#allocation6 + $0x338] sm:$0xf0]  ;;  %v4015_v5 = vor.u32 %v4739_v3, %v4014_v2  ;;  %v4723_v53 = vld [vmem:[#allocation6 + $0x74] sm:$0xf0] }
  0x7a   :  { %1032 = vmatmul.bf16.vlgmr.msrb.gmra.mxu0 %v5385_v44  ;;  %1090 = vmatmul.bf16.vlgmr.msrb.gmra.mxu2 %v5385_v44  ;;  %v4307_v63 = vor.u32 %v4807_v59, %v4304_v60  ;;  %v4727_v60 = vld [vmem:[#allocation6 + $0x9c] sm:$0xf] }
  0x7b   :  { %1256 = vmatpush.bf16.msrb.mxu0 %v4143_v9  ;;  %1314 = vmatpush.bf16.msrb.mxu2 %v4147_v28  ;;  %v4795_v28 = vld [vmem:[#allocation6 + $0x2b4] sm:$0xf0]  ;;  %v3987_v2 = vor.u32 %v4727_v60, %v3984_v61 }
  0x7c   :  { %1061 = vmatmul.bf16.vlgmr.msrb.gmra.mxu1 %v5387_v49  ;;  %1119 = vmatmul.bf16.vlgmr.msrb.gmra.mxu3 %v5387_v49  ;;  %v4239_v29 = vor.u32 %v4795_v28, %v4238_v27 }
  0x7d   :  { %1285 = vmatpush.bf16.msrb.mxu1 %v4399_v11  ;;  %1343 = vmatpush.bf16.msrb.mxu3 %v4403_v15 }
  0x7f   :  { %1257 = vmatpush.bf16.msrb.mxu0 %v4111_v21  ;;  %1315 = vmatpush.bf16.msrb.mxu2 %v4115_v47  ;;  %v4275_v21 = vor.u32 %v4799_v16, %v4272_v17  ;;  %v4016_v47 = vld [vmem:[#allocation6 + $0xf8] sm:$0xf0] }
  0x81   :  { %1286 = vmatpush.bf16.msrb.mxu1 %v4367_v22  ;;  %1344 = vmatpush.bf16.msrb.mxu3 %v4371_v26  ;;  %v4048_v22 = vld [vmem:[#allocation6 + $0x138] sm:$0xf0]  ;;  %v3983_v26 = vor.u32 %v4731_v24, %v3982_v23 }
  0x82   :  { %v4051_v25 = vor.u32 %v4743_v20, %v4048_v22  ;;  %v4719_v20 = vld [vmem:[#allocation6 + $0x5c] sm:$0xf] }
  0x83   :  { %1258 = vmatpush.bf16.msrb.mxu0 %v4079_v32  ;;  %1316 = vmatpush.bf16.msrb.mxu2 %v4083_v1  ;;  %v4711_v24 = vld [vmem:[#allocation6 + $0x1c] sm:$0xf] }
  0x85   :  { %1287 = vmatpush.bf16.msrb.mxu1 %v4335_v35  ;;  %1345 = vmatpush.bf16.msrb.mxu3 %v4339_v41  ;;  %v4791_v41 = vld [vmem:[#allocation6 + $0x29c] sm:$0xf] }
  0x86   :  { %v4243_v45 = vor.u32 %v4791_v41, %v4240_v42  ;;  %v4518_v42 = vld [vmem:[#allocation8 + $0xe0] sm:$0xf] }
  0x87   :  { %1259 = vmatpush.bf16.msrb.mxu0 %v4047_v51  ;;  %1317 = vmatpush.bf16.msrb.mxu2 %v4051_v25  ;;  %v4019_v51 = vor.u32 %v4735_v43, %v4016_v47  ;;  %v3920_v25 = vld [vmem:[#allocation6 + $0x38] sm:$0xf0]  ;;  %v4866_v43 = vld [vmem:[#allocation8 + $0xec] sm:$0xf0] }
  0x88   :  { %v5480_v47 = vor.u32 %v4866_v43, %v4518_v42 }
  0x89   :  { %1288 = vmatpush.bf16.msrb.mxu1 %v4303_v54  ;;  %1346 = vmatpush.bf16.msrb.mxu3 %v4307_v63  ;;  %v4206_v54 = vld [vmem:[#allocation6 + $0x258] sm:$0xf] }
  0x8a   :  { %1037 = vmatmul.bf16.gmra.mxu0 %v5393_v34  ;;  %1095 = vmatmul.bf16.gmra.mxu2 %v5393_v34 }
  0x8b   :  { %1260 = vmatpush.bf16.msrb.mxu0 %v4015_v5  ;;  %1318 = vmatpush.bf16.msrb.mxu2 %v4019_v51  ;;  %v4520_v51 = vld [vmem:[#allocation8 + $0xf0] sm:$0xf0] }
  0x8c   :  { %1066 = vmatmul.bf16.gmra.mxu1 %v5395_v39  ;;  %1124 = vmatmul.bf16.gmra.mxu3 %v5395_v39 }
  0x8d   :  { %1289 = vmatpush.bf16.msrb.mxu1 %v4271_v8  ;;  %1347 = vmatpush.bf16.msrb.mxu3 %v4275_v21  ;;  %v4208_v8 = vld [vmem:[#allocation6 + $0x278] sm:$0xf0] }
  0x8e   :  { %v3952_v21 = vld [vmem:[#allocation6 + $0x78] sm:$0xf0] }
  0x8f   :  { %1261 = vmatpush.bf16.msrb.mxu0 %v3983_v26  ;;  %1319 = vmatpush.bf16.msrb.mxu2 %v3987_v2  ;;  %v3955_v22 = vor.u32 %v4719_v20, %v3952_v21  ;;  %v4775_v26 = vld [vmem:[#allocation6 + $0x21c] sm:$0xf] }
  0x91   :  { %1290 = vmatpush.bf16.msrb.mxu1 %v4239_v29  ;;  %1348 = vmatpush.bf16.msrb.mxu3 %v4243_v45  ;;  %v4864_v45 = vld [vmem:[#allocation8 + $0xe4] sm:$0xf] }
  0x93   :  { %1320 = vmatpush.bf16.msrb.mxu2 %v3955_v22  ;;  %v4861_v22 = vld [vmem:[#allocation8 + $0xcc] sm:$0xf] }
  0x9a   :  { %1042 = vmatmul.bf16.gmra.mxu0 %v5401_v18  ;;  %1100 = vmatmul.bf16.gmra.mxu2 %v5401_v18 }
  0x9c   :  { %1071 = vmatmul.bf16.gmra.mxu1 %v5403_v19  ;;  %1129 = vmatmul.bf16.gmra.mxu3 %v5403_v19 }
  0xaa   :  { %1047 = vmatmul.bf16.gmra.mxu0 %v5409_v48  ;;  %1105 = vmatmul.bf16.gmra.mxu2 %v5409_v48 }
  0xac   :  { %1076 = vmatmul.bf16.gmra.mxu1 %v5411_v50  ;;  %1134 = vmatmul.bf16.gmra.mxu3 %v5411_v50 }
  0xb7   :  { %v917_v55 = vpop.f32.mrf.mxu0 }
  0xb8   :  { %v918_v56 = vadd.f32 %v917_v55, %v5436_v46  ;;  %v3951_v55 = vor.u32 %v4723_v53, %v3950_v52  ;;  %v5482_v53 = vor.u32 %v4864_v45, %v4520_v51 }
  0xb9   :  { %v946_v57 = vpop.f32.mrf.mxu1 }
  0xba   :  { %v5439_v58 = vadd.f32 %v946_v57, %v918_v56  ;;  %1148 = vmatmul.bf16.vlgmr.msra.gmra.mxu0 %v5385_v44  ;;  %1206 = vmatmul.bf16.vlgmr.msra.gmra.mxu2 %v5385_v44  ;;  %v4787_v56 = vld [vmem:[#allocation6 + $0x274] sm:$0xf0] }
  0xbb   :  { %v4207_v59 = vor.u32 %v4787_v56, %v4206_v54  ;;  %1262 = vmatpush.bf16.msrb.mxu0 %v3951_v55 }
  0xbc   :  { %6707 = vst [vmem:[#allocation17_spill] sm:$0xff] %v5439_v58  ;;  %1177 = vmatmul.bf16.vlgmr.msra.gmra.mxu1 %v5387_v49  ;;  %1235 = vmatmul.bf16.vlgmr.msra.gmra.mxu3 %v5387_v49 }
  0xbd   :  { %v975_v7 = vpop.f32.mrf.mxu2  ;;  %1291 = vmatpush.bf16.msrb.mxu1 %v4207_v59 }
  0xbe   :  { %v976_v9 = vadd.f32 %v975_v7, %v5445_v62  ;;  %v4783_v7 = vld [vmem:[#allocation6 + $0x25c] sm:$0xf] }
  0xbf   :  { %v1004_v10 = vpop.f32.mrf.mxu3  ;;  %v919_v11 = vpop.f32.mrf.mxu0 }
  0xc0   :  { %v920_v12 = vadd.f32 %v919_v11, %v5436_v46  ;;  %v5450_v14 = vadd.f32 %v1004_v10, %v976_v9  ;;  %v3918_v9 = vld [vmem:[#allocation6 + $0x18] sm:$0xf]  ;;  %v4211_v10 = vor.u32 %v4783_v7, %v4208_v8  ;;  %v4504_v7 = vld [vmem:[#allocation8 + $0xd0] sm:$0xf0] }
  0xc1   :  { %v948_v13 = vpop.f32.mrf.mxu1  ;;  %v4715_v11 = vld [vmem:[#allocation6 + $0x34] sm:$0xf0] }
  0xc2   :  { %6708 = vst [vmem:[#allocation18_spill] sm:$0xff] %v5450_v14  ;;  %v5452_v15 = vadd.f32 %v948_v13, %v920_v12  ;;  %v4174_v12 = vld [vmem:[#allocation6 + $0x218] sm:$0xf]  ;;  %v3919_v16 = vor.u32 %v4715_v11, %v3918_v9  ;;  %1349 = vmatpush.bf16.msrb.mxu3 %v4211_v10 }
  0xc3   :  { %v4779_v13 = vld [vmem:[#allocation6 + $0x234] sm:$0xf0] }
  0xc4   :  { %6709 = vst [vmem:[#allocation19_spill] sm:$0xff] %v5452_v15  ;;  %v4175_v17 = vor.u32 %v4779_v13, %v4174_v12  ;;  %1263 = vmatpush.bf16.msrb.mxu0 %v3919_v16  ;;  %v4640_v15 = vld [vmem:[#allocation9 + $0xd8] sm:$0xf0] }
  0xc5   :  { %v977_v30 = vpop.f32.mrf.mxu2 }
  0xc6   :  { %v978_v31 = vadd.f32 %v977_v30, %v5445_v62  ;;  %1292 = vmatpush.bf16.msrb.mxu1 %v4175_v17  ;;  %v4176_v30 = vld [vmem:[#allocation6 + $0x238] sm:$0xf0] }
  0xc7   :  { %v1006_v32 = vpop.f32.mrf.mxu3  ;;  %v922_v33 = vpop.f32.mrf.mxu0 }
  0xc8   :  { %v923_v35 = vadd.f32 %v922_v33, %v5436_v46  ;;  %v5456_v38 = vadd.f32 %v1006_v32, %v978_v31  ;;  %v3923_v33 = vor.u32 %v4711_v24, %v3920_v25  ;;  %1664 = vmatpush.bf16.msra.mxu0 %v5480_v47  ;;  %v4526_v24 = vld [vmem:[#allocation8 + $0xe8] sm:$0xf] }
  0xc9   :  { %v951_v37 = vpop.f32.mrf.mxu1 }
  0xca   :  { %6710 = vst [vmem:[#allocation20_spill] sm:$0xff] %v5456_v38  ;;  %v5458_v40 = vadd.f32 %v951_v37, %v923_v35  ;;  %1153 = vmatmul.bf16.gmra.mxu0 %v5393_v34  ;;  %1211 = vmatmul.bf16.gmra.mxu2 %v5393_v34  ;;  %v4179_v35 = vor.u32 %v4775_v26, %v4176_v30  ;;  %v4867_v26 = vld [vmem:[#allocation8 + $0xf4] sm:$0xf0]  ;;  %v4856_v30 = vld [vmem:[#allocation8 + $0xa4] sm:$0xf] }
  0xcb   :  { %1321 = vmatpush.bf16.msrb.mxu2 %v3923_v33  ;;  %1677 = vmatpush.bf16.msra.mxu1 %v5482_v53  ;;  %v4893_v38 = vld [vmem:[#allocation9 + $0xcc] sm:$0xf] }
  0xcc   :  { %6711 = vst [vmem:[#allocation21_spill] sm:$0xff] %v5458_v40  ;;  %1182 = vmatmul.bf16.gmra.mxu1 %v5395_v39  ;;  %1240 = vmatmul.bf16.gmra.mxu3 %v5395_v39 }
  0xcd   :  { %v980_v57 = vpop.f32.mrf.mxu2  ;;  %1350 = vmatpush.bf16.msrb.mxu3 %v4179_v35 }
  0xce   :  { %v981_v63 = vadd.f32 %v980_v57, %v5445_v62 }
  0xcf   :  { %v1009_v0 = vpop.f32.mrf.mxu3  ;;  %v924_v1 = vpop.f32.mrf.mxu0 }
  0xd0   :  { %v925_v3 = vadd.f32 %v924_v1, %v5436_v46  ;;  %v5466_v5 = vadd.f32 %v1009_v0, %v981_v63  ;;  %v4865_v63 = vld [vmem:[#allocation8 + $0xec] sm:$0xf]  ;;  %v4528_v0 = vld [vmem:[#allocation8 + $0xf8] sm:$0xf0]  ;;  %v4502_v1 = vld [vmem:[#allocation8 + $0xc0] sm:$0xf] }
  0xd1   :  { %v953_v4 = vpop.f32.mrf.mxu1  ;;  %v5492_v2 = vor.u32 %v4865_v63, %v4528_v0  ;;  %v4496_v63 = vld [vmem:[#allocation8 + $0xb8] sm:$0xf0] }
  0xd2   :  { %6712 = vst [vmem:[#allocation22_spill] sm:$0xff] %v5466_v5  ;;  %v5468_v6 = vadd.f32 %v953_v4, %v925_v3  ;;  %v4862_v3 = vld [vmem:[#allocation8 + $0xcc] sm:$0xf0]  ;;  %v4860_v4 = vld [vmem:[#allocation8 + $0xc4] sm:$0xf] }
  0xd3   :  { %v5494_v8 = vor.u32 %v4862_v3, %v4502_v1  ;;  %v5496_v9 = vor.u32 %v4860_v4, %v4504_v7  ;;  %1703 = vmatpush.bf16.msra.mxu3 %v5492_v2  ;;  %v4470_v1 = vld [vmem:[#allocation8 + $0x80] sm:$0xf]  ;;  %v4854_v4 = vld [vmem:[#allocation8 + $0x8c] sm:$0xf0]  ;;  %v4852_v7 = vld [vmem:[#allocation8 + $0x84] sm:$0xf] }
  0xd4   :  { %6713 = vst [vmem:[#allocation23_spill] sm:$0xff] %v5468_v6  ;;  %v4894_v6 = vld [vmem:[#allocation9 + $0xcc] sm:$0xf0] }
  0xd5   :  { %v982_v23 = vpop.f32.mrf.mxu2  ;;  %1665 = vmatpush.bf16.msra.mxu0 %v5494_v8  ;;  %1678 = vmatpush.bf16.msra.mxu1 %v5496_v9 }
  0xd6   :  { %v983_v27 = vadd.f32 %v982_v23, %v5445_v62  ;;  %v4512_v23 = vld [vmem:[#allocation8 + $0xd8] sm:$0xf0] }
  0xd7   :  { %v1011_v28 = vpop.f32.mrf.mxu3  ;;  %v927_v29 = vpop.f32.mrf.mxu0  ;;  %v5510_v25 = vor.u32 %v4861_v22, %v4512_v23 }
  0xd8   :  { %v928_v31 = vadd.f32 %v927_v29, %v5436_v46  ;;  %v5472_v37 = vadd.f32 %v1011_v28, %v983_v27  ;;  %v5513_v27 = vor.u32 %v4867_v26, %v4526_v24  ;;  %v4486_v28 = vld [vmem:[#allocation8 + $0xa0] sm:$0xf]  ;;  %v4858_v29 = vld [vmem:[#allocation8 + $0xac] sm:$0xf0] }
  0xd9   :  { %v956_v32 = vpop.f32.mrf.mxu1  ;;  %1704 = vmatpush.bf16.msra.mxu3 %v5510_v25 }
  0xda   :  { %6714 = vst [vmem:[#allocation24_spill] sm:$0xff] %v5472_v37  ;;  %v5474_v41 = vadd.f32 %v956_v32, %v928_v31  ;;  %1158 = vmatmul.bf16.gmra.mxu0 %v5401_v18  ;;  %1216 = vmatmul.bf16.gmra.mxu2 %v5401_v18  ;;  %v5516_v31 = vor.u32 %v4858_v29, %v4486_v28  ;;  %v4488_v32 = vld [vmem:[#allocation8 + $0xb0] sm:$0xf0] }
  0xdb   :  { %1690 = vmatpush.bf16.msra.mxu2 %v5513_v27  ;;  %v5519_v35 = vor.u32 %v4856_v30, %v4488_v32  ;;  %v4853_v32 = vld [vmem:[#allocation8 + $0x8c] sm:$0xf] }
  0xdc   :  { %6715 = vst [vmem:[#allocation25_spill] sm:$0xff] %v5474_v41  ;;  %1187 = vmatmul.bf16.gmra.mxu1 %v5403_v19  ;;  %1245 = vmatmul.bf16.gmra.mxu3 %v5403_v19  ;;  %v4648_v41 = vld [vmem:[#allocation9 + $0xf0] sm:$0xf0] }
  0xdd   :  { %v985_v52 = vpop.f32.mrf.mxu2  ;;  %1666 = vmatpush.bf16.msra.mxu0 %v5516_v31  ;;  %1679 = vmatpush.bf16.msra.mxu1 %v5519_v35 }
  0xde   :  { %v986_v54 = vadd.f32 %v985_v52, %v5445_v62 }
  0xdf   :  { %v1014_v55 = vpop.f32.mrf.mxu3  ;;  %v929_v56 = vpop.f32.mrf.mxu0 }
  0xe0   :  { %v930_v57 = vadd.f32 %v929_v56, %v5436_v46  ;;  %v5488_v60 = vadd.f32 %v1014_v55, %v986_v54  ;;  %v4510_v55 = vld [vmem:[#allocation8 + $0xc8] sm:$0xf]  ;;  %v4863_v56 = vld [vmem:[#allocation8 + $0xd4] sm:$0xf0] }
  0xe1   :  { %v958_v59 = vpop.f32.mrf.mxu1  ;;  %v5529_v0 = vor.u32 %v4863_v56, %v4510_v55  ;;  %v4454_v55 = vld [vmem:[#allocation8 + $0x60] sm:$0xf]  ;;  %v4850_v56 = vld [vmem:[#allocation8 + $0x6c] sm:$0xf0] }
  0xe2   :  { %6716 = vst [vmem:[#allocation26_spill] sm:$0xff] %v5488_v60  ;;  %v5490_v61 = vadd.f32 %v958_v59, %v930_v57  ;;  %v4857_v59 = vld [vmem:[#allocation8 + $0xac] sm:$0xf]  ;;  %v4896_v60 = vld [vmem:[#allocation9 + $0xe4] sm:$0xf] }
  0xe3   :  { %v5531_v3 = vor.u32 %v4857_v59, %v4496_v63  ;;  %1691 = vmatpush.bf16.msra.mxu2 %v5529_v0  ;;  %v4848_v59 = vld [vmem:[#allocation8 + $0x64] sm:$0xf]  ;;  %v5565_v63 = vor.u32 %v4850_v56, %v4454_v55 }
  0xe4   :  { %6717 = vst [vmem:[#allocation27_spill] sm:$0xff] %v5490_v61  ;;  %v4837_v61 = vld [vmem:[#allocation8 + $0xc] sm:$0xf] }
  0xe5   :  { %v987_v10 = vpop.f32.mrf.mxu2  ;;  %1705 = vmatpush.bf16.msra.mxu3 %v5531_v3 }
  0xe6   :  { %v988_v11 = vadd.f32 %v987_v10, %v5445_v62  ;;  %v4472_v10 = vld [vmem:[#allocation8 + $0x90] sm:$0xf0] }
  0xe7   :  { %v1016_v12 = vpop.f32.mrf.mxu3  ;;  %v932_v13 = vpop.f32.mrf.mxu0 }
  0xe8   :  { %v933_v16 = vadd.f32 %v932_v13, %v5436_v46  ;;  %v5503_v20 = vadd.f32 %v1016_v12, %v988_v11  ;;  %v5537_v11 = vor.u32 %v4854_v4, %v4470_v1  ;;  %v5539_v12 = vor.u32 %v4852_v7, %v4472_v10  ;;  %v4494_v13 = vld [vmem:[#allocation8 + $0xa8] sm:$0xf]  ;;  %v4456_v1 = vld [vmem:[#allocation8 + $0x70] sm:$0xf0]  ;;  %v4851_v7 = vld [vmem:[#allocation8 + $0x74] sm:$0xf0] }
  0xe9   :  { %v961_v17 = vpop.f32.mrf.mxu1  ;;  %v4462_v4 = vld [vmem:[#allocation8 + $0x68] sm:$0xf]  ;;  %v5568_v10 = vor.u32 %v4848_v59, %v4456_v1  ;;  %v4440_v59 = vld [vmem:[#allocation8 + $0x50] sm:$0xf0] }
  0xea   :  { %6718 = vst [vmem:[#allocation28_spill] sm:$0xff] %v5503_v20  ;;  %v5505_v21 = vadd.f32 %v961_v17, %v933_v16  ;;  %1163 = vmatmul.bf16.gmra.mxu0 %v5409_v48  ;;  %1221 = vmatmul.bf16.gmra.mxu2 %v5409_v48  ;;  %v4859_v16 = vld [vmem:[#allocation8 + $0xb4] sm:$0xf0]  ;;  %v4446_v1 = vld [vmem:[#allocation8 + $0x48] sm:$0xf] }
  0xeb   :  { %1667 = vmatpush.bf16.msra.mxu0 %v5537_v11  ;;  %1680 = vmatpush.bf16.msra.mxu1 %v5539_v12  ;;  %v5544_v22 = vor.u32 %v4859_v16, %v4494_v13  ;;  %v5570_v13 = vor.u32 %v4851_v7, %v4462_v4  ;;  %v4849_v16 = vld [vmem:[#allocation8 + $0x6c] sm:$0xf]  ;;  %v4847_v4 = vld [vmem:[#allocation8 + $0x54] sm:$0xf0] }
  0xec   :  { %6719 = vst [vmem:[#allocation29_spill] sm:$0xff] %v5505_v21  ;;  %1192 = vmatmul.bf16.gmra.mxu1 %v5411_v50  ;;  %1250 = vmatmul.bf16.gmra.mxu3 %v5411_v50 }
  0xed   :  { %v990_v33 = vpop.f32.mrf.mxu2  ;;  %1692 = vmatpush.bf16.msra.mxu2 %v5544_v22 }
  0xee   :  { %v991_v42 = vadd.f32 %v990_v33, %v5445_v62  ;;  %v4480_v33 = vld [vmem:[#allocation8 + $0x98] sm:$0xf0] }
  0xef   :  { %v1019_v43 = vpop.f32.mrf.mxu3  ;;  %v934_v45 = vpop.f32.mrf.mxu0  ;;  %1668 = vmatpush.bf16.msra.mxu0 %v5565_v63  ;;  %1681 = vmatpush.bf16.msra.mxu1 %v5568_v10 }
  0xf0   :  { %v935_v51 = vadd.f32 %v934_v45, %v5436_v46  ;;  %v5525_v54 = vadd.f32 %v1019_v43, %v991_v42  ;;  %v5534_v46 = vperm.slane %v5433_v36, 2  ;;  %v4478_v42 = vld [vmem:[#allocation8 + $0x88] sm:$0xf]  ;;  %v5554_v45 = vor.u32 %v4853_v32, %v4480_v33  ;;  %v4438_v33 = vld [vmem:[#allocation8 + $0x40] sm:$0xf] }
  0xf1   :  { %v963_v52 = vpop.f32.mrf.mxu1 }
  0xf2   :  { %6720 = vst [vmem:[#allocation30_spill] sm:$0xff] %v5525_v54  ;;  %v5527_v57 = vadd.f32 %v963_v52, %v935_v51  ;;  %v4855_v51 = vld [vmem:[#allocation8 + $0x94] sm:$0xf0]  ;;  %1706 = vmatpush.bf16.msra.mxu3 %v5554_v45  ;;  %v4432_v54 = vld [vmem:[#allocation8 + $0x38] sm:$0xf0] }
  0xf3   :  { %6722 = vst [vmem:[#allocation32_spill] sm:$0xff] %v5534_v46  ;;  %v5561_v52 = vor.u32 %v4855_v51, %v4478_v42  ;;  %v4846_v42 = vld [vmem:[#allocation8 + $0x4c] sm:$0xf0]  ;;  %v4844_v51 = vld [vmem:[#allocation8 + $0x44] sm:$0xf] }
  0xf4   :  { %6721 = vst [vmem:[#allocation31_spill] sm:$0xff] %v5527_v57  ;;  %v5584_v56 = vor.u32 %v4846_v42, %v4438_v33  ;;  %v5586_v7 = vor.u32 %v4844_v51, %v4440_v59  ;;  %v4424_v42 = vld [vmem:[#allocation8 + $0x30] sm:$0xf0]  ;;  %v4430_v51 = vld [vmem:[#allocation8 + $0x28] sm:$0xf] }
  0xf5   :  { %v992_v17 = vpop.f32.mrf.mxu2  ;;  %1693 = vmatpush.bf16.msra.mxu2 %v5561_v52  ;;  %v4843_v59 = vld [vmem:[#allocation8 + $0x34] sm:$0xf0]  ;;  %v4841_v57 = vld [vmem:[#allocation8 + $0x2c] sm:$0xf] }
  0xf6   :  { %v993_v23 = vadd.f32 %v992_v17, %v5445_v62  ;;  %v5559_v62 = vperm.slane %v5433_v36, 3  ;;  %v4464_v17 = vld [vmem:[#allocation8 + $0x78] sm:$0xf0]  ;;  %1669 = vmatpush.bf16.msra.mxu0 %v5584_v56  ;;  %1682 = vmatpush.bf16.msra.mxu1 %v5586_v7 }
  0xf7   :  { %v1021_v24 = vpop.f32.mrf.mxu3  ;;  %v1033_v26 = vpop.f32.mrf.mxu0 }
  0xf8   :  { %v1034_v28 = vadd.f32 %v1033_v26, %v5534_v46  ;;  %v5549_v30 = vadd.f32 %v1021_v24, %v993_v23  ;;  %6725 = vst [vmem:[#allocation35_spill] sm:$0xff] %v5559_v62  ;;  %v5574_v26 = vor.u32 %v4849_v16, %v4464_v17  ;;  %v4845_v16 = vld [vmem:[#allocation8 + $0x4c] sm:$0xf]  ;;  %v4448_v17 = vld [vmem:[#allocation8 + $0x58] sm:$0xf0] }
  0xf9   :  { %v1062_v29 = vpop.f32.mrf.mxu1  ;;  %1694 = vmatpush.bf16.msra.mxu2 %v5570_v13 }
  0xfa   :  { %6723 = vst [vmem:[#allocation33_spill] sm:$0xff] %v5549_v30  ;;  %v5551_v43 = vadd.f32 %v1062_v29, %v1034_v28  ;;  %1264 = vmatmul.bf16.vlgmr.msrb.gmra.mxu0 %v5385_v44  ;;  %1322 = vmatmul.bf16.vlgmr.msrb.gmra.mxu2 %v5385_v44  ;;  %v5601_v30 = vor.u32 %v4843_v59, %v4430_v51 }
  0xfb   :  { %1707 = vmatpush.bf16.msra.mxu3 %v5574_v26 }
  0xfc   :  { %6724 = vst [vmem:[#allocation34_spill] sm:$0xff] %v5551_v43  ;;  %1293 = vmatmul.bf16.vlgmr.msrb.gmra.mxu1 %v5387_v49  ;;  %1351 = vmatmul.bf16.vlgmr.msrb.gmra.mxu3 %v5387_v49 }
  0xfd   :  { %v1091_v44 = vpop.f32.mrf.mxu2 }
  0xfe   :  { %v1092_v49 = vadd.f32 %v1091_v44, %v5559_v62  ;;  %v5588_v44 = vor.u32 %v4847_v4, %v4446_v1 }
  0xff   :  { %v1120_v23 = vpop.f32.mrf.mxu3  ;;  %v1035_v24 = vpop.f32.mrf.mxu0 }
 0x100   :  { %v1036_v28 = vadd.f32 %v1035_v24, %v5534_v46  ;;  %v5578_v32 = vadd.f32 %v1120_v23, %v1092_v49  ;;  %v5591_v49 = vor.u32 %v4845_v16, %v4448_v17  ;;  %1695 = vmatpush.bf16.msra.mxu2 %v5588_v44  ;;  %v4422_v23 = vld [vmem:[#allocation8 + $0x20] sm:$0xf]  ;;  %v4842_v24 = vld [vmem:[#allocation8 + $0x2c] sm:$0xf0] }
 0x101   :  { %v1064_v29 = vpop.f32.mrf.mxu1  ;;  %v5596_v33 = vor.u32 %v4842_v24, %v4422_v23  ;;  %v5605_v23 = vor.u32 %v4841_v57, %v4432_v54  ;;  %v4414_v54 = vld [vmem:[#allocation8 + $0x8] sm:$0xf]  ;;  %v4839_v57 = vld [vmem:[#allocation8 + $0x14] sm:$0xf0] }
 0x102   :  { %6726 = vst [vmem:[#allocation36_spill] sm:$0xff] %v5578_v32  ;;  %v5582_v55 = vadd.f32 %v1064_v29, %v1036_v28  ;;  %v4840_v28 = vld [vmem:[#allocation8 + $0x24] sm:$0xf]  ;;  %1708 = vmatpush.bf16.msra.mxu3 %v5591_v49 }
 0x103   :  { %v5599_v17 = vor.u32 %v4840_v28, %v4424_v42  ;;  %1670 = vmatpush.bf16.msra.mxu0 %v5596_v33  ;;  %v4838_v28 = vld [vmem:[#allocation8 + $0xc] sm:$0xf0]  ;;  %v4836_v42 = vld [vmem:[#allocation8 + $0x4] sm:$0xf] }
 0x104   :  { %6727 = vst [vmem:[#allocation37_spill] sm:$0xff] %v5582_v55  ;;  %1696 = vmatpush.bf16.msra.mxu2 %v5601_v30  ;;  %v4638_v55 = vld [vmem:[#allocation9 + $0xc8] sm:$0xf]  ;;  %v4888_v32 = vld [vmem:[#allocation9 + $0xa4] sm:$0xf] }
 0x105   :  { %v1093_v29 = vpop.f32.mrf.mxu2  ;;  %1683 = vmatpush.bf16.msra.mxu1 %v5599_v17 }
 0x106   :  { %v1094_v1 = vadd.f32 %v1093_v29, %v5559_v62  ;;  %v4406_v29 = vld [vmem:[#allocation8] sm:$0xf]  ;;  %1709 = vmatpush.bf16.msra.mxu3 %v5605_v23 }
 0x107   :  { %v1122_v4 = vpop.f32.mrf.mxu3  ;;  %v1038_v16 = vpop.f32.mrf.mxu0  ;;  %v5615_v59 = vor.u32 %v4838_v28, %v4406_v29  ;;  %v4898_v28 = vld [vmem:[#allocation9 + $0xec] sm:$0xf0] }
 0x108   :  { %v1039_v21 = vadd.f32 %v1038_v16, %v5534_v46  ;;  %v5607_v24 = vadd.f32 %v1122_v4, %v1094_v1  ;;  %v4408_v16 = vld [vmem:[#allocation8 + $0x10] sm:$0xf0]  ;;  %v5621_v4 = vor.u32 %v4839_v57, %v4414_v54  ;;  %v4899_v54 = vld [vmem:[#allocation9 + $0xf4] sm:$0xf0]  ;;  %v4897_v57 = vld [vmem:[#allocation9 + $0xec] sm:$0xf] }
 0x109   :  { %v1067_v20 = vpop.f32.mrf.mxu1  ;;  %v5619_v1 = vor.u32 %v4836_v42, %v4408_v16  ;;  %1671 = vmatpush.bf16.msra.mxu0 %v5615_v59  ;;  %v5631_v42 = vor.u32 %v4896_v60, %v4648_v41  ;;  %v4654_v16 = vld [vmem:[#allocation9 + $0xe8] sm:$0xf] }
 0x10a   :  { %6728 = vst [vmem:[#allocation38_spill] sm:$0xff] %v5607_v24  ;;  %v5611_v51 = vadd.f32 %v1067_v20, %v1039_v21  ;;  %1269 = vmatmul.bf16.gmra.mxu0 %v5393_v34  ;;  %1327 = vmatmul.bf16.gmra.mxu2 %v5393_v34  ;;  %v4416_v20 = vld [vmem:[#allocation8 + $0x18] sm:$0xf0]  ;;  %v4646_v21 = vld [vmem:[#allocation9 + $0xe0] sm:$0xf] }
 0x10b   :  { %v5625_v29 = vor.u32 %v4837_v61, %v4416_v20  ;;  %1684 = vmatpush.bf16.msra.mxu1 %v5619_v1  ;;  %1697 = vmatpush.bf16.msra.mxu2 %v5621_v4  ;;  %v5629_v34 = vor.u32 %v4898_v28, %v4646_v21  ;;  %6731 = vst [vmem:[#allocation41_spill] sm:$0xff] %v5631_v42  ;;  %v4656_v61 = vld [vmem:[#allocation9 + $0xf8] sm:$0xf0]  ;;  %v4630_v20 = vld [vmem:[#allocation9 + $0xc0] sm:$0xf] }
 0x10c   :  { %6729 = vst [vmem:[#allocation39_spill] sm:$0xff] %v5611_v51  ;;  %1298 = vmatmul.bf16.gmra.mxu1 %v5395_v39  ;;  %1356 = vmatmul.bf16.gmra.mxu3 %v5395_v39  ;;  %v5634_v39 = vor.u32 %v4899_v54, %v4654_v16  ;;  %v5639_v41 = vor.u32 %v4897_v57, %v4656_v61  ;;  %v4892_v21 = vld [vmem:[#allocation9 + $0xc4] sm:$0xf]  ;;  %v4632_v28 = vld [vmem:[#allocation9 + $0xd0] sm:$0xf0] }
 0x10d   :  { %6730 = vst [vmem:[#allocation40_spill] sm:$0xff] %v5629_v34  ;;  %v1096_v37 = vpop.f32.mrf.mxu2  ;;  %1710 = vmatpush.bf16.msra.mxu3 %v5625_v29  ;;  %1885 = vmatpush.bf16.msrb.mxu0 %v5629_v34  ;;  %v5641_v60 = vor.u32 %v4894_v6, %v4630_v20  ;;  %v5645_v24 = vor.u32 %v4892_v21, %v4632_v28  ;;  %v4614_v20 = vld [vmem:[#allocation9 + $0xa0] sm:$0xf]  ;;  %v4616_v28 = vld [vmem:[#allocation9 + $0xb0] sm:$0xf0] }
 0x10e   :  { %6732 = vst [vmem:[#allocation42_spill] sm:$0xff] %v5634_v39  ;;  %v1097_v51 = vadd.f32 %v1096_v37, %v5559_v62  ;;  %v4895_v37 = vld [vmem:[#allocation9 + $0xd4] sm:$0xf0]  ;;  %v5652_v6 = vor.u32 %v4893_v38, %v4640_v15  ;;  %v4889_v38 = vld [vmem:[#allocation9 + $0xac] sm:$0xf] }
 0x10f   :  { %v1125_v5 = vpop.f32.mrf.mxu3  ;;  %v1040_v40 = vpop.f32.mrf.mxu0  ;;  %1898 = vmatpush.bf16.msrb.mxu1 %v5631_v42  ;;  %6733 = vst [vmem:[#allocation43_spill] sm:$0xff] %v5639_v41  ;;  %1911 = vmatpush.bf16.msrb.mxu2 %v5634_v39  ;;  %v5650_v57 = vor.u32 %v4895_v37, %v4638_v55  ;;  %v5661_v55 = vor.u32 %v4888_v32, %v4616_v28  ;;  %v4600_v32 = vld [vmem:[#allocation9 + $0x90] sm:$0xf0]  ;;  %v4606_v28 = vld [vmem:[#allocation9 + $0x88] sm:$0xf] }
 0x110   :  { %6734 = vst [vmem:[#allocation44_spill] sm:$0xff] %v5641_v60  ;;  %v1041_v16 = vadd.f32 %v1040_v40, %v5534_v46  ;;  %v5647_v43 = vadd.f32 %v1125_v5, %v1097_v51  ;;  %v4890_v40 = vld [vmem:[#allocation9 + $0xac] sm:$0xf0]  ;;  %v4622_v5 = vld [vmem:[#allocation9 + $0xa8] sm:$0xf] }
 0x111   :  { %v1069_v54 = vpop.f32.mrf.mxu1  ;;  %6735 = vst [vmem:[#allocation45_spill] sm:$0xff] %v5645_v24  ;;  %1924 = vmatpush.bf16.msrb.mxu3 %v5639_v41  ;;  %1886 = vmatpush.bf16.msrb.mxu0 %v5641_v60  ;;  %v5658_v21 = vor.u32 %v4890_v40, %v4614_v20  ;;  %v4891_v51 = vld [vmem:[#allocation9 + $0xb4] sm:$0xf0]  ;;  %v4884_v20 = vld [vmem:[#allocation9 + $0x84] sm:$0xf] }
 0x112   :  { %6736 = vst [vmem:[#allocation46_spill] sm:$0xff] %v5647_v43  ;;  %v5654_v61 = vadd.f32 %v1069_v54, %v1041_v16  ;;  %v5663_v15 = vor.u32 %v4891_v51, %v4622_v5  ;;  %v4624_v16 = vld [vmem:[#allocation9 + $0xb8] sm:$0xf0]  ;;  %v4886_v43 = vld [vmem:[#allocation9 + $0x8c] sm:$0xf0] }
 0x113   :  { %6737 = vst [vmem:[#allocation47_spill] sm:$0xff] %v5650_v57  ;;  %1899 = vmatpush.bf16.msrb.mxu1 %v5645_v24  ;;  %1912 = vmatpush.bf16.msrb.mxu2 %v5650_v57  ;;  %v5666_v54 = vor.u32 %v4889_v38, %v4624_v16  ;;  %v4887_v5 = vld [vmem:[#allocation9 + $0x94] sm:$0xf0]  ;;  %v4885_v16 = vld [vmem:[#allocation9 + $0x8c] sm:$0xf] }
 0x114   :  { %6738 = vst [vmem:[#allocation48_spill] sm:$0xff] %v5652_v6  ;;  %v4608_v57 = vld [vmem:[#allocation9 + $0x98] sm:$0xf0]  ;;  %v4582_v60 = vld [vmem:[#allocation9 + $0x60] sm:$0xf] }
 0x115   :  { %6739 = vst [vmem:[#allocation49_spill] sm:$0xff] %v5654_v61  ;;  %1925 = vmatpush.bf16.msrb.mxu3 %v5652_v6  ;;  %v1098_v37 = vpop.f32.mrf.mxu2  ;;  %v4598_v61 = vld [vmem:[#allocation9 + $0x80] sm:$0xf]  ;;  %1887 = vmatpush.bf16.msrb.mxu0 %v5658_v21 }
 0x116   :  { %6740 = vst [vmem:[#allocation50_spill] sm:$0xff] %v5658_v21  ;;  %v1099_v40 = vadd.f32 %v1098_v37, %v5559_v62  ;;  %v5673_v38 = vor.u32 %v4886_v43, %v4598_v61  ;;  %v5678_v37 = vor.u32 %v4884_v20, %v4600_v32  ;;  %v5680_v21 = vor.u32 %v4887_v5, %v4606_v28  ;;  %v4584_v43 = vld [vmem:[#allocation9 + $0x70] sm:$0xf0]  ;;  %v4590_v61 = vld [vmem:[#allocation9 + $0x68] sm:$0xf] }
 0x117   :  { %6741 = vst [vmem:[#allocation51_spill] sm:$0xff] %v5661_v55  ;;  %v1127_v14 = vpop.f32.mrf.mxu3  ;;  %v1043_v58 = vpop.f32.mrf.mxu0  ;;  %1900 = vmatpush.bf16.msrb.mxu1 %v5661_v55  ;;  %1913 = vmatpush.bf16.msrb.mxu2 %v5663_v15  ;;  %v4592_v32 = vld [vmem:[#allocation9 + $0x78] sm:$0xf0] }
 0x118   :  { %6742 = vst [vmem:[#allocation52_spill] sm:$0xff] %v5663_v15  ;;  %v1044_v51 = vadd.f32 %v1043_v58, %v5534_v46  ;;  %v5675_v24 = vadd.f32 %v1127_v14, %v1099_v40  ;;  %v5685_v58 = vor.u32 %v4885_v16, %v4608_v57  ;;  %v4882_v15 = vld [vmem:[#allocation9 + $0x6c] sm:$0xf0]  ;;  %v4880_v14 = vld [vmem:[#allocation9 + $0x64] sm:$0xf] }
 0x119   :  { %6743 = vst [vmem:[#allocation53_spill] sm:$0xff] %v5666_v54  ;;  %v1072_v6 = vpop.f32.mrf.mxu1  ;;  %1926 = vmatpush.bf16.msrb.mxu3 %v5666_v54  ;;  %1888 = vmatpush.bf16.msrb.mxu0 %v5673_v38  ;;  %v5691_v20 = vor.u32 %v4882_v15, %v4582_v60  ;;  %v4881_v40 = vld [vmem:[#allocation9 + $0x6c] sm:$0xf]  ;;  %v5695_v57 = vor.u32 %v4880_v14, %v4584_v43  ;;  %v4876_v60 = vld [vmem:[#allocation9 + $0x44] sm:$0xf] }
 0x11a   :  { %6744 = vst [vmem:[#allocation54_spill] sm:$0xff] %v5673_v38  ;;  %v5682_v55 = vadd.f32 %v1072_v6, %v1044_v51  ;;  %1274 = vmatmul.bf16.gmra.mxu0 %v5401_v18  ;;  %1332 = vmatmul.bf16.gmra.mxu2 %v5401_v18  ;;  %v4883_v6 = vld [vmem:[#allocation9 + $0x74] sm:$0xf0]  ;;  %v5700_v5 = vor.u32 %v4881_v40, %v4592_v32  ;;  %v4878_v51 = vld [vmem:[#allocation9 + $0x4c] sm:$0xf0] }
 0x11b   :  { %6745 = vst [vmem:[#allocation55_spill] sm:$0xff] %v5675_v24  ;;  %1901 = vmatpush.bf16.msrb.mxu1 %v5678_v37  ;;  %1914 = vmatpush.bf16.msrb.mxu2 %v5680_v21  ;;  %v5697_v28 = vor.u32 %v4883_v6, %v4590_v61  ;;  %v4568_v24 = vld [vmem:[#allocation9 + $0x50] sm:$0xf0]  ;;  %v4877_v61 = vld [vmem:[#allocation9 + $0x4c] sm:$0xf] }
 0x11c   :  { %6746 = vst [vmem:[#allocation56_spill] sm:$0xff] %v5678_v37  ;;  %1303 = vmatmul.bf16.gmra.mxu1 %v5403_v19  ;;  %1361 = vmatmul.bf16.gmra.mxu3 %v5403_v19  ;;  %v4566_v19 = vld [vmem:[#allocation9 + $0x40] sm:$0xf]  ;;  %v4574_v37 = vld [vmem:[#allocation9 + $0x48] sm:$0xf]  ;;  %v5714_v32 = vor.u32 %v4876_v60, %v4568_v24 }
 0x11d   :  { %6747 = vst [vmem:[#allocation57_spill] sm:$0xff] %v5680_v21  ;;  %v1101_v18 = vpop.f32.mrf.mxu2  ;;  %1927 = vmatpush.bf16.msrb.mxu3 %v5685_v58  ;;  %v4879_v21 = vld [vmem:[#allocation9 + $0x54] sm:$0xf0]  ;;  %1889 = vmatpush.bf16.msrb.mxu0 %v5691_v20  ;;  %v5708_v43 = vor.u32 %v4878_v51, %v4566_v19  ;;  %v4576_v6 = vld [vmem:[#allocation9 + $0x58] sm:$0xf0] }
 0x11e   :  { %6748 = vst [vmem:[#allocation58_spill] sm:$0xff] %v5682_v55  ;;  %v1102_v15 = vadd.f32 %v1101_v18, %v5559_v62  ;;  %v5716_v18 = vor.u32 %v4879_v21, %v4574_v37  ;;  %v4872_v19 = vld [vmem:[#allocation9 + $0x24] sm:$0xf]  ;;  %v4552_v51 = vld [vmem:[#allocation9 + $0x30] sm:$0xf0] }
 0x11f   :  { %6749 = vst [vmem:[#allocation59_spill] sm:$0xff] %v5685_v58  ;;  %v1130_v16 = vpop.f32.mrf.mxu3  ;;  %v5703_v55 = vpop.f32.mrf.mxu0  ;;  %1902 = vmatpush.bf16.msrb.mxu1 %v5695_v57  ;;  %1915 = vmatpush.bf16.msrb.mxu2 %v5697_v28  ;;  %v4558_v58 = vld [vmem:[#allocation9 + $0x28] sm:$0xf]  ;;  %v4875_v38 = vld [vmem:[#allocation9 + $0x34] sm:$0xf0]  ;;  %v5726_v24 = vor.u32 %v4872_v19, %v4552_v51 }
 0x120   :  { %6750 = vst [vmem:[#allocation60_spill] sm:$0xff] %v5691_v20  ;;  %v5710_v40 = vadd.f32 %v1130_v16, %v1102_v15  ;;  %v4874_v20 = vld [vmem:[#allocation9 + $0x2c] sm:$0xf0]  ;;  %v4873_v16 = vld [vmem:[#allocation9 + $0x2c] sm:$0xf]  ;;  %v5728_v21 = vor.u32 %v4875_v38, %v4558_v58 }
 0x121   :  { %6751 = vst [vmem:[#allocation61_spill] sm:$0xff] %v5695_v57  ;;  %v5705_v14 = vpop.f32.mrf.mxu1  ;;  %1928 = vmatpush.bf16.msrb.mxu3 %v5700_v5  ;;  %1890 = vmatpush.bf16.msrb.mxu0 %v5708_v43  ;;  %v4869_v58 = vld [vmem:[#allocation9 + $0xc] sm:$0xf] }
 0x122   :  { %6752 = vst [vmem:[#allocation62_spill] sm:$0xff] %v5697_v28  ;;  %v4871_v28 = vld [vmem:[#allocation9 + $0x14] sm:$0xf0] }
 0x123   :  { %6753 = vst [vmem:[#allocation63_spill] sm:$0xff] %v5700_v5  ;;  %1903 = vmatpush.bf16.msrb.mxu1 %v5714_v32  ;;  %1916 = vmatpush.bf16.msrb.mxu2 %v5716_v18  ;;  %v4536_v5 = vld [vmem:[#allocation9 + $0x10] sm:$0xf0] }
 0x124   :  { %6754 = vst [vmem:[#allocation64_spill] sm:$0xff] %v5703_v55  ;;  %v5719_v55 = vor.u32 %v4877_v61, %v4576_v6  ;;  %v4534_v61 = vld [vmem:[#allocation9] sm:$0xf]  ;;  %v4870_v6 = vld [vmem:[#allocation9 + $0xc] sm:$0xf0] }
 0x125   :  { %6755 = vst [vmem:[#allocation65_spill] sm:$0xff] %v5705_v14  ;;  %v4550_v14 = vld [vmem:[#allocation9 + $0x20] sm:$0xf]  ;;  %v5730_v37 = vpop.f32.mrf.mxu2  ;;  %v5739_v38 = vor.u32 %v4870_v6, %v4534_v61 }
 0x126   :  { %6756 = vst [vmem:[#allocation66_spill] sm:$0xff] %v5708_v43  ;;  %v5722_v15 = vor.u32 %v4874_v20, %v4550_v14  ;;  %1929 = vmatpush.bf16.msrb.mxu3 %v5719_v55  ;;  %v4868_v20 = vld [vmem:[#allocation9 + $0x4] sm:$0xf] }
 0x127   :  { %6757 = vst [vmem:[#allocation67_spill] sm:$0xff] %v5710_v40  ;;  %v4560_v40 = vld [vmem:[#allocation9 + $0x38] sm:$0xf0]  ;;  %v5735_v14 = vpop.f32.mrf.mxu3  ;;  %v1048_v43 = vpop.f32.mrf.mxu0  ;;  %1904 = vmatpush.bf16.msrb.mxu1 %v5726_v24  ;;  %1917 = vmatpush.bf16.msrb.mxu2 %v5728_v21 }
 0x128   :  { %6758 = vst [vmem:[#allocation68_spill] sm:$0xff] %v5714_v32  ;;  %v5733_v60 = vor.u32 %v4873_v16, %v4560_v40  ;;  %v4542_v32 = vld [vmem:[#allocation9 + $0x8] sm:$0xf]  ;;  %v1049_v19 = vadd.f32 %v1048_v43, %v5534_v46  ;;  %1891 = vmatpush.bf16.msrb.mxu0 %v5722_v15  ;;  %v5743_v40 = vor.u32 %v4868_v20, %v4536_v5 }
 0x129   :  { %6759 = vst [vmem:[#allocation69_spill] sm:$0xff] %v5716_v18  ;;  %v1077_v51 = vpop.f32.mrf.mxu1  ;;  %v5745_v16 = vor.u32 %v4871_v28, %v4542_v32 }
 0x12a   :  { %6760 = vst [vmem:[#allocation70_spill] sm:$0xff] %v5719_v55  ;;  %1279 = vmatmul.bf16.gmra.mxu0 %v5409_v48  ;;  %1930 = vmatpush.bf16.msrb.mxu3 %v5733_v60 }
 0x12b   :  { %6761 = vst [vmem:[#allocation71_spill] sm:$0xff] %v5722_v15  ;;  %1337 = vmatmul.bf16.gmra.mxu2 %v5409_v48  ;;  %1905 = vmatpush.bf16.msrb.mxu1 %v5743_v40  ;;  %v5768_v48 = vperm.slane %v5433_v36, 4 }
 0x12c   :  { %6762 = vst [vmem:[#allocation72_spill] sm:$0xff] %v5726_v24  ;;  %1308 = vmatmul.bf16.gmra.mxu1 %v5411_v50  ;;  %1366 = vmatmul.bf16.gmra.mxu3 %v5411_v50 }
 0x12d   :  { %6763 = vst [vmem:[#allocation73_spill] sm:$0xff] %v5728_v21  ;;  %1892 = vmatpush.bf16.msrb.mxu0 %v5739_v38  ;;  %1918 = vmatpush.bf16.msrb.mxu2 %v5745_v16  ;;  %v1106_v28 = vpop.f32.mrf.mxu2 }
 0x12e   :  { %6764 = vst [vmem:[#allocation74_spill] sm:$0xff] %v5730_v37  ;;  %v4544_v37 = vld [vmem:[#allocation9 + $0x18] sm:$0xf0]  ;;  %v1107_v5 = vadd.f32 %v1106_v28, %v5559_v62  ;;  %v5329_v28 = vmov 0  }
 0x12f   :  { %6765 = vst [vmem:[#allocation75_spill] sm:$0xff] %v5733_v60  ;;  %v5751_v43 = vor.u32 %v4869_v58, %v4544_v37  ;;  %v1135_v32 = vpop.f32.mrf.mxu3  ;;  %v5761_v37 = vpop.f32.mrf.mxu0 }
 0x130   :  { %6766 = vst [vmem:[#allocation76_spill] sm:$0xff] %v5735_v14  ;;  %v5747_v14 = vadd.f32 %v1077_v51, %v1049_v19  ;;  %v5765_v6 = vadd.f32 %v1135_v32, %v1107_v5 }
 0x131   :  { %6767 = vst [vmem:[#allocation77_spill] sm:$0xff] %v5739_v38  ;;  %1931 = vmatpush.bf16.msrb.mxu3 %v5751_v43  ;;  %v5763_v61 = vpop.f32.mrf.mxu1 }
 0x132   :  { %6768 = vst [vmem:[#allocation78_spill] sm:$0xff] %v5743_v40 }
 0x133   :  { %6769 = vst [vmem:[#allocation79_spill] sm:$0xff] %v5745_v16 }
 0x134   :  { %6770 = vst [vmem:[#allocation80_spill] sm:$0xff] %v5747_v14 }
 0x135   :  { %6771 = vst [vmem:[#allocation81_spill] sm:$0xff] %v5751_v43  ;;  %v5770_v50 = vpop.f32.mrf.mxu2 }
 0x136   :  { %6772 = vst [vmem:[#allocation82_spill] sm:$0xff] %v5761_v37 }
 0x137   :  { %6773 = vst [vmem:[#allocation83_spill] sm:$0xff] %v5763_v61  ;;  %v5772_v20 = vpop.f32.mrf.mxu3  ;;  %v1149_v19 = vpop.f32.mrf.mxu0  ;;  %v5777_v61 = vld [vmem:[#allocation11] sm:$0xff] }
 0x138   :  { %6774 = vst [vmem:[#allocation84_spill] sm:$0xff] %v5765_v6  ;;  %v1150_v51 = vadd.f32 %v1149_v19, %v5768_v48  ;;  %v5780_v5 = vperm.slane %v5777_v61, 5  ;;  %v6792_v6 = vld [vmem:[#allocation44_spill] sm:$0xff] }
 0x139   :  { %6775 = vst [vmem:[#allocation85_spill] sm:$0xff] %v5768_v48  ;;  %v1178_v58 = vpop.f32.mrf.mxu1 }
 0x13a   :  { %6776 = vst [vmem:[#allocation86_spill] sm:$0xff] %v5770_v50  ;;  %v5775_v14 = vadd.f32 %v1178_v58, %v1150_v51  ;;  %1672 = vmatmul.bf16.vlgmr.msra.gmra.mxu0 %v5329_v28 }
 0x13b   :  { %6777 = vst [vmem:[#allocation87_spill] sm:$0xff] %v5772_v20  ;;  %1698 = vmatmul.bf16.vlgmr.msra.gmra.mxu2 %v5329_v28  ;;  %2081 = vmatpush.bf16.msra.mxu0 %v5480_v47 }
 0x13c   :  { %6778 = vst [vmem:[#allocation88_spill] sm:$0xff] %v5775_v14  ;;  %1685 = vmatmul.bf16.vlgmr.msra.gmra.mxu1 %v5329_v28  ;;  %1711 = vmatmul.bf16.vlgmr.msra.gmra.mxu3 %v5329_v28 }
 0x13d   :  { %6779 = vst [vmem:[#allocation89_spill] sm:$0xff] %v5780_v5  ;;  %2094 = vmatpush.bf16.msra.mxu1 %v5482_v53  ;;  %2107 = vmatpush.bf16.msra.mxu2 %v5513_v27  ;;  %v1207_v36 = vpop.f32.mrf.mxu2 }
 0x13e   :  { %2120 = vmatpush.bf16.msra.mxu3 %v5492_v2  ;;  %v1208_v32 = vadd.f32 %v1207_v36, %v5780_v5 }
 0x13f   :  { %v1236_v19 = vpop.f32.mrf.mxu3  ;;  %v5787_v51 = vpop.f32.mrf.mxu0  ;;  %2082 = vmatpush.bf16.msra.mxu0 %v5494_v8 }
 0x140   :  { %6780 = vst [vmem:[#allocation90_spill] sm:$0xff] %v5787_v51  ;;  %v5792_v14 = vadd.f32 %v1236_v19, %v1208_v32 }
 0x141   :  { %v5789_v58 = vpop.f32.mrf.mxu1  ;;  %2095 = vmatpush.bf16.msra.mxu1 %v5496_v9  ;;  %2108 = vmatpush.bf16.msra.mxu2 %v5529_v0 }
 0x142   :  { %6781 = vst [vmem:[#allocation91_spill] sm:$0xff] %v5789_v58  ;;  %2121 = vmatpush.bf16.msra.mxu3 %v5510_v25 }
 0x143   :  { %6782 = vst [vmem:[#allocation92_spill] sm:$0xff] %v5792_v14  ;;  %2083 = vmatpush.bf16.msra.mxu0 %v5516_v31 }
 0x145   :  { %2096 = vmatpush.bf16.msra.mxu1 %v5519_v35  ;;  %2109 = vmatpush.bf16.msra.mxu2 %v5544_v22  ;;  %v5800_v36 = vpop.f32.mrf.mxu2 }
 0x146   :  { %6783 = vst [vmem:[#allocation93_spill] sm:$0xff] %v5800_v36  ;;  %2122 = vmatpush.bf16.msra.mxu3 %v5531_v3 }
 0x147   :  { %v5803_v37 = vpop.f32.mrf.mxu3  ;;  %v1154_v32 = vpop.f32.mrf.mxu0  ;;  %2084 = vmatpush.bf16.msra.mxu0 %v5537_v11 }
 0x148   :  { %6784 = vst [vmem:[#allocation94_spill] sm:$0xff] %v5803_v37  ;;  %v1155_v19 = vadd.f32 %v1154_v32, %v5768_v48 }
 0x149   :  { %v1183_v14 = vpop.f32.mrf.mxu1  ;;  %2097 = vmatpush.bf16.msra.mxu1 %v5539_v12  ;;  %2110 = vmatpush.bf16.msra.mxu2 %v5561_v52 }
 0x14a   :  { %v5809_v20 = vadd.f32 %v1183_v14, %v1155_v19  ;;  %1893 = vmatmul.bf16.vlgmr.msrb.gmra.mxu0 %v5329_v28  ;;  %2123 = vmatpush.bf16.msra.mxu3 %v5554_v45 }
 0x14b   :  { %1919 = vmatmul.bf16.vlgmr.msrb.gmra.mxu2 %v5329_v28  ;;  %2085 = vmatpush.bf16.msra.mxu0 %v5565_v63 }
 0x14c   :  { %6785 = vst [vmem:[#allocation95_spill] sm:$0xff] %v5809_v20  ;;  %1906 = vmatmul.bf16.vlgmr.msrb.gmra.mxu1 %v5329_v28  ;;  %1932 = vmatmul.bf16.vlgmr.msrb.gmra.mxu3 %v5329_v28 }
 0x14d   :  { %2098 = vmatpush.bf16.msra.mxu1 %v5568_v10  ;;  %2111 = vmatpush.bf16.msra.mxu2 %v5570_v13  ;;  %v1212_v32 = vpop.f32.mrf.mxu2 }
 0x14e   :  { %2124 = vmatpush.bf16.msra.mxu3 %v5574_v26  ;;  %v1213_v50 = vadd.f32 %v1212_v32, %v5780_v5 }
 0x14f   :  { %v1241_v37 = vpop.f32.mrf.mxu3  ;;  %v5817_v14 = vpop.f32.mrf.mxu0  ;;  %2086 = vmatpush.bf16.msra.mxu0 %v5584_v56 }
 0x150   :  { %6786 = vst [vmem:[#allocation96_spill] sm:$0xff] %v5817_v14  ;;  %v5822_v58 = vadd.f32 %v1241_v37, %v1213_v50  ;;  %v6800_v14 = vld [vmem:[#allocation51_spill] sm:$0xff] }
 0x151   :  { %v5819_v19 = vpop.f32.mrf.mxu1  ;;  %2099 = vmatpush.bf16.msra.mxu1 %v5586_v7  ;;  %2112 = vmatpush.bf16.msra.mxu2 %v5588_v44 }
 0x152   :  { %6787 = vst [vmem:[#allocation97_spill] sm:$0xff] %v5819_v19  ;;  %2125 = vmatpush.bf16.msra.mxu3 %v5591_v49 }
 0x153   :  { %6788 = vst [vmem:[#allocation98_spill] sm:$0xff] %v5822_v58  ;;  %2087 = vmatpush.bf16.msra.mxu0 %v5596_v33 }
 0x155   :  { %2100 = vmatpush.bf16.msra.mxu1 %v5599_v17  ;;  %2113 = vmatpush.bf16.msra.mxu2 %v5601_v30  ;;  %v5830_v28 = vpop.f32.mrf.mxu2 }
 0x156   :  { %6789 = vst [vmem:[#allocation99_spill] sm:$0xff] %v5830_v28  ;;  %2126 = vmatpush.bf16.msra.mxu3 %v5605_v23  ;;  %v6799_v28 = vld [vmem:[#allocation50_spill] sm:$0xff] }
 0x157   :  { %v5833_v32 = vpop.f32.mrf.mxu3  ;;  %v1159_v37 = vpop.f32.mrf.mxu0  ;;  %2088 = vmatpush.bf16.msra.mxu0 %v5615_v59 }
 0x158   :  { %6790 = vst [vmem:[#allocation100_spill] sm:$0xff] %v5833_v32  ;;  %v1160_v50 = vadd.f32 %v1159_v37, %v5768_v48  ;;  %v6797_v32 = vld [vmem:[#allocation48_spill] sm:$0xff] }
 0x159   :  { %v1188_v36 = vpop.f32.mrf.mxu1  ;;  %2101 = vmatpush.bf16.msra.mxu1 %v5619_v1  ;;  %2114 = vmatpush.bf16.msra.mxu2 %v5621_v4 }
 0x15a   :  { %v5839_v51 = vadd.f32 %v1188_v36, %v1160_v50  ;;  %2127 = vmatpush.bf16.msra.mxu3 %v5625_v29  ;;  %v6794_v36 = vld [vmem:[#allocation45_spill] sm:$0xff]  ;;  %v6795_v50 = vld [vmem:[#allocation47_spill] sm:$0xff] }
 0x15b   :  { %2143 = vmatpush.bf16.msrb.mxu0 %v5629_v34 }
 0x15c   :  { %6791 = vst [vmem:[#allocation101_spill] sm:$0xff] %v5839_v51  ;;  %v6801_v51 = vld [vmem:[#allocation52_spill] sm:$0xff] }
 0x15d   :  { %2156 = vmatpush.bf16.msrb.mxu1 %v5631_v42  ;;  %2169 = vmatpush.bf16.msrb.mxu2 %v5634_v39  ;;  %v1217_v37 = vpop.f32.mrf.mxu2 }
 0x15e   :  { %2182 = vmatpush.bf16.msrb.mxu3 %v5639_v41  ;;  %v1218_v58 = vadd.f32 %v1217_v37, %v5780_v5 }
 0x15f   :  { %2144 = vmatpush.bf16.msrb.mxu0 %v6792_v6  ;;  %v1246_v20 = vpop.f32.mrf.mxu3  ;;  %v5848_v46 = vpop.f32.mrf.mxu0 }
 0x160   :  { %6793 = vst [vmem:[#allocation102_spill] sm:$0xff] %v5848_v46  ;;  %v5855_v19 = vadd.f32 %v1246_v20, %v1218_v58  ;;  %v6803_v46 = vld [vmem:[#allocation54_spill] sm:$0xff] }
 0x161   :  { %2157 = vmatpush.bf16.msrb.mxu1 %v6794_v36  ;;  %2170 = vmatpush.bf16.msrb.mxu2 %v6795_v50  ;;  %v5852_v62 = vpop.f32.mrf.mxu1 }
 0x162   :  { %6796 = vst [vmem:[#allocation103_spill] sm:$0xff] %v5852_v62  ;;  %2183 = vmatpush.bf16.msrb.mxu3 %v6797_v32  ;;  %v6805_v62 = vld [vmem:[#allocation56_spill] sm:$0xff]  ;;  %v6806_v32 = vld [vmem:[#allocation57_spill] sm:$0xff] }
 0x163   :  { %6798 = vst [vmem:[#allocation104_spill] sm:$0xff] %v5855_v19  ;;  %2145 = vmatpush.bf16.msrb.mxu0 %v6799_v28  ;;  %v6807_v19 = vld [vmem:[#allocation59_spill] sm:$0xff]  ;;  %v6813_v28 = vld [vmem:[#allocation68_spill] sm:$0xff] }
 0x165   :  { %2158 = vmatpush.bf16.msrb.mxu1 %v6800_v14  ;;  %2171 = vmatpush.bf16.msrb.mxu2 %v6801_v51  ;;  %v5861_v37 = vpop.f32.mrf.mxu2  ;;  %v6809_v51 = vld [vmem:[#allocation60_spill] sm:$0xff] }
 0x166   :  { %2184 = vmatpush.bf16.msrb.mxu3 %v5666_v54  ;;  %6802 = vst [vmem:[#allocation105_spill] sm:$0xff] %v5861_v37  ;;  %v6810_v37 = vld [vmem:[#allocation62_spill] sm:$0xff] }
 0x167   :  { %2146 = vmatpush.bf16.msrb.mxu0 %v6803_v46  ;;  %v5864_v36 = vpop.f32.mrf.mxu3  ;;  %v1164_v50 = vpop.f32.mrf.mxu0  ;;  %v6811_v46 = vld [vmem:[#allocation63_spill] sm:$0xff]  ;;  %v6812_v54 = vld [vmem:[#allocation66_spill] sm:$0xff] }
 0x168   :  { %6804 = vst [vmem:[#allocation106_spill] sm:$0xff] %v5864_v36  ;;  %v1165_v20 = vadd.f32 %v1164_v50, %v5768_v48 }
 0x169   :  { %2159 = vmatpush.bf16.msrb.mxu1 %v6805_v62  ;;  %2172 = vmatpush.bf16.msrb.mxu2 %v6806_v32  ;;  %v1193_v58 = vpop.f32.mrf.mxu1 }
 0x16a   :  { %2185 = vmatpush.bf16.msrb.mxu3 %v6807_v19  ;;  %v5870_v14 = vadd.f32 %v1193_v58, %v1165_v20  ;;  %v6839_v19 = vld [vmem:[#allocation36_spill] sm:$0xff] }
 0x16b   :  { %2147 = vmatpush.bf16.msrb.mxu0 %v6809_v51 }
 0x16c   :  { %6808 = vst [vmem:[#allocation107_spill] sm:$0xff] %v5870_v14 }
 0x16d   :  { %2160 = vmatpush.bf16.msrb.mxu1 %v5695_v57  ;;  %2173 = vmatpush.bf16.msrb.mxu2 %v6810_v37  ;;  %v1222_v36 = vpop.f32.mrf.mxu2 }
 0x16e   :  { %2186 = vmatpush.bf16.msrb.mxu3 %v6811_v46  ;;  %v1223_v32 = vadd.f32 %v1222_v36, %v5780_v5  ;;  %v5891_v36 = vperm.slane %v5777_v61, 6 }
 0x16f   :  { %2148 = vmatpush.bf16.msrb.mxu0 %v6812_v54  ;;  %v1251_v62 = vpop.f32.mrf.mxu3  ;;  %v5878_v50 = vpop.f32.mrf.mxu0 }
 0x170   :  { %v5885_v58 = vadd.f32 %v1251_v62, %v1223_v32  ;;  %6815 = vst [vmem:[#allocation109_spill] sm:$0xff] %v5891_v36 }
 0x171   :  { %2161 = vmatpush.bf16.msrb.mxu1 %v6813_v28  ;;  %2174 = vmatpush.bf16.msrb.mxu2 %v5716_v18  ;;  %v5882_v20 = vpop.f32.mrf.mxu1 }
 0x172   :  { %2187 = vmatpush.bf16.msrb.mxu3 %v5719_v55  ;;  %6814 = vst [vmem:[#allocation108_spill] sm:$0xff] %v5885_v58 }
 0x173   :  { %2149 = vmatpush.bf16.msrb.mxu0 %v5722_v15 }
 0x175   :  { %2162 = vmatpush.bf16.msrb.mxu1 %v5726_v24  ;;  %2175 = vmatpush.bf16.msrb.mxu2 %v5728_v21  ;;  %v5894_v14 = vpop.f32.mrf.mxu2 }
 0x176   :  { %2188 = vmatpush.bf16.msrb.mxu3 %v5733_v60  ;;  %v5906_v60 = vperm.slane %v5777_v61, 7 }
 0x177   :  { %2150 = vmatpush.bf16.msrb.mxu0 %v5739_v38  ;;  %v5897_v18 = vpop.f32.mrf.mxu3  ;;  %v1265_v55 = vpop.f32.mrf.mxu0 }
 0x178   :  { %v1266_v62 = vadd.f32 %v1265_v55, %v5891_v36  ;;  %6817 = vst [vmem:[#allocation111_spill] sm:$0xff] %v5906_v60 }
 0x179   :  { %2163 = vmatpush.bf16.msrb.mxu1 %v5743_v40  ;;  %2176 = vmatpush.bf16.msrb.mxu2 %v5745_v16  ;;  %v1294_v32 = vpop.f32.mrf.mxu1 }
 0x17a   :  { %2189 = vmatpush.bf16.msrb.mxu3 %v5751_v43  ;;  %v5903_v58 = vadd.f32 %v1294_v32, %v1266_v62 }
 0x17c   :  { %6816 = vst [vmem:[#allocation110_spill] sm:$0xff] %v5903_v58 }
 0x17d   :  { %v1323_v21 = vpop.f32.mrf.mxu2 }
 0x17e   :  { %v1324_v38 = vadd.f32 %v1323_v21, %v5906_v60 }
 0x17f   :  { %v1352_v24 = vpop.f32.mrf.mxu3  ;;  %v5909_v15 = vpop.f32.mrf.mxu0 }
 0x180   :  { %6818 = vst [vmem:[#allocation112_spill] sm:$0xff] %v5909_v15  ;;  %v5913_v40 = vadd.f32 %v1352_v24, %v1324_v38 }
 0x181   :  { %v5911_v28 = vpop.f32.mrf.mxu1 }
 0x182   :  { %6819 = vst [vmem:[#allocation113_spill] sm:$0xff] %v5911_v28 }
 0x183   :  { %6820 = vst [vmem:[#allocation114_spill] sm:$0xff] %v5913_v40 }
 0x185   :  { %v5915_v16 = vpop.f32.mrf.mxu2 }
 0x186   :  { %6821 = vst [vmem:[#allocation115_spill] sm:$0xff] %v5915_v16 }
 0x187   :  { %v5917_v55 = vpop.f32.mrf.mxu3  ;;  %v1270_v43 = vpop.f32.mrf.mxu0 }
 0x188   :  { %6822 = vst [vmem:[#allocation116_spill] sm:$0xff] %v5917_v55  ;;  %v1271_v62 = vadd.f32 %v1270_v43, %v5891_v36 }
 0x189   :  { %v1299_v32 = vpop.f32.mrf.mxu1 }
 0x18a   :  { %v5920_v61 = vadd.f32 %v1299_v32, %v1271_v62 }
 0x18c   :  { %6823 = vst [vmem:[#allocation117_spill] sm:$0xff] %v5920_v61 }
 0x18d   :  { %v1328_v58 = vpop.f32.mrf.mxu2 }
 0x18e   :  { %v1329_v21 = vadd.f32 %v1328_v58, %v5906_v60 }
 0x18f   :  { %v1357_v54 = vpop.f32.mrf.mxu3  ;;  %v5923_v46 = vpop.f32.mrf.mxu0 }
 0x190   :  { %6824 = vst [vmem:[#allocation118_spill] sm:$0xff] %v5923_v46  ;;  %v5927_v24 = vadd.f32 %v1357_v54, %v1329_v21 }
 0x191   :  { %v5925_v15 = vpop.f32.mrf.mxu1 }
 0x192   :  { %6825 = vst [vmem:[#allocation119_spill] sm:$0xff] %v5925_v15 }
 0x193   :  { %6826 = vst [vmem:[#allocation120_spill] sm:$0xff] %v5927_v24 }
 0x195   :  { %v5929_v38 = vpop.f32.mrf.mxu2 }
 0x196   :  { %6827 = vst [vmem:[#allocation121_spill] sm:$0xff] %v5929_v38 }
 0x197   :  { %v5931_v40 = vpop.f32.mrf.mxu3  ;;  %v1275_v28 = vpop.f32.mrf.mxu0 }
 0x198   :  { %6828 = vst [vmem:[#allocation122_spill] sm:$0xff] %v5931_v40  ;;  %v1276_v43 = vadd.f32 %v1275_v28, %v5891_v36 }
 0x199   :  { %v1304_v55 = vpop.f32.mrf.mxu1 }
 0x19a   :  { %v5934_v62 = vadd.f32 %v1304_v55, %v1276_v43 }
 0x19c   :  { %6829 = vst [vmem:[#allocation123_spill] sm:$0xff] %v5934_v62 }
 0x19d   :  { %v1333_v32 = vpop.f32.mrf.mxu2 }
 0x19e   :  { %v1334_v58 = vadd.f32 %v1333_v32, %v5906_v60 }
 0x19f   :  { %v1362_v16 = vpop.f32.mrf.mxu3  ;;  %v5937_v61 = vpop.f32.mrf.mxu0 }
 0x1a0   :  { %6830 = vst [vmem:[#allocation124_spill] sm:$0xff] %v5937_v61  ;;  %v5941_v54 = vadd.f32 %v1362_v16, %v1334_v58 }
 0x1a1   :  { %v5939_v46 = vpop.f32.mrf.mxu1 }
 0x1a2   :  { %6831 = vst [vmem:[#allocation125_spill] sm:$0xff] %v5939_v46 }
 0x1a3   :  { %6832 = vst [vmem:[#allocation126_spill] sm:$0xff] %v5941_v54 }
 0x1a5   :  { %v5943_v21 = vpop.f32.mrf.mxu2 }
 0x1a6   :  { %6833 = vst [vmem:[#allocation127_spill] sm:$0xff] %v5943_v21 }
 0x1a7   :  { %v5945_v24 = vpop.f32.mrf.mxu3  ;;  %v1280_v15 = vpop.f32.mrf.mxu0 }
 0x1a8   :  { %6834 = vst [vmem:[#allocation128_spill] sm:$0xff] %v5945_v24  ;;  %v1281_v28 = vadd.f32 %v1280_v15, %v5891_v36  ;;  %v6837_v24 = vld [vmem:[#allocation17_spill] sm:$0xff]  ;;  %v6838_v15 = vld [vmem:[#allocation18_spill] sm:$0xff] }
 0x1a9   :  { %v1309_v40 = vpop.f32.mrf.mxu1 }
 0x1aa   :  { %v5948_v55 = vadd.f32 %v1309_v40, %v1281_v28 }
 0x1ac   :  { %6835 = vst [vmem:[#allocation129_spill] sm:$0xff] %v5948_v55 }
 0x1ae   :  { %v1338_v43 = vpop.f32.mrf.mxu2 }
 0x1af   :  { %v1339_v32 = vadd.f32 %v1338_v43, %v5906_v60  ;;  %v1367_v38 = vpop.f32.mrf.mxu3  ;;  %v5951_v62 = vpop.f32.mrf.mxu0 }
 0x1b1   :  { %v5953_v61 = vpop.f32.mrf.mxu1  ;;  %v5955_v16 = vadd.f32 %v1367_v38, %v1339_v32  ;;  %v1167_v32 = vadd.f32 %v5878_v50, %v5768_v48  ;;  %v6870_v48 = vld [vmem:[#allocation78_spill] sm:$0xff] }
 0x1b3   :  { %6836 = vst [vmem:[#allocation130_spill] sm:$0xff] %v5955_v16 }
 0x1b6   :  { %v1340_v58 = vpop.f32.mrf.mxu2 }
 0x1b7   :  { %v1369_v54 = vpop.f32.mrf.mxu3  ;;  %v1673_v46 = vpop.f32.mrf.mxu0 }
 0x1b8   :  { %v1716_v21 = vadd.f32 %v1673_v46, %v6837_v24  ;;  %v1225_v46 = vadd.f32 %v5894_v14, %v5780_v5 }
 0x1b9   :  { %v1686_v37 = vpop.f32.mrf.mxu1 }
 0x1ba   :  { %v1717_v57 = vadd.f32 %v1686_v37, %v6838_v15  ;;  %v4660_v40 = vmul.f32 -1.442695, %v1716_v21 }
 0x1bc   :  { %v4661_v28 = vmul.f32 -1.442695, %v1717_v57  ;;  %4911 = vpow2.f32 %v4660_v40  ;;  %v1196_v57 = vadd.f32 %v5882_v20, %v1167_v32  ;;  %v1341_v40 = vadd.f32 %v1340_v58, %v5906_v60 }
 0x1be   :  { %4913 = vpow2.f32 %v4661_v28  ;;  %v1699_v43 = vpop.f32.mrf.mxu2 }
 0x1bf   :  { %v1712_v55 = vpop.f32.mrf.mxu3  ;;  %v1675_v51 = vpop.f32.mrf.mxu0 }
 0x1c0   :  { %v1719_v6 = vadd.f32 %v1712_v55, %v6839_v19  ;;  %v1254_v19 = vadd.f32 %v5897_v18, %v1225_v46  ;;  %v1370_v18 = vadd.f32 %v1369_v54, %v1341_v40 }
 0x1c1   :  { %v1688_v41 = vpop.f32.mrf.mxu1 }
 0x1c2   :  { %v4912_v38 = vpop.eup %4911  ;;  %v4662_v16 = vmul.f32 -1.442695, %v1719_v6 }
 0x1c3   :  { %v1944_v37 = vadd.f32 1.0, %v4912_v38  ;;  %v6840_v38 = vld [vmem:[#allocation34_spill] sm:$0xff] }
 0x1c4   :  { %v4914_v39 = vpop.eup %4913  ;;  %4915 = vpow2.f32 %v4662_v16 }
 0x1c5   :  { %v1963_v24 = vadd.f32 1.0, %v4914_v39  ;;  %4917 = vrcp.f32 %v1944_v37  ;;  %v1718_v39 = vadd.f32 %v1699_v43, %v6840_v38  ;;  %vm1950_vm1 = vweird.f32 %v1944_v37 }
 0x1c6   :  { %v1701_v51 = vpop.f32.mrf.mxu2 }
 0x1c7   :  { %4919 = vrcp.f32 %v1963_v24  ;;  %v1714_v41 = vpop.f32.mrf.mxu3  ;;  %v1894_v21 = vpop.f32.mrf.mxu0  ;;  %v1975_v58 = vand.u32 2147483648, %v1963_v24  ;;  %vm1969_vm3 = vweird.f32 %v1963_v24 }
 0x1c8   :  { %v1937_v55 = vadd.f32 %v1894_v21, %v1196_v57  ;;  %v1954_v57 = vand.u32 2147483647, %v1944_v37  ;;  %v1956_v21 = vand.u32 2147483648, %v1944_v37 }
 0x1c9   :  { %v1907_v15 = vpop.f32.mrf.mxu1 }
 0x1ca   :  { %v1938_v50 = vadd.f32 %v1907_v15, %v1254_v19  ;;  %v4916_v6 = vpop.eup %4915  ;;  %v4663_v28 = vmul.f32 -1.442695, %v1937_v55  ;;  %vm1955_vm4 = vcmp.eq.f32.partialorder %v1954_v57, 8.507059e+37 }
 0x1cb   :  { %v4918_v14 = vpop.eup %4917  ;;  %v5968_v16 = vadd.f32 1.0, %v4916_v6 }
 0x1cc   :  { %v4664_v5 = vmul.f32 -1.442695, %v1938_v50  ;;  %v1946_v32 = vmul.f32 %v4918_v14, %v1944_v37  ;;  %4921 = vpow2.f32 %v4663_v28  ;;  %vm1951_vm0 = vweird.f32 %v4918_v14 }
 0x1cd   :  { %v4920_v20 = vpop.eup %4919  ;;  %4923 = vrcp.f32 %v5968_v16  ;;  %v1973_v50 = vand.u32 2147483647, %v1963_v24  ;;  %v1283_v28 = vadd.f32 %v5951_v62, %v5891_v36  ;;  %vm1952_vm5 = vmor %vm1950_vm1, %vm1951_vm0  ;;  %vm1989_vm9 = vweird.f32 %v5968_v16  ;;  %v6869_v36 = vld [vmem:[#allocation77_spill] sm:$0xff] }
 0x1ce   :  { %v1965_v51 = vmul.f32 %v4920_v20, %v1963_v24  ;;  %v1947_v46 = vsub.f32 1.0, %v1946_v32  ;;  %4925 = vpow2.f32 %v4664_v5  ;;  %v1920_v19 = vpop.f32.mrf.mxu2  ;;  %vm1970_vm2 = vweird.f32 %v4920_v20 }
 0x1cf   :  { %4927 = vtanh.f32 %v1718_v39  ;;  %v1933_v55 = vpop.f32.mrf.mxu3  ;;  %v1896_v43 = vpop.f32.mrf.mxu0  ;;  %v1976_v39 = vor.u32 1.1754944e-38, %v1975_v58  ;;  %vm1971_vm6 = vmor %vm1969_vm3, %vm1970_vm2  ;;  %vm1974_vm7 = vcmp.eq.f32.partialorder %v1973_v50, 8.507059e+37 }
 0x1d0   :  { %v1966_v41 = vsub.f32 1.0, %v1965_v51  ;;  %v1948_v15 = vmul.f32 %v4918_v14, %v1947_v46  ;;  %v1940_v6 = vadd.f32 %v1933_v55, %v1370_v18  ;;  %v1957_v51 = vor.u32 1.1754944e-38, %v1956_v21 }
 0x1d1   :  { %v1909_v38 = vpop.f32.mrf.mxu1 }
 0x1d2   :  { %v1967_v60 = vmul.f32 %v4920_v20, %v1966_v41  ;;  %v4922_v54 = vpop.eup %4921  ;;  %v1949_v5 = vadd.f32 %v4918_v14, %v1948_v15  ;;  %v4665_v40 = vmul.f32 -1.442695, %v1940_v6 }
 0x1d3   :  { %v4924_v32 = vpop.eup %4923  ;;  %v5974_v43 = vadd.f32 1.0, %v4922_v54 }
 0x1d4   :  { %v1968_v46 = vadd.f32 %v4920_v20, %v1967_v60  ;;  %v4926_v18 = vpop.eup %4925  ;;  %v1953_v55 = vsel %vm1952_vm5, %v4918_v14, %v1949_v5  ;;  %v1985_v62 = vmul.f32 %v4924_v32, %v5968_v16  ;;  %4929 = vpow2.f32 %v4665_v40 }
 0x1d5   :  { %v4928_v37 = vpop.eup %4927  ;;  %v1958_v24 = vsel %vm1955_vm4, %v1957_v51, %v1953_v55  ;;  %4931 = vrcp.f32 %v5974_v43  ;;  %v2026_v57 = vadd.f32 1.0, %v4926_v18  ;;  %v1312_v14 = vadd.f32 %v5953_v61, %v1283_v28 }
 0x1d6   :  { %v1972_v41 = vsel %vm1971_vm6, %v4920_v20, %v1968_v46  ;;  %v2000_v15 = vmul.f32 %v4928_v37, %v1958_v24  ;;  %v1986_v6 = vsub.f32 1.0, %v1985_v62  ;;  %v1922_v21 = vpop.f32.mrf.mxu2  ;;  %vm1990_vm8 = vweird.f32 %v4924_v32 }
 0x1d7   :  { %v1977_v58 = vsel %vm1974_vm7, %v1976_v39, %v1972_v41  ;;  %4933 = vrcp.f32 %v2026_v57  ;;  %v1935_v38 = vpop.f32.mrf.mxu3  ;;  %v1993_v20 = vand.u32 2147483647, %v5968_v16  ;;  %v1995_v39 = vand.u32 2147483648, %v5968_v16  ;;  %vm5988_vm10 = vmor %vm1989_vm9, %vm1990_vm8 }
 0x1d8   :  { %v1999_v60 = vmul.f32 0.0, %v1977_v58  ;;  %v1987_v54 = vmul.f32 %v4924_v32, %v1986_v6  ;;  %v1939_v46 = vadd.f32 %v1920_v19, %v1312_v14  ;;  %v2019_v41 = vand.u32 2147483648, %v5974_v43 }
 0x1d9   :  { %vm1994_vm11 = vcmp.eq.f32.partialorder %v1993_v20, 8.507059e+37  ;;  %v1996_v19 = vor.u32 1.1754944e-38, %v1995_v39  ;;  %v2038_v21 = vand.u32 2147483648, %v2026_v57  ;;  %vm2013_vm13 = vweird.f32 %v5974_v43 }
 0x1da   :  { %v5979_v50 = vadd.f32 %v2000_v15, %v1999_v60  ;;  %v4930_v5 = vpop.eup %4929  ;;  %v1988_v40 = vadd.f32 %v4924_v32, %v1987_v54  ;;  %v2017_v15 = vand.u32 2147483647, %v5974_v43  ;;  %v2036_v60 = vand.u32 2147483647, %v2026_v57 }
 0x1db   :  { %v4932_v51 = vpop.eup %4931  ;;  %v5984_v18 = vadd.f32 1.0, %v4930_v5  ;;  %v2067_v5 = vld [vmem:[#allocation3] sm:$0xff]  ;;  %vm2032_vm15 = vweird.f32 %v2026_v57  ;;  %v2020_v20 = vor.u32 1.1754944e-38, %v2019_v41 }
 0x1dc   :  { %4935 = vtanh.f32 %v5979_v50  ;;  %v2009_v55 = vmul.f32 %v4932_v51, %v5974_v43  ;;  %v1992_v24 = vsel %vm5988_vm10, %v4924_v32, %v1988_v40  ;;  %vm2014_vm12 = vweird.f32 %v4932_v51 }
 0x1dd   :  { %v4934_v61 = vpop.eup %4933  ;;  %4937 = vrcp.f32 %v5984_v18  ;;  %v1997_v38 = vsel %vm1994_vm11, %v1996_v19, %v1992_v24  ;;  %vm2015_vm0 = vmor %vm2013_vm13, %vm2014_vm12  ;;  %vm2018_vm1 = vcmp.eq.f32.partialorder %v2017_v15, 8.507059e+37  ;;  %vm2037_vm3 = vcmp.eq.f32.partialorder %v2036_v60, 8.507059e+37 }
 0x1de   :  { %v2010_v62 = vsub.f32 1.0, %v2009_v55  ;;  %v2028_v37 = vmul.f32 %v4934_v61, %v2026_v57  ;;  %4939 = vtanh.f32 %v1939_v46  ;;  %vm2033_vm14 = vweird.f32 %v4934_v61 }
 0x1df   :  { %vm2034_vm2 = vmor %vm2032_vm15, %vm2033_vm14  ;;  %v2058_v15 = vand.u32 2147483648, %v5984_v18  ;;  %vm2052_vm5 = vweird.f32 %v5984_v18 }
 0x1e0   :  { %v2029_v16 = vsub.f32 1.0, %v2028_v37  ;;  %v2011_v58 = vmul.f32 %v4932_v51, %v2010_v62  ;;  %v2039_v62 = vor.u32 1.1754944e-38, %v2038_v21  ;;  %v2056_v21 = vand.u32 2147483647, %v5984_v18 }
 0x1e2   :  { %v4936_v6 = vpop.eup %4935  ;;  %v2030_v54 = vmul.f32 %v4934_v61, %v2029_v16  ;;  %v2012_v14 = vadd.f32 %v4932_v51, %v2011_v58  ;;  %vm2057_vm7 = vcmp.eq.f32.partialorder %v2056_v21, 8.507059e+37  ;;  %v6860_v21 = vld [vmem:[#allocation63_spill] sm:$0xff] }
 0x1e3   :  { %v2003_v32 = vmul.f32 %v4936_v6, %v1997_v38  ;;  %v4938_v40 = vpop.eup %4937  ;;  %v2059_v38 = vor.u32 1.1754944e-38, %v2058_v15  ;;  %v6859_v15 = vld [vmem:[#allocation62_spill] sm:$0xff] }
 0x1e4   :  { %v2016_v39 = vsel %vm2015_vm0, %v4932_v51, %v2012_v14  ;;  %v2031_v46 = vadd.f32 %v4934_v61, %v2030_v54  ;;  %v2048_v55 = vmul.f32 %v4938_v40, %v5984_v18  ;;  %v4940_v28 = vpop.eup %4939  ;;  %vm2053_vm4 = vweird.f32 %v4938_v40 }
 0x1e5   :  { %v2021_v37 = vsel %vm2018_vm1, %v2020_v20, %v2016_v39  ;;  %v2068_v43 = vadd.f32 %v2067_v5, %v2003_v32  ;;  %v2080_v24 = vpack.c.bf16 %v2003_v32, %v2003_v32  ;;  %vm2054_vm6 = vmor %vm2052_vm5, %vm2053_vm4  ;;  %v2071_v32 = vld [vmem:[#allocation3 + $0x78] sm:$0xff] }
 0x1e6   :  { %v2035_v19 = vsel %vm2034_vm2, %v4934_v61, %v2031_v46  ;;  %v2063_v16 = vmul.f32 %v4940_v28, %v2021_v37  ;;  %v2049_v58 = vsub.f32 1.0, %v2048_v55  ;;  %v6844_v39 = vld [vmem:[#allocation43_spill] sm:$0xff]  ;;  %v6845_v46 = vld [vmem:[#allocation44_spill] sm:$0xff]  ;;  %v6846_v55 = vld [vmem:[#allocation45_spill] sm:$0xff] }
 0x1e7   :  { %v2040_v6 = vsel %vm2037_vm3, %v2039_v62, %v2035_v19  ;;  %2069 = vst [vmem:[#allocation12] sm:$0xff] %v2068_v43  ;;  %2089 = vmatmul.bf16.vlgmr.msra.gmra.mxu0 %v2080_v24  ;;  %2102 = vmatmul.bf16.vlgmr.msra.gmra.mxu1 %v2080_v24  ;;  %v6847_v28 = vld [vmem:[#allocation47_spill] sm:$0xff]  ;;  %v6848_v62 = vld [vmem:[#allocation48_spill] sm:$0xff]  ;;  %v6849_v37 = vld [vmem:[#allocation50_spill] sm:$0xff] }
 0x1e8   :  { %v2062_v57 = vmul.f32 0.0, %v2040_v6  ;;  %v2050_v51 = vmul.f32 %v4938_v40, %v2049_v58  ;;  %2115 = vmatmul.bf16.vlgmr.msra.gmra.mxu2 %v2080_v24  ;;  %2128 = vmatmul.bf16.vlgmr.msra.gmra.mxu3 %v2080_v24  ;;  %v6850_v43 = vld [vmem:[#allocation51_spill] sm:$0xff]  ;;  %v6851_v24 = vld [vmem:[#allocation52_spill] sm:$0xff]  ;;  %v6852_v19 = vld [vmem:[#allocation53_spill] sm:$0xff] }
 0x1e9   :  { %2341 = vmatpush.bf16.msra.mxu0 %v5480_v47  ;;  %2354 = vmatpush.bf16.msra.mxu1 %v5482_v53  ;;  %v6854_v58 = vld [vmem:[#allocation56_spill] sm:$0xff]  ;;  %v6855_v6 = vld [vmem:[#allocation57_spill] sm:$0xff] }
 0x1ea   :  { %v6001_v41 = vadd.f32 %v2063_v16, %v2062_v57  ;;  %2367 = vmatpush.bf16.msra.mxu2 %v5513_v27  ;;  %2380 = vmatpush.bf16.msra.mxu3 %v5492_v2  ;;  %v2051_v61 = vadd.f32 %v4938_v40, %v2050_v51  ;;  %v6853_v16 = vld [vmem:[#allocation54_spill] sm:$0xff]  ;;  %v6856_v57 = vld [vmem:[#allocation59_spill] sm:$0xff]  ;;  %v6857_v51 = vld [vmem:[#allocation60_spill] sm:$0xff] }
 0x1ec   :  { %4941 = vtanh.f32 %v6001_v41  ;;  %v2055_v60 = vsel %vm2054_vm6, %v4938_v40, %v2051_v61  ;;  %v6843_v40 = vld [vmem:[#allocation42_spill] sm:$0xff]  ;;  %v6858_v61 = vld [vmem:[#allocation61_spill] sm:$0xff] }
 0x1ed   :  { %2342 = vmatpush.bf16.msra.mxu0 %v5494_v8  ;;  %2355 = vmatpush.bf16.msra.mxu1 %v5496_v9  ;;  %v2060_v14 = vsel %vm2057_vm7, %v2059_v38, %v2055_v60  ;;  %v6861_v60 = vld [vmem:[#allocation66_spill] sm:$0xff]  ;;  %v6862_v38 = vld [vmem:[#allocation68_spill] sm:$0xff] }
 0x1ee   :  { %2368 = vmatpush.bf16.msra.mxu2 %v5529_v0  ;;  %2381 = vmatpush.bf16.msra.mxu3 %v5510_v25 }
 0x1f1   :  { %2343 = vmatpush.bf16.msra.mxu0 %v5516_v31  ;;  %2356 = vmatpush.bf16.msra.mxu1 %v5519_v35 }
 0x1f2   :  { %v4942_v54 = vpop.eup %4941  ;;  %2369 = vmatpush.bf16.msra.mxu2 %v5544_v22  ;;  %2382 = vmatpush.bf16.msra.mxu3 %v5531_v3 }
 0x1f3   :  { %v2066_v18 = vmul.f32 %v4942_v54, %v2060_v14  ;;  %v6863_v54 = vld [vmem:[#allocation69_spill] sm:$0xff]  ;;  %v6864_v14 = vld [vmem:[#allocation70_spill] sm:$0xff] }
 0x1f5   :  { %v2072_v5 = vadd.f32 %v2071_v32, %v2066_v18  ;;  %v2142_v20 = vpack.c.bf16 %v2066_v18, %v2066_v18  ;;  %2344 = vmatpush.bf16.msra.mxu0 %v5537_v11  ;;  %2357 = vmatpush.bf16.msra.mxu1 %v5539_v12  ;;  %v6865_v32 = vld [vmem:[#allocation71_spill] sm:$0xff]  ;;  %v6866_v18 = vld [vmem:[#allocation72_spill] sm:$0xff] }
 0x1f6   :  { %2370 = vmatpush.bf16.msra.mxu2 %v5561_v52  ;;  %2383 = vmatpush.bf16.msra.mxu3 %v5554_v45 }
 0x1f7   :  { %2074 = vst [vmem:[#allocation12 + $0x78] sm:$0xff] %v2072_v5  ;;  %2151 = vmatmul.bf16.vlgmr.msrb.gmra.mxu0 %v2142_v20  ;;  %2164 = vmatmul.bf16.vlgmr.msrb.gmra.mxu1 %v2142_v20  ;;  %v6867_v5 = vld [vmem:[#allocation73_spill] sm:$0xff] }
 0x1f8   :  { %2177 = vmatmul.bf16.vlgmr.msrb.gmra.mxu2 %v2142_v20  ;;  %2190 = vmatmul.bf16.vlgmr.msrb.gmra.mxu3 %v2142_v20  ;;  %v6868_v20 = vld [vmem:[#allocation75_spill] sm:$0xff] }
 0x1f9   :  { %2345 = vmatpush.bf16.msra.mxu0 %v5565_v63  ;;  %2358 = vmatpush.bf16.msra.mxu1 %v5568_v10 }
 0x1fa   :  { %2371 = vmatpush.bf16.msra.mxu2 %v5570_v13  ;;  %2384 = vmatpush.bf16.msra.mxu3 %v5574_v26 }
 0x1fd   :  { %2346 = vmatpush.bf16.msra.mxu0 %v5584_v56  ;;  %2359 = vmatpush.bf16.msra.mxu1 %v5586_v7 }
 0x1fe   :  { %2372 = vmatpush.bf16.msra.mxu2 %v5588_v44  ;;  %2385 = vmatpush.bf16.msra.mxu3 %v5591_v49 }
 0x201   :  { %2347 = vmatpush.bf16.msra.mxu0 %v5596_v33  ;;  %2360 = vmatpush.bf16.msra.mxu1 %v5599_v17 }
 0x202   :  { %2373 = vmatpush.bf16.msra.mxu2 %v5601_v30  ;;  %2386 = vmatpush.bf16.msra.mxu3 %v5605_v23 }
 0x205   :  { %2348 = vmatpush.bf16.msra.mxu0 %v5615_v59  ;;  %2361 = vmatpush.bf16.msra.mxu1 %v5619_v1 }
 0x206   :  { %2374 = vmatpush.bf16.msra.mxu2 %v5621_v4  ;;  %2387 = vmatpush.bf16.msra.mxu3 %v5625_v29 }
 0x209   :  { %2403 = vmatpush.bf16.msrb.mxu0 %v5629_v34  ;;  %2416 = vmatpush.bf16.msrb.mxu1 %v5631_v42 }
 0x20a   :  { %2429 = vmatpush.bf16.msrb.mxu2 %v6843_v40  ;;  %2442 = vmatpush.bf16.msrb.mxu3 %v6844_v39 }
 0x20d   :  { %2404 = vmatpush.bf16.msrb.mxu0 %v6845_v46  ;;  %2417 = vmatpush.bf16.msrb.mxu1 %v6846_v55 }
 0x20e   :  { %2430 = vmatpush.bf16.msrb.mxu2 %v6847_v28  ;;  %2443 = vmatpush.bf16.msrb.mxu3 %v6848_v62 }
 0x211   :  { %2405 = vmatpush.bf16.msrb.mxu0 %v6849_v37  ;;  %2418 = vmatpush.bf16.msrb.mxu1 %v6850_v43 }
 0x212   :  { %2431 = vmatpush.bf16.msrb.mxu2 %v6851_v24  ;;  %2444 = vmatpush.bf16.msrb.mxu3 %v6852_v19 }
 0x215   :  { %2406 = vmatpush.bf16.msrb.mxu0 %v6853_v16  ;;  %2419 = vmatpush.bf16.msrb.mxu1 %v6854_v58 }
 0x216   :  { %2432 = vmatpush.bf16.msrb.mxu2 %v6855_v6  ;;  %2445 = vmatpush.bf16.msrb.mxu3 %v6856_v57  ;;  %v6875_v57 = vld [vmem:[#allocation38_spill] sm:$0xff] }
 0x219   :  { %2407 = vmatpush.bf16.msrb.mxu0 %v6857_v51  ;;  %2420 = vmatpush.bf16.msrb.mxu1 %v6858_v61  ;;  %v6874_v61 = vld [vmem:[#allocation20_spill] sm:$0xff] }
 0x21a   :  { %2433 = vmatpush.bf16.msrb.mxu2 %v6859_v15  ;;  %2446 = vmatpush.bf16.msrb.mxu3 %v6860_v21  ;;  %v6871_v21 = vld [vmem:[#allocation79_spill] sm:$0xff] }
 0x21b   :  { %v6873_v15 = vld [vmem:[#allocation19_spill] sm:$0xff] }
 0x21d   :  { %2408 = vmatpush.bf16.msrb.mxu0 %v6861_v60  ;;  %2421 = vmatpush.bf16.msrb.mxu1 %v6862_v38  ;;  %v6872_v60 = vld [vmem:[#allocation81_spill] sm:$0xff] }
 0x21e   :  { %2434 = vmatpush.bf16.msrb.mxu2 %v6863_v54  ;;  %2447 = vmatpush.bf16.msrb.mxu3 %v6864_v14 }
 0x221   :  { %2409 = vmatpush.bf16.msrb.mxu0 %v6865_v32  ;;  %2422 = vmatpush.bf16.msrb.mxu1 %v6866_v18 }
 0x222   :  { %2435 = vmatpush.bf16.msrb.mxu2 %v6867_v5  ;;  %2448 = vmatpush.bf16.msrb.mxu3 %v6868_v20 }
 0x225   :  { %2410 = vmatpush.bf16.msrb.mxu0 %v6869_v36  ;;  %2423 = vmatpush.bf16.msrb.mxu1 %v6870_v48 }
 0x226   :  { %2436 = vmatpush.bf16.msrb.mxu2 %v6871_v21  ;;  %2449 = vmatpush.bf16.msrb.mxu3 %v6872_v60 }
 0x264   :  { %v2090_v38 = vpop.f32.mrf.mxu0  ;;  %v2103_v54 = vpop.f32.mrf.mxu1 }
 0x265   :  { %v2133_v14 = vadd.f32 %v2090_v38, %v6873_v15  ;;  %v2134_v32 = vadd.f32 %v2103_v54, %v6874_v61 }
 0x267   :  { %v4666_v51 = vmul.f32 -1.442695, %v2133_v14  ;;  %v4667_v18 = vmul.f32 -1.442695, %v2134_v32  ;;  %v6877_v32 = vld [vmem:[#allocation108_spill] sm:$0xff] }
 0x269   :  { %4943 = vpow2.f32 %v4666_v51  ;;  %v6876_v51 = vld [vmem:[#allocation107_spill] sm:$0xff] }
 0x26a   :  { %4945 = vpow2.f32 %v4667_v18 }
 0x26b   :  { %v2116_v5 = vpop.f32.mrf.mxu2  ;;  %v2129_v20 = vpop.f32.mrf.mxu3 }
 0x26c   :  { %v2136_v36 = vadd.f32 %v2129_v20, %v6875_v57  ;;  %v2092_v6 = vpop.f32.mrf.mxu0  ;;  %v2105_v48 = vpop.f32.mrf.mxu1  ;;  %v6878_v57 = vld [vmem:[#allocation37_spill] sm:$0xff] }
 0x26d   :  { %v2135_v6 = vadd.f32 %v2116_v5, %v6878_v57  ;;  %v6879_v57 = vld [vmem:[#allocation130_spill] sm:$0xff] }
 0x26e   :  { %v4668_v58 = vmul.f32 -1.442695, %v2136_v36 }
 0x26f   :  { %v4944_v21 = vpop.eup %4943 }
 0x270   :  { %v4946_v16 = vpop.eup %4945  ;;  %v2202_v60 = vadd.f32 1.0, %v4944_v21  ;;  %4947 = vpow2.f32 %v4668_v58 }
 0x271   :  { %v2221_v19 = vadd.f32 1.0, %v4946_v16 }
 0x272   :  { %4949 = vrcp.f32 %v2202_v60  ;;  %v2212_v43 = vand.u32 2147483647, %v2202_v60  ;;  %v2214_v37 = vand.u32 2147483648, %v2202_v60  ;;  %vm2208_vm11 = vweird.f32 %v2202_v60 }
 0x273   :  { %4951 = vrcp.f32 %v2221_v19  ;;  %v2118_v15 = vpop.f32.mrf.mxu2  ;;  %v2131_v61 = vpop.f32.mrf.mxu3  ;;  %vm2227_vm10 = vweird.f32 %v2221_v19 }
 0x274   :  { %v2152_v38 = vpop.f32.mrf.mxu0  ;;  %v2165_v54 = vpop.f32.mrf.mxu1  ;;  %vm2213_vm13 = vcmp.eq.f32.partialorder %v2212_v43, 8.507059e+37 }
 0x275   :  { %v2195_v14 = vadd.f32 %v2152_v38, %v6876_v51  ;;  %v2196_v18 = vadd.f32 %v2165_v54, %v6877_v32  ;;  %v2233_v32 = vand.u32 2147483648, %v2221_v19 }
 0x276   :  { %v4948_v24 = vpop.eup %4947 }
 0x277   :  { %v6075_v48 = vadd.f32 1.0, %v4948_v24  ;;  %v4669_v36 = vmul.f32 -1.442695, %v2195_v14  ;;  %v4670_v21 = vmul.f32 -1.442695, %v2196_v18 }
 0x278   :  { %v4950_v20 = vpop.eup %4949  ;;  %v2231_v18 = vand.u32 2147483647, %v2221_v19 }
 0x279   :  { %v4952_v58 = vpop.eup %4951  ;;  %v2204_v16 = vmul.f32 %v4950_v20, %v2202_v60  ;;  %4953 = vrcp.f32 %v6075_v48  ;;  %vm2209_vm8 = vweird.f32 %v4950_v20  ;;  %vm2247_vm1 = vweird.f32 %v6075_v48 }
 0x27a   :  { %v2223_v15 = vmul.f32 %v4952_v58, %v2221_v19  ;;  %4955 = vtanh.f32 %v2135_v6  ;;  %vm2228_vm9 = vweird.f32 %v4952_v58  ;;  %vm2210_vm12 = vmor %vm2208_vm11, %vm2209_vm8  ;;  %vm2232_vm15 = vcmp.eq.f32.partialorder %v2231_v18, 8.507059e+37  ;;  %v6880_v18 = vld [vmem:[#allocation129_spill] sm:$0xff] }
 0x27b   :  { %v2205_v61 = vsub.f32 1.0, %v2204_v16  ;;  %4957 = vpow2.f32 %v4669_v36  ;;  %v2178_v38 = vpop.f32.mrf.mxu2  ;;  %v2191_v51 = vpop.f32.mrf.mxu3  ;;  %vm2229_vm14 = vmor %vm2227_vm10, %vm2228_vm9 }
 0x27c   :  { %v2224_v54 = vsub.f32 1.0, %v2223_v15  ;;  %4959 = vpow2.f32 %v4670_v21  ;;  %v2154_v24 = vpop.f32.mrf.mxu0  ;;  %v2167_v5 = vpop.f32.mrf.mxu1  ;;  %v2198_v62 = vadd.f32 %v2191_v51, %v6879_v57  ;;  %v2215_v15 = vor.u32 1.1754944e-38, %v2214_v37 }
 0x27d   :  { %v2206_v14 = vmul.f32 %v4950_v20, %v2205_v61  ;;  %v2234_v61 = vor.u32 1.1754944e-38, %v2233_v32 }
 0x27e   :  { %v2225_v28 = vmul.f32 %v4952_v58, %v2224_v54  ;;  %v4671_v36 = vmul.f32 -1.442695, %v2198_v62 }
 0x27f   :  { %v4954_v55 = vpop.eup %4953  ;;  %v2207_v6 = vadd.f32 %v4950_v20, %v2206_v14 }
 0x280   :  { %v4956_v16 = vpop.eup %4955  ;;  %v2226_v46 = vadd.f32 %v4952_v58, %v2225_v28  ;;  %v2243_v21 = vmul.f32 %v4954_v55, %v6075_v48  ;;  %4961 = vpow2.f32 %v4671_v36  ;;  %vm2248_vm0 = vweird.f32 %v4954_v55 }
 0x281   :  { %v4958_v24 = vpop.eup %4957  ;;  %v2211_v5 = vsel %vm2210_vm12, %v4950_v20, %v2207_v6  ;;  %vm2249_vm2 = vmor %vm2247_vm1, %vm2248_vm0 }
 0x282   :  { %v4960_v51 = vpop.eup %4959  ;;  %v2216_v54 = vsel %vm2213_vm13, %v2215_v15, %v2211_v5  ;;  %v2230_v57 = vsel %vm2229_vm14, %v4952_v58, %v2226_v46  ;;  %v2244_v19 = vsub.f32 1.0, %v2243_v21  ;;  %v2265_v14 = vadd.f32 1.0, %v4958_v24 }
 0x283   :  { %v2235_v60 = vsel %vm2232_vm15, %v2234_v61, %v2230_v57  ;;  %v2258_v62 = vmul.f32 %v4956_v16, %v2216_v54  ;;  %v2284_v39 = vadd.f32 1.0, %v4960_v51  ;;  %v2180_v40 = vpop.f32.mrf.mxu2  ;;  %v2193_v43 = vpop.f32.mrf.mxu3  ;;  %v2253_v46 = vand.u32 2147483648, %v6075_v48 }
 0x284   :  { %v2257_v28 = vmul.f32 %v2235_v60, %v5979_v50  ;;  %v2245_v37 = vmul.f32 %v4954_v55, %v2244_v19  ;;  %4963 = vrcp.f32 %v2265_v14  ;;  %v2251_v40 = vand.u32 2147483647, %v6075_v48  ;;  %v2326_v48 = vld [vmem:[#allocation3 + $0x10] sm:$0xff] }
 0x285   :  { %4965 = vrcp.f32 %v2284_v39  ;;  %v2197_v50 = vadd.f32 %v2178_v38, %v6880_v18  ;;  %v2254_v21 = vor.u32 1.1754944e-38, %v2253_v46  ;;  %v2296_v54 = vand.u32 2147483648, %v2284_v39 }
 0x286   :  { %v6081_v42 = vadd.f32 %v2258_v62, %v2257_v28  ;;  %v4962_v20 = vpop.eup %4961  ;;  %v2246_v32 = vadd.f32 %v4954_v55, %v2245_v37  ;;  %vm2252_vm3 = vcmp.eq.f32.partialorder %v2251_v40, 8.507059e+37  ;;  %v2277_v57 = vand.u32 2147483648, %v2265_v14 }
 0x287   :  { %v6085_v58 = vadd.f32 1.0, %v4962_v20  ;;  %v2275_v38 = vand.u32 2147483647, %v2265_v14  ;;  %v2294_v37 = vand.u32 2147483647, %v2284_v39  ;;  %vm2271_vm6 = vweird.f32 %v2265_v14 }
 0x288   :  { %4967 = vtanh.f32 %v6081_v42  ;;  %v2250_v15 = vsel %vm2249_vm2, %v4954_v55, %v2246_v32  ;;  %vm2290_vm7 = vweird.f32 %v2284_v39  ;;  %v2278_v46 = vor.u32 1.1754944e-38, %v2277_v57 }
 0x289   :  { %4969 = vrcp.f32 %v6085_v58  ;;  %v2255_v19 = vsel %vm2252_vm3, %v2254_v21, %v2250_v15  ;;  %vm2276_vm10 = vcmp.eq.f32.partialorder %v2275_v38, 8.507059e+37  ;;  %vm2295_vm11 = vcmp.eq.f32.partialorder %v2294_v37, 8.507059e+37  ;;  %v2331_v38 = vld [vmem:[#allocation3 + $0x68] sm:$0xff]  ;;  %v6882_v37 = vld [vmem:[#allocation42_spill] sm:$0xff] }
 0x28a   :  { %v4964_v6 = vpop.eup %4963  ;;  %4971 = vtanh.f32 %v2197_v50  ;;  %vm2310_vm13 = vweird.f32 %v6085_v58 }
 0x28b   :  { %v4966_v36 = vpop.eup %4965  ;;  %v2267_v16 = vmul.f32 %v4964_v6, %v2265_v14  ;;  %vm2272_vm4 = vweird.f32 %v4964_v6 }
 0x28c   :  { %v2286_v24 = vmul.f32 %v4966_v36, %v2284_v39  ;;  %vm2291_vm5 = vweird.f32 %v4966_v36  ;;  %vm2273_vm8 = vmor %vm2271_vm6, %vm2272_vm4 }
 0x28d   :  { %v2268_v61 = vsub.f32 1.0, %v2267_v16  ;;  %vm2292_vm9 = vmor %vm2290_vm7, %vm2291_vm5  ;;  %v2297_v16 = vor.u32 1.1754944e-38, %v2296_v54  ;;  %v2316_v54 = vand.u32 2147483648, %v6085_v58 }
 0x28e   :  { %v4968_v5 = vpop.eup %4967  ;;  %v2287_v51 = vsub.f32 1.0, %v2286_v24 }
 0x28f   :  { %v2269_v60 = vmul.f32 %v4964_v6, %v2268_v61  ;;  %v2261_v62 = vmul.f32 %v4968_v5, %v2255_v19  ;;  %v4970_v43 = vpop.eup %4969  ;;  %v2317_v19 = vor.u32 1.1754944e-38, %v2316_v54  ;;  %v6900_v54 = vld [vmem:[#allocation66_spill] sm:$0xff] }
 0x290   :  { %v2288_v28 = vmul.f32 %v4966_v36, %v2287_v51  ;;  %v2306_v20 = vmul.f32 %v4970_v43, %v6085_v58  ;;  %v4972_v50 = vpop.eup %4971  ;;  %vm2311_vm12 = vweird.f32 %v4970_v43 }
 0x291   :  { %v2270_v55 = vadd.f32 %v4964_v6, %v2269_v60  ;;  %v2327_v32 = vadd.f32 %v2326_v48, %v2261_v62  ;;  %v2340_v18 = vpack.c.bf16 %v2261_v62, %v2261_v62  ;;  %vm2312_vm14 = vmor %vm2310_vm13, %vm2311_vm12 }
 0x292   :  { %v2289_v40 = vadd.f32 %v4966_v36, %v2288_v28  ;;  %v2307_v21 = vsub.f32 1.0, %v2306_v20  ;;  %v6881_v28 = vld [vmem:[#allocation41_spill] sm:$0xff]  ;;  %v6884_v20 = vld [vmem:[#allocation44_spill] sm:$0xff] }
 0x293   :  { %v2274_v15 = vsel %vm2273_vm8, %v4964_v6, %v2270_v55  ;;  %2329 = vst [vmem:[#allocation12 + $0x10] sm:$0xff] %v2327_v32  ;;  %2349 = vmatmul.bf16.vlgmr.msra.gmra.mxu0 %v2340_v18  ;;  %2362 = vmatmul.bf16.vlgmr.msra.gmra.mxu1 %v2340_v18  ;;  %v6883_v55 = vld [vmem:[#allocation43_spill] sm:$0xff]  ;;  %v6885_v32 = vld [vmem:[#allocation45_spill] sm:$0xff] }
 0x294   :  { %v2279_v24 = vsel %vm2276_vm10, %v2278_v46, %v2274_v15  ;;  %v2293_v61 = vsel %vm2292_vm9, %v4966_v36, %v2289_v40  ;;  %v2308_v51 = vmul.f32 %v4970_v43, %v2307_v21  ;;  %2375 = vmatmul.bf16.vlgmr.msra.gmra.mxu2 %v2340_v18  ;;  %2388 = vmatmul.bf16.vlgmr.msra.gmra.mxu3 %v2340_v18  ;;  %v6886_v46 = vld [vmem:[#allocation47_spill] sm:$0xff]  ;;  %v6887_v40 = vld [vmem:[#allocation48_spill] sm:$0xff]  ;;  %v6888_v18 = vld [vmem:[#allocation50_spill] sm:$0xff] }
 0x295   :  { %v2298_v14 = vsel %vm2295_vm11, %v2297_v16, %v2293_v61  ;;  %v2321_v5 = vmul.f32 %v4972_v50, %v2279_v24  ;;  %2601 = vmatpush.bf16.msra.mxu0 %v5480_v47  ;;  %2614 = vmatpush.bf16.msra.mxu1 %v5482_v53  ;;  %v6889_v50 = vld [vmem:[#allocation51_spill] sm:$0xff]  ;;  %v6890_v16 = vld [vmem:[#allocation52_spill] sm:$0xff]  ;;  %v6891_v15 = vld [vmem:[#allocation53_spill] sm:$0xff] }
 0x296   :  { %v2320_v39 = vmul.f32 %v2298_v14, %v6001_v41  ;;  %2627 = vmatpush.bf16.msra.mxu2 %v5513_v27  ;;  %2640 = vmatpush.bf16.msra.mxu3 %v5492_v2  ;;  %v2309_v36 = vadd.f32 %v4970_v43, %v2308_v51  ;;  %v2314_v41 = vand.u32 2147483647, %v6085_v58  ;;  %v6892_v21 = vld [vmem:[#allocation54_spill] sm:$0xff]  ;;  %v6893_v24 = vld [vmem:[#allocation56_spill] sm:$0xff]  ;;  %v6894_v61 = vld [vmem:[#allocation57_spill] sm:$0xff] }
 0x297   :  { %v6895_v14 = vld [vmem:[#allocation59_spill] sm:$0xff]  ;;  %v6897_v51 = vld [vmem:[#allocation61_spill] sm:$0xff] }
 0x298   :  { %v6097_v6 = vadd.f32 %v2321_v5, %v2320_v39  ;;  %v2313_v57 = vsel %vm2312_vm14, %v4970_v43, %v2309_v36  ;;  %vm2315_vm15 = vcmp.eq.f32.partialorder %v2314_v41, 8.507059e+37  ;;  %v6896_v5 = vld [vmem:[#allocation60_spill] sm:$0xff]  ;;  %v6898_v39 = vld [vmem:[#allocation62_spill] sm:$0xff]  ;;  %v6899_v36 = vld [vmem:[#allocation63_spill] sm:$0xff] }
 0x299   :  { %2602 = vmatpush.bf16.msra.mxu0 %v5494_v8  ;;  %2615 = vmatpush.bf16.msra.mxu1 %v5496_v9  ;;  %v2318_v60 = vsel %vm2315_vm15, %v2317_v19, %v2313_v57  ;;  %v6901_v41 = vld [vmem:[#allocation68_spill] sm:$0xff]  ;;  %v6902_v57 = vld [vmem:[#allocation69_spill] sm:$0xff]  ;;  %v6903_v19 = vld [vmem:[#allocation70_spill] sm:$0xff] }
 0x29a   :  { %4973 = vtanh.f32 %v6097_v6  ;;  %2628 = vmatpush.bf16.msra.mxu2 %v5529_v0  ;;  %2641 = vmatpush.bf16.msra.mxu3 %v5510_v25 }
 0x29d   :  { %2603 = vmatpush.bf16.msra.mxu0 %v5516_v31  ;;  %2616 = vmatpush.bf16.msra.mxu1 %v5519_v35 }
 0x29e   :  { %2629 = vmatpush.bf16.msra.mxu2 %v5544_v22  ;;  %2642 = vmatpush.bf16.msra.mxu3 %v5531_v3 }
 0x2a0   :  { %v4974_v48 = vpop.eup %4973 }
 0x2a1   :  { %v2324_v58 = vmul.f32 %v4974_v48, %v2318_v60  ;;  %2604 = vmatpush.bf16.msra.mxu0 %v5537_v11  ;;  %2617 = vmatpush.bf16.msra.mxu1 %v5539_v12  ;;  %v6904_v48 = vld [vmem:[#allocation71_spill] sm:$0xff]  ;;  %v6905_v60 = vld [vmem:[#allocation72_spill] sm:$0xff] }
 0x2a2   :  { %2630 = vmatpush.bf16.msra.mxu2 %v5561_v52  ;;  %2643 = vmatpush.bf16.msra.mxu3 %v5554_v45 }
 0x2a3   :  { %v2332_v62 = vadd.f32 %v2331_v38, %v2324_v58  ;;  %v2402_v43 = vpack.c.bf16 %v2324_v58, %v2324_v58  ;;  %v6906_v38 = vld [vmem:[#allocation73_spill] sm:$0xff]  ;;  %v6907_v58 = vld [vmem:[#allocation75_spill] sm:$0xff] }
 0x2a5   :  { %2334 = vst [vmem:[#allocation12 + $0x68] sm:$0xff] %v2332_v62  ;;  %2411 = vmatmul.bf16.vlgmr.msrb.gmra.mxu0 %v2402_v43  ;;  %2424 = vmatmul.bf16.vlgmr.msrb.gmra.mxu1 %v2402_v43  ;;  %v6908_v62 = vld [vmem:[#allocation77_spill] sm:$0xff] }
 0x2a6   :  { %2437 = vmatmul.bf16.vlgmr.msrb.gmra.mxu2 %v2402_v43  ;;  %2450 = vmatmul.bf16.vlgmr.msrb.gmra.mxu3 %v2402_v43  ;;  %v6909_v43 = vld [vmem:[#allocation78_spill] sm:$0xff] }
 0x2a7   :  { %2605 = vmatpush.bf16.msra.mxu0 %v5565_v63  ;;  %2618 = vmatpush.bf16.msra.mxu1 %v5568_v10 }
 0x2a8   :  { %2631 = vmatpush.bf16.msra.mxu2 %v5570_v13  ;;  %2644 = vmatpush.bf16.msra.mxu3 %v5574_v26 }
 0x2ab   :  { %2606 = vmatpush.bf16.msra.mxu0 %v5584_v56  ;;  %2619 = vmatpush.bf16.msra.mxu1 %v5586_v7 }
 0x2ac   :  { %2632 = vmatpush.bf16.msra.mxu2 %v5588_v44  ;;  %2645 = vmatpush.bf16.msra.mxu3 %v5591_v49 }
 0x2af   :  { %2607 = vmatpush.bf16.msra.mxu0 %v5596_v33  ;;  %2620 = vmatpush.bf16.msra.mxu1 %v5599_v17 }
 0x2b0   :  { %2633 = vmatpush.bf16.msra.mxu2 %v5601_v30  ;;  %2646 = vmatpush.bf16.msra.mxu3 %v5605_v23 }
 0x2b3   :  { %2608 = vmatpush.bf16.msra.mxu0 %v5615_v59  ;;  %2621 = vmatpush.bf16.msra.mxu1 %v5619_v1 }
 0x2b4   :  { %2634 = vmatpush.bf16.msra.mxu2 %v5621_v4  ;;  %2647 = vmatpush.bf16.msra.mxu3 %v5625_v29 }
 0x2b7   :  { %2663 = vmatpush.bf16.msrb.mxu0 %v5629_v34  ;;  %2676 = vmatpush.bf16.msrb.mxu1 %v6881_v28 }
 0x2b8   :  { %2689 = vmatpush.bf16.msrb.mxu2 %v6882_v37  ;;  %2702 = vmatpush.bf16.msrb.mxu3 %v6883_v55 }
 0x2bb   :  { %2664 = vmatpush.bf16.msrb.mxu0 %v6884_v20  ;;  %2677 = vmatpush.bf16.msrb.mxu1 %v6885_v32 }
 0x2bc   :  { %2690 = vmatpush.bf16.msrb.mxu2 %v6886_v46  ;;  %2703 = vmatpush.bf16.msrb.mxu3 %v6887_v40  ;;  %v6922_v46 = vld [vmem:[#allocation111_spill] sm:$0xff] }
 0x2bf   :  { %2665 = vmatpush.bf16.msrb.mxu0 %v6888_v18  ;;  %2678 = vmatpush.bf16.msrb.mxu1 %v6889_v50  ;;  %v6917_v50 = vld [vmem:[#allocation89_spill] sm:$0xff]  ;;  %v6921_v18 = vld [vmem:[#allocation39_spill] sm:$0xff] }
 0x2c0   :  { %2691 = vmatpush.bf16.msrb.mxu2 %v6890_v16  ;;  %2704 = vmatpush.bf16.msrb.mxu3 %v6891_v15  ;;  %v6916_v15 = vld [vmem:[#allocation102_spill] sm:$0xff] }
 0x2c3   :  { %2666 = vmatpush.bf16.msrb.mxu0 %v6892_v21  ;;  %2679 = vmatpush.bf16.msrb.mxu1 %v6893_v24 }
 0x2c4   :  { %2692 = vmatpush.bf16.msrb.mxu2 %v6894_v61  ;;  %2705 = vmatpush.bf16.msrb.mxu3 %v6895_v14  ;;  %v6914_v14 = vld [vmem:[#allocation46_spill] sm:$0xff] }
 0x2c7   :  { %2667 = vmatpush.bf16.msrb.mxu0 %v6896_v5  ;;  %2680 = vmatpush.bf16.msrb.mxu1 %v6897_v51  ;;  %v6913_v51 = vld [vmem:[#allocation22_spill] sm:$0xff] }
 0x2c8   :  { %2693 = vmatpush.bf16.msrb.mxu2 %v6898_v39  ;;  %2706 = vmatpush.bf16.msrb.mxu3 %v6899_v36  ;;  %v6910_v36 = vld [vmem:[#allocation79_spill] sm:$0xff]  ;;  %v6912_v39 = vld [vmem:[#allocation21_spill] sm:$0xff] }
 0x2cb   :  { %2668 = vmatpush.bf16.msrb.mxu0 %v6900_v54  ;;  %2681 = vmatpush.bf16.msrb.mxu1 %v6901_v41  ;;  %v6911_v54 = vld [vmem:[#allocation81_spill] sm:$0xff] }
 0x2cc   :  { %2694 = vmatpush.bf16.msrb.mxu2 %v6902_v57  ;;  %2707 = vmatpush.bf16.msrb.mxu3 %v6903_v19 }
 0x2cf   :  { %2669 = vmatpush.bf16.msrb.mxu0 %v6904_v48  ;;  %2682 = vmatpush.bf16.msrb.mxu1 %v6905_v60 }
 0x2d0   :  { %2695 = vmatpush.bf16.msrb.mxu2 %v6906_v38  ;;  %2708 = vmatpush.bf16.msrb.mxu3 %v6907_v58 }
 0x2d3   :  { %2670 = vmatpush.bf16.msrb.mxu0 %v6908_v62  ;;  %2683 = vmatpush.bf16.msrb.mxu1 %v6909_v43 }
 0x2d4   :  { %2696 = vmatpush.bf16.msrb.mxu2 %v6910_v36  ;;  %2709 = vmatpush.bf16.msrb.mxu3 %v6911_v54  ;;  %v6915_v54 = vld [vmem:[#allocation85_spill] sm:$0xff] }
 0x2d5   :  { %v1162_v16 = vadd.f32 %v6916_v15, %v6915_v54 }
 0x310   :  { %v2350_v41 = vpop.f32.mrf.mxu0  ;;  %v2363_v57 = vpop.f32.mrf.mxu1 }
 0x311   :  { %v2393_v19 = vadd.f32 %v2350_v41, %v6912_v39  ;;  %v2394_v48 = vadd.f32 %v2363_v57, %v6913_v51  ;;  %v6918_v39 = vld [vmem:[#allocation105_spill] sm:$0xff] }
 0x312   :  { %v1220_v41 = vadd.f32 %v6918_v39, %v6917_v50  ;;  %v6923_v39 = vld [vmem:[#allocation127_spill] sm:$0xff] }
 0x313   :  { %v4672_v5 = vmul.f32 -1.442695, %v2393_v19  ;;  %v4673_v60 = vmul.f32 -1.442695, %v2394_v48  ;;  %v6919_v48 = vld [vmem:[#allocation103_spill] sm:$0xff] }
 0x315   :  { %4975 = vpow2.f32 %v4672_v5 }
 0x316   :  { %4977 = vpow2.f32 %v4673_v60 }
 0x317   :  { %v2376_v38 = vpop.f32.mrf.mxu2  ;;  %v2389_v58 = vpop.f32.mrf.mxu3 }
 0x318   :  { %v2396_v62 = vadd.f32 %v2389_v58, %v6914_v14  ;;  %v2352_v61 = vpop.f32.mrf.mxu0  ;;  %v2365_v43 = vpop.f32.mrf.mxu1  ;;  %v1191_v14 = vadd.f32 %v6919_v48, %v1162_v16  ;;  %v2395_v40 = vadd.f32 %v2376_v38, %v6921_v18 }
 0x319   :  { %v6920_v61 = vld [vmem:[#allocation106_spill] sm:$0xff] }
 0x31a   :  { %v4674_v24 = vmul.f32 -1.442695, %v2396_v62  ;;  %v1249_v60 = vadd.f32 %v6920_v61, %v1220_v41  ;;  %v6924_v41 = vld [vmem:[#allocation128_spill] sm:$0xff] }
 0x31b   :  { %v4976_v36 = vpop.eup %4975 }
 0x31c   :  { %v4978_v21 = vpop.eup %4977  ;;  %v2462_v51 = vadd.f32 1.0, %v4976_v36  ;;  %4979 = vpow2.f32 %v4674_v24  ;;  %v1336_v36 = vadd.f32 %v6923_v39, %v6922_v46 }
 0x31d   :  { %v2481_v57 = vadd.f32 1.0, %v4978_v21 }
 0x31e   :  { %4981 = vrcp.f32 %v2462_v51  ;;  %v1365_v48 = vadd.f32 %v6924_v41, %v1336_v36  ;;  %v2472_v18 = vand.u32 2147483647, %v2462_v51  ;;  %vm2468_vm3 = vweird.f32 %v2462_v51 }
 0x31f   :  { %4983 = vrcp.f32 %v2481_v57  ;;  %v2378_v5 = vpop.f32.mrf.mxu2  ;;  %v2391_v19 = vpop.f32.mrf.mxu3  ;;  %vm2487_vm2 = vweird.f32 %v2481_v57 }
 0x320   :  { %vm2473_vm5 = vcmp.eq.f32.partialorder %v2472_v18, 8.507059e+37 }
 0x322   :  { %v2412_v58 = vpop.f32.mrf.mxu0  ;;  %v2425_v62 = vpop.f32.mrf.mxu1 }
 0x323   :  { %v4980_v43 = vpop.eup %4979  ;;  %v2455_v15 = vadd.f32 %v2412_v58, %v1191_v14  ;;  %v2456_v54 = vadd.f32 %v2425_v62, %v1249_v60  ;;  %v2493_v14 = vand.u32 2147483648, %v2481_v57  ;;  %v2474_v60 = vand.u32 2147483648, %v2462_v51 }
 0x324   :  { %v6175_v24 = vadd.f32 1.0, %v4980_v43  ;;  %v4982_v21 = vpop.eup %4981 }
 0x325   :  { %v4675_v50 = vmul.f32 -1.442695, %v2455_v15  ;;  %v4676_v5 = vmul.f32 -1.442695, %v2456_v54  ;;  %v4984_v19 = vpop.eup %4983  ;;  %v2464_v32 = vmul.f32 %v4982_v21, %v2462_v51  ;;  %vm2469_vm0 = vweird.f32 %v4982_v21  ;;  %v6925_v51 = vld [vmem:[#allocation109_spill] sm:$0xff] }
 0x326   :  { %4985 = vrcp.f32 %v6175_v24  ;;  %v2483_v16 = vmul.f32 %v4984_v19, %v2481_v57  ;;  %v2491_v54 = vand.u32 2147483647, %v2481_v57  ;;  %vm2488_vm1 = vweird.f32 %v4984_v19  ;;  %vm2470_vm4 = vmor %vm2468_vm3, %vm2469_vm0 }
 0x327   :  { %4987 = vtanh.f32 %v2395_v40  ;;  %v2465_v61 = vsub.f32 1.0, %v2464_v32  ;;  %vm2489_vm6 = vmor %vm2487_vm2, %vm2488_vm1  ;;  %v2494_v55 = vor.u32 1.1754944e-38, %v2493_v14  ;;  %vm2507_vm9 = vweird.f32 %v6175_v24 }
 0x328   :  { %4989 = vpow2.f32 %v4675_v50  ;;  %v2484_v38 = vsub.f32 1.0, %v2483_v16  ;;  %v2475_v16 = vor.u32 1.1754944e-38, %v2474_v60  ;;  %vm2492_vm7 = vcmp.eq.f32.partialorder %v2491_v54, 8.507059e+37 }
 0x329   :  { %4991 = vpow2.f32 %v4676_v5  ;;  %v2438_v58 = vpop.f32.mrf.mxu2  ;;  %v2451_v62 = vpop.f32.mrf.mxu3  ;;  %v2466_v43 = vmul.f32 %v4982_v21, %v2465_v61 }
 0x32a   :  { %v2458_v15 = vadd.f32 %v2451_v62, %v1365_v48  ;;  %v2414_v39 = vpop.f32.mrf.mxu0  ;;  %v2427_v46 = vpop.f32.mrf.mxu1  ;;  %v2485_v20 = vmul.f32 %v4984_v19, %v2484_v38 }
 0x32b   :  { %v2467_v36 = vadd.f32 %v4982_v21, %v2466_v43 }
 0x32c   :  { %v4986_v40 = vpop.eup %4985  ;;  %v4677_v32 = vmul.f32 -1.442695, %v2458_v15  ;;  %v2486_v5 = vadd.f32 %v4984_v19, %v2485_v20  ;;  %v6926_v15 = vld [vmem:[#allocation124_spill] sm:$0xff] }
 0x32d   :  { %v4988_v50 = vpop.eup %4987  ;;  %v2503_v41 = vmul.f32 %v4986_v40, %v6175_v24  ;;  %v2471_v48 = vsel %vm2470_vm4, %v4982_v21, %v2467_v36  ;;  %v1278_v39 = vadd.f32 %v6926_v15, %v6925_v51  ;;  %v6927_v36 = vld [vmem:[#allocation125_spill] sm:$0xff]  ;;  %vm2508_vm8 = vweird.f32 %v4986_v40  ;;  %v6957_v51 = vld [vmem:[#allocation78_spill] sm:$0xff] }
 0x32e   :  { %v4990_v61 = vpop.eup %4989  ;;  %4993 = vpow2.f32 %v4677_v32  ;;  %v2476_v38 = vsel %vm2473_vm5, %v2475_v16, %v2471_v48  ;;  %v2490_v62 = vsel %vm2489_vm6, %v4984_v19, %v2486_v5  ;;  %vm2509_vm10 = vmor %vm2507_vm9, %vm2508_vm8 }
 0x32f   :  { %v4992_v46 = vpop.eup %4991  ;;  %v2504_v57 = vsub.f32 1.0, %v2503_v41  ;;  %v2525_v43 = vadd.f32 1.0, %v4990_v61  ;;  %v2495_v37 = vsel %vm2492_vm7, %v2494_v55, %v2490_v62  ;;  %v2518_v18 = vmul.f32 %v4988_v50, %v2476_v38 }
 0x330   :  { %v2544_v60 = vadd.f32 1.0, %v4992_v46  ;;  %v2517_v20 = vmul.f32 %v2495_v37, %v6081_v42  ;;  %v1307_v19 = vadd.f32 %v6927_v36, %v1278_v39  ;;  %v2513_v55 = vand.u32 2147483648, %v6175_v24  ;;  %v2586_v39 = vld [vmem:[#allocation3 + $0x20] sm:$0xff] }
 0x331   :  { %v2505_v28 = vmul.f32 %v4986_v40, %v2504_v57  ;;  %4995 = vrcp.f32 %v2525_v43  ;;  %v2440_v34 = vpop.f32.mrf.mxu2  ;;  %v2453_v14 = vpop.f32.mrf.mxu3  ;;  %v2511_v42 = vand.u32 2147483647, %v6175_v24  ;;  %v2537_v57 = vand.u32 2147483648, %v2525_v43 }
 0x332   :  { %4997 = vrcp.f32 %v2544_v60  ;;  %v6183_v21 = vadd.f32 %v2518_v18, %v2517_v20  ;;  %v2457_v34 = vadd.f32 %v2438_v58, %v1307_v19  ;;  %v2556_v62 = vand.u32 2147483648, %v2544_v60 }
 0x333   :  { %v2506_v32 = vadd.f32 %v4986_v40, %v2505_v28  ;;  %v2514_v28 = vor.u32 1.1754944e-38, %v2513_v55  ;;  %vm2512_vm11 = vcmp.eq.f32.partialorder %v2511_v42, 8.507059e+37  ;;  %v2535_v58 = vand.u32 2147483647, %v2525_v43 }
 0x334   :  { %v4994_v54 = vpop.eup %4993  ;;  %4999 = vtanh.f32 %v6183_v21  ;;  %vm2531_vm14 = vweird.f32 %v2525_v43  ;;  %vm2550_vm15 = vweird.f32 %v2544_v60 }
 0x335   :  { %v6188_v50 = vadd.f32 1.0, %v4994_v54  ;;  %v2510_v41 = vsel %vm2509_vm10, %v4986_v40, %v2506_v32  ;;  %v2554_v54 = vand.u32 2147483647, %v2544_v60  ;;  %v2538_v32 = vor.u32 1.1754944e-38, %v2537_v57 }
 0x336   :  { %v2515_v15 = vsel %vm2512_vm11, %v2514_v28, %v2510_v41  ;;  %vm2536_vm2 = vcmp.eq.f32.partialorder %v2535_v58, 8.507059e+37  ;;  %v2591_v58 = vld [vmem:[#allocation3 + $0x58] sm:$0xff] }
 0x337   :  { %v4996_v37 = vpop.eup %4995  ;;  %5001 = vrcp.f32 %v6188_v50  ;;  %vm2555_vm3 = vcmp.eq.f32.partialorder %v2554_v54, 8.507059e+37  ;;  %vm2570_vm5 = vweird.f32 %v6188_v50  ;;  %v6929_v54 = vld [vmem:[#allocation41_spill] sm:$0xff] }
 0x338   :  { %v4998_v16 = vpop.eup %4997  ;;  %v2527_v5 = vmul.f32 %v4996_v37, %v2525_v43  ;;  %5003 = vtanh.f32 %v2457_v34  ;;  %vm2532_vm12 = vweird.f32 %v4996_v37 }
 0x339   :  { %v2546_v61 = vmul.f32 %v4998_v16, %v2544_v60  ;;  %vm2551_vm13 = vweird.f32 %v4998_v16  ;;  %vm2533_vm0 = vmor %vm2531_vm14, %vm2532_vm12 }
 0x33a   :  { %v2528_v48 = vsub.f32 1.0, %v2527_v5  ;;  %v5000_v46 = vpop.eup %4999  ;;  %vm2552_vm1 = vmor %vm2550_vm15, %vm2551_vm13  ;;  %v2557_v5 = vor.u32 1.1754944e-38, %v2556_v62  ;;  %v2576_v62 = vand.u32 2147483648, %v6188_v50 }
 0x33b   :  { %v2547_v38 = vsub.f32 1.0, %v2546_v61  ;;  %v2521_v18 = vmul.f32 %v5000_v46, %v2515_v15 }
 0x33c   :  { %v2529_v24 = vmul.f32 %v4996_v37, %v2528_v48  ;;  %v2577_v15 = vor.u32 1.1754944e-38, %v2576_v62  ;;  %v6947_v62 = vld [vmem:[#allocation63_spill] sm:$0xff] }
 0x33d   :  { %v5002_v20 = vpop.eup %5001  ;;  %v2548_v14 = vmul.f32 %v4998_v16, %v2547_v38  ;;  %v2587_v19 = vadd.f32 %v2586_v39, %v2521_v18  ;;  %v2600_v42 = vpack.c.bf16 %v2521_v18, %v2521_v18 }
 0x33e   :  { %v2530_v40 = vadd.f32 %v4996_v37, %v2529_v24  ;;  %v2566_v36 = vmul.f32 %v5002_v20, %v6188_v50  ;;  %v5004_v34 = vpop.eup %5003  ;;  %vm2571_vm4 = vweird.f32 %v5002_v20 }
 0x33f   :  { %v2549_v55 = vadd.f32 %v4998_v16, %v2548_v14  ;;  %2589 = vst [vmem:[#allocation12 + $0x20] sm:$0xff] %v2587_v19  ;;  %2609 = vmatmul.bf16.vlgmr.msra.gmra.mxu0 %v2600_v42  ;;  %2622 = vmatmul.bf16.vlgmr.msra.gmra.mxu1 %v2600_v42  ;;  %vm2572_vm6 = vmor %vm2570_vm5, %vm2571_vm4  ;;  %v6928_v14 = vld [vmem:[#allocation40_spill] sm:$0xff] }
 0x340   :  { %v2534_v41 = vsel %vm2533_vm0, %v4996_v37, %v2530_v40  ;;  %v2567_v28 = vsub.f32 1.0, %v2566_v36  ;;  %2635 = vmatmul.bf16.vlgmr.msra.gmra.mxu2 %v2600_v42  ;;  %2648 = vmatmul.bf16.vlgmr.msra.gmra.mxu3 %v2600_v42  ;;  %v6930_v40 = vld [vmem:[#allocation42_spill] sm:$0xff]  ;;  %v6931_v36 = vld [vmem:[#allocation43_spill] sm:$0xff]  ;;  %v6932_v19 = vld [vmem:[#allocation44_spill] sm:$0xff] }
 0x341   :  { %v2539_v61 = vsel %vm2536_vm2, %v2538_v32, %v2534_v41  ;;  %v2553_v48 = vsel %vm2552_vm1, %v4998_v16, %v2549_v55  ;;  %2860 = vmatpush.bf16.msra.mxu0 %v5480_v47  ;;  %2873 = vmatpush.bf16.msra.mxu1 %v5482_v53  ;;  %v6933_v32 = vld [vmem:[#allocation45_spill] sm:$0xff]  ;;  %v6934_v55 = vld [vmem:[#allocation47_spill] sm:$0xff]  ;;  %v6935_v42 = vld [vmem:[#allocation48_spill] sm:$0xff] }
 0x342   :  { %v2558_v43 = vsel %vm2555_vm3, %v2557_v5, %v2553_v48  ;;  %v2581_v46 = vmul.f32 %v5004_v34, %v2539_v61  ;;  %v2568_v38 = vmul.f32 %v5002_v20, %v2567_v28  ;;  %2886 = vmatpush.bf16.msra.mxu2 %v5513_v27  ;;  %2899 = vmatpush.bf16.msra.mxu3 %v5492_v2  ;;  %v6936_v34 = vld [vmem:[#allocation50_spill] sm:$0xff]  ;;  %v6937_v5 = vld [vmem:[#allocation51_spill] sm:$0xff]  ;;  %v6938_v41 = vld [vmem:[#allocation52_spill] sm:$0xff] }
 0x343   :  { %v2580_v60 = vmul.f32 %v2558_v43, %v6097_v6  ;;  %v2574_v6 = vand.u32 2147483647, %v6188_v50  ;;  %v6939_v28 = vld [vmem:[#allocation53_spill] sm:$0xff]  ;;  %v6940_v61 = vld [vmem:[#allocation54_spill] sm:$0xff]  ;;  %v6941_v48 = vld [vmem:[#allocation56_spill] sm:$0xff] }
 0x344   :  { %v2569_v16 = vadd.f32 %v5002_v20, %v2568_v38  ;;  %v6942_v43 = vld [vmem:[#allocation57_spill] sm:$0xff]  ;;  %v6944_v38 = vld [vmem:[#allocation60_spill] sm:$0xff] }
 0x345   :  { %v6199_v37 = vadd.f32 %v2581_v46, %v2580_v60  ;;  %2861 = vmatpush.bf16.msra.mxu0 %v5494_v8  ;;  %2874 = vmatpush.bf16.msra.mxu1 %v5496_v9  ;;  %vm2575_vm7 = vcmp.eq.f32.partialorder %v2574_v6, 8.507059e+37  ;;  %v6943_v46 = vld [vmem:[#allocation59_spill] sm:$0xff]  ;;  %v6945_v60 = vld [vmem:[#allocation61_spill] sm:$0xff]  ;;  %v6948_v6 = vld [vmem:[#allocation66_spill] sm:$0xff] }
 0x346   :  { %2887 = vmatpush.bf16.msra.mxu2 %v5529_v0  ;;  %2900 = vmatpush.bf16.msra.mxu3 %v5510_v25  ;;  %v2573_v57 = vsel %vm2572_vm6, %v5002_v20, %v2569_v16  ;;  %v6946_v16 = vld [vmem:[#allocation62_spill] sm:$0xff] }
 0x347   :  { %5005 = vtanh.f32 %v6199_v37  ;;  %v2578_v24 = vsel %vm2575_vm7, %v2577_v15, %v2573_v57  ;;  %v6949_v57 = vld [vmem:[#allocation68_spill] sm:$0xff]  ;;  %v6950_v15 = vld [vmem:[#allocation69_spill] sm:$0xff] }
 0x349   :  { %2862 = vmatpush.bf16.msra.mxu0 %v5516_v31  ;;  %2875 = vmatpush.bf16.msra.mxu1 %v5519_v35 }
 0x34a   :  { %2888 = vmatpush.bf16.msra.mxu2 %v5544_v22  ;;  %2901 = vmatpush.bf16.msra.mxu3 %v5531_v3 }
 0x34d   :  { %v5006_v39 = vpop.eup %5005  ;;  %2863 = vmatpush.bf16.msra.mxu0 %v5537_v11  ;;  %2876 = vmatpush.bf16.msra.mxu1 %v5539_v12 }
 0x34e   :  { %v2584_v50 = vmul.f32 %v5006_v39, %v2578_v24  ;;  %2889 = vmatpush.bf16.msra.mxu2 %v5561_v52  ;;  %2902 = vmatpush.bf16.msra.mxu3 %v5554_v45  ;;  %v6951_v39 = vld [vmem:[#allocation70_spill] sm:$0xff]  ;;  %v6952_v24 = vld [vmem:[#allocation71_spill] sm:$0xff] }
 0x350   :  { %v2592_v18 = vadd.f32 %v2591_v58, %v2584_v50  ;;  %v2662_v20 = vpack.c.bf16 %v2584_v50, %v2584_v50  ;;  %v6953_v58 = vld [vmem:[#allocation72_spill] sm:$0xff]  ;;  %v6954_v50 = vld [vmem:[#allocation73_spill] sm:$0xff] }
 0x351   :  { %2864 = vmatpush.bf16.msra.mxu0 %v5565_v63  ;;  %2877 = vmatpush.bf16.msra.mxu1 %v5568_v10 }
 0x352   :  { %2594 = vst [vmem:[#allocation12 + $0x58] sm:$0xff] %v2592_v18  ;;  %2671 = vmatmul.bf16.vlgmr.msrb.gmra.mxu0 %v2662_v20  ;;  %2684 = vmatmul.bf16.vlgmr.msrb.gmra.mxu1 %v2662_v20  ;;  %v6955_v18 = vld [vmem:[#allocation75_spill] sm:$0xff] }
 0x353   :  { %2697 = vmatmul.bf16.vlgmr.msrb.gmra.mxu2 %v2662_v20  ;;  %2710 = vmatmul.bf16.vlgmr.msrb.gmra.mxu3 %v2662_v20  ;;  %v6956_v20 = vld [vmem:[#allocation77_spill] sm:$0xff] }
 0x354   :  { %2890 = vmatpush.bf16.msra.mxu2 %v5570_v13  ;;  %2903 = vmatpush.bf16.msra.mxu3 %v5574_v26 }
 0x355   :  { %2865 = vmatpush.bf16.msra.mxu0 %v5584_v56  ;;  %2878 = vmatpush.bf16.msra.mxu1 %v5586_v7 }
 0x358   :  { %2891 = vmatpush.bf16.msra.mxu2 %v5588_v44  ;;  %2904 = vmatpush.bf16.msra.mxu3 %v5591_v49 }
 0x359   :  { %2866 = vmatpush.bf16.msra.mxu0 %v5596_v33  ;;  %2879 = vmatpush.bf16.msra.mxu1 %v5599_v17 }
 0x35c   :  { %2892 = vmatpush.bf16.msra.mxu2 %v5601_v30  ;;  %2905 = vmatpush.bf16.msra.mxu3 %v5605_v23 }
 0x35d   :  { %2867 = vmatpush.bf16.msra.mxu0 %v5615_v59  ;;  %2880 = vmatpush.bf16.msra.mxu1 %v5619_v1 }
 0x360   :  { %2893 = vmatpush.bf16.msra.mxu2 %v5621_v4  ;;  %2906 = vmatpush.bf16.msra.mxu3 %v5625_v29 }
 0x361   :  { %2921 = vmatpush.bf16.msrb.mxu0 %v6928_v14  ;;  %2934 = vmatpush.bf16.msrb.mxu1 %v6929_v54 }
 0x364   :  { %2947 = vmatpush.bf16.msrb.mxu2 %v6930_v40  ;;  %2960 = vmatpush.bf16.msrb.mxu3 %v6931_v36 }
 0x365   :  { %2922 = vmatpush.bf16.msrb.mxu0 %v6932_v19  ;;  %2935 = vmatpush.bf16.msrb.mxu1 %v6933_v32 }
 0x368   :  { %2948 = vmatpush.bf16.msrb.mxu2 %v6934_v55  ;;  %2961 = vmatpush.bf16.msrb.mxu3 %v6935_v42 }
 0x369   :  { %2923 = vmatpush.bf16.msrb.mxu0 %v6936_v34  ;;  %2936 = vmatpush.bf16.msrb.mxu1 %v6937_v5 }
 0x36c   :  { %2949 = vmatpush.bf16.msrb.mxu2 %v6938_v41  ;;  %2962 = vmatpush.bf16.msrb.mxu3 %v6939_v28 }
 0x36d   :  { %2924 = vmatpush.bf16.msrb.mxu0 %v6940_v61  ;;  %2937 = vmatpush.bf16.msrb.mxu1 %v6941_v48 }
 0x370   :  { %2950 = vmatpush.bf16.msrb.mxu2 %v6942_v43  ;;  %2963 = vmatpush.bf16.msrb.mxu3 %v6943_v46  ;;  %v6962_v46 = vld [vmem:[#allocation55_spill] sm:$0xff] }
 0x371   :  { %2925 = vmatpush.bf16.msrb.mxu0 %v6944_v38  ;;  %2938 = vmatpush.bf16.msrb.mxu1 %v6945_v60  ;;  %v6961_v60 = vld [vmem:[#allocation24_spill] sm:$0xff] }
 0x374   :  { %2951 = vmatpush.bf16.msrb.mxu2 %v6946_v16  ;;  %2964 = vmatpush.bf16.msrb.mxu3 %v6947_v62  ;;  %v6958_v62 = vld [vmem:[#allocation79_spill] sm:$0xff] }
 0x375   :  { %2926 = vmatpush.bf16.msrb.mxu0 %v6948_v6  ;;  %2939 = vmatpush.bf16.msrb.mxu1 %v6949_v57  ;;  %v6959_v6 = vld [vmem:[#allocation81_spill] sm:$0xff]  ;;  %v6960_v16 = vld [vmem:[#allocation23_spill] sm:$0xff] }
 0x378   :  { %2952 = vmatpush.bf16.msrb.mxu2 %v6950_v15  ;;  %2965 = vmatpush.bf16.msrb.mxu3 %v6951_v39 }
 0x379   :  { %2927 = vmatpush.bf16.msrb.mxu0 %v6952_v24  ;;  %2940 = vmatpush.bf16.msrb.mxu1 %v6953_v58 }
 0x37c   :  { %2953 = vmatpush.bf16.msrb.mxu2 %v6954_v50  ;;  %2966 = vmatpush.bf16.msrb.mxu3 %v6955_v18 }
 0x37d   :  { %2928 = vmatpush.bf16.msrb.mxu0 %v6956_v20  ;;  %2941 = vmatpush.bf16.msrb.mxu1 %v6957_v51 }
 0x380   :  { %2954 = vmatpush.bf16.msrb.mxu2 %v6958_v62  ;;  %2967 = vmatpush.bf16.msrb.mxu3 %v6959_v6 }
 0x3bc   :  { %v2610_v57 = vpop.f32.mrf.mxu0  ;;  %v2623_v15 = vpop.f32.mrf.mxu1 }
 0x3bd   :  { %v2653_v39 = vadd.f32 %v2610_v57, %v6960_v16  ;;  %v2654_v24 = vadd.f32 %v2623_v15, %v6961_v60 }
 0x3bf   :  { %v4678_v38 = vmul.f32 -1.442695, %v2653_v39  ;;  %v4679_v58 = vmul.f32 -1.442695, %v2654_v24  ;;  %v6963_v39 = vld [vmem:[#allocation49_spill] sm:$0xff] }
 0x3c1   :  { %5007 = vpow2.f32 %v4678_v38 }
 0x3c2   :  { %5009 = vpow2.f32 %v4679_v58  ;;  %v6964_v58 = vld [vmem:[#allocation101_spill] sm:$0xff] }
 0x3c3   :  { %v2636_v50 = vpop.f32.mrf.mxu2  ;;  %v2649_v18 = vpop.f32.mrf.mxu3 }
 0x3c4   :  { %v2656_v20 = vadd.f32 %v2649_v18, %v6962_v46  ;;  %v2612_v43 = vpop.f32.mrf.mxu0  ;;  %v2625_v51 = vpop.f32.mrf.mxu1  ;;  %v2655_v24 = vadd.f32 %v2636_v50, %v6963_v39  ;;  %v6965_v46 = vld [vmem:[#allocation104_spill] sm:$0xff] }
 0x3c6   :  { %v4680_v48 = vmul.f32 -1.442695, %v2656_v20 }
 0x3c7   :  { %v5008_v62 = vpop.eup %5007 }
 0x3c8   :  { %v5010_v61 = vpop.eup %5009  ;;  %v2722_v6 = vadd.f32 1.0, %v5008_v62  ;;  %5011 = vpow2.f32 %v4680_v48 }
 0x3c9   :  { %v2741_v28 = vadd.f32 1.0, %v5010_v61 }
 0x3ca   :  { %5013 = vrcp.f32 %v2722_v6  ;;  %v2732_v5 = vand.u32 2147483647, %v2722_v6  ;;  %v2734_v39 = vand.u32 2147483648, %v2722_v6  ;;  %vm2728_vm11 = vweird.f32 %v2722_v6 }
 0x3cb   :  { %5015 = vrcp.f32 %v2741_v28  ;;  %v2638_v16 = vpop.f32.mrf.mxu2  ;;  %v2651_v60 = vpop.f32.mrf.mxu3  ;;  %v2753_v50 = vand.u32 2147483648, %v2741_v28  ;;  %vm2747_vm10 = vweird.f32 %v2741_v28 }
 0x3cc   :  { %vm2733_vm13 = vcmp.eq.f32.partialorder %v2732_v5, 8.507059e+37 }
 0x3cd   :  { %v2754_v36 = vor.u32 1.1754944e-38, %v2753_v50 }
 0x3ce   :  { %v5012_v38 = vpop.eup %5011 }
 0x3cf   :  { %v2672_v57 = vpop.f32.mrf.mxu0  ;;  %v2685_v15 = vpop.f32.mrf.mxu1  ;;  %v6271_v51 = vadd.f32 1.0, %v5012_v38 }
 0x3d0   :  { %v2715_v41 = vadd.f32 %v2672_v57, %v6964_v58  ;;  %v2716_v43 = vadd.f32 %v2685_v15, %v6965_v46  ;;  %v5014_v18 = vpop.eup %5013  ;;  %v2751_v58 = vand.u32 2147483647, %v2741_v28 }
 0x3d1   :  { %v5016_v48 = vpop.eup %5015  ;;  %v2724_v61 = vmul.f32 %v5014_v18, %v2722_v6  ;;  %5017 = vrcp.f32 %v6271_v51  ;;  %vm2729_vm8 = vweird.f32 %v5014_v18  ;;  %vm2767_vm1 = vweird.f32 %v6271_v51 }
 0x3d2   :  { %v4681_v20 = vmul.f32 -1.442695, %v2715_v41  ;;  %v4682_v62 = vmul.f32 -1.442695, %v2716_v43  ;;  %v2743_v16 = vmul.f32 %v5016_v48, %v2741_v28  ;;  %5019 = vtanh.f32 %v2655_v24  ;;  %v6966_v41 = vld [vmem:[#allocation126_spill] sm:$0xff]  ;;  %vm2730_vm12 = vmor %vm2728_vm11, %vm2729_vm8 }
 0x3d3   :  { %v2725_v60 = vsub.f32 1.0, %v2724_v61  ;;  %vm2748_vm9 = vweird.f32 %v5016_v48  ;;  %vm2752_vm15 = vcmp.eq.f32.partialorder %v2751_v58, 8.507059e+37 }
 0x3d4   :  { %5021 = vpow2.f32 %v4681_v20  ;;  %v2744_v34 = vsub.f32 1.0, %v2743_v16  ;;  %vm2749_vm14 = vmor %vm2747_vm10, %vm2748_vm9 }
 0x3d5   :  { %5023 = vpow2.f32 %v4682_v62  ;;  %v2726_v38 = vmul.f32 %v5014_v18, %v2725_v60  ;;  %v2735_v62 = vor.u32 1.1754944e-38, %v2734_v39 }
 0x3d6   :  { %v2698_v57 = vpop.f32.mrf.mxu2  ;;  %v2711_v15 = vpop.f32.mrf.mxu3  ;;  %v2745_v55 = vmul.f32 %v5016_v48, %v2744_v34 }
 0x3d7   :  { %v2718_v46 = vadd.f32 %v2711_v15, %v6966_v41  ;;  %v2674_v43 = vpop.f32.mrf.mxu0  ;;  %v2687_v42 = vpop.f32.mrf.mxu1  ;;  %v2727_v24 = vadd.f32 %v5014_v18, %v2726_v38 }
 0x3d8   :  { %v5018_v32 = vpop.eup %5017  ;;  %v2746_v16 = vadd.f32 %v5016_v48, %v2745_v55 }
 0x3d9   :  { %v4683_v20 = vmul.f32 -1.442695, %v2718_v46  ;;  %v5020_v61 = vpop.eup %5019  ;;  %v2763_v60 = vmul.f32 %v5018_v32, %v6271_v51  ;;  %v2731_v15 = vsel %vm2730_vm12, %v5014_v18, %v2727_v24  ;;  %vm2768_vm0 = vweird.f32 %v5018_v32 }
 0x3da   :  { %v5022_v19 = vpop.eup %5021  ;;  %v2736_v34 = vsel %vm2733_vm13, %v2735_v62, %v2731_v15  ;;  %v2750_v41 = vsel %vm2749_vm14, %v5016_v48, %v2746_v16  ;;  %v2773_v48 = vand.u32 2147483648, %v6271_v51  ;;  %vm2769_vm2 = vmor %vm2767_vm1, %vm2768_vm0 }
 0x3db   :  { %5025 = vpow2.f32 %v4683_v20  ;;  %v5024_v42 = vpop.eup %5023  ;;  %v2764_v28 = vsub.f32 1.0, %v2763_v60  ;;  %v2785_v38 = vadd.f32 1.0, %v5022_v19  ;;  %v2755_v6 = vsel %vm2752_vm15, %v2754_v36, %v2750_v41  ;;  %v6967_v36 = vld [vmem:[#allocation123_spill] sm:$0xff] }
 0x3dc   :  { %v2778_v46 = vmul.f32 %v5020_v61, %v2736_v34  ;;  %v2804_v43 = vadd.f32 1.0, %v5024_v42  ;;  %v2777_v5 = vmul.f32 %v2755_v6, %v6183_v21  ;;  %v2771_v21 = vand.u32 2147483647, %v6271_v51  ;;  %v2846_v51 = vld [vmem:[#allocation3 + $0x30] sm:$0xff] }
 0x3dd   :  { %v2765_v39 = vmul.f32 %v5018_v32, %v2764_v28  ;;  %5027 = vrcp.f32 %v2785_v38  ;;  %v2717_v58 = vadd.f32 %v2698_v57, %v6967_v36  ;;  %v2774_v62 = vor.u32 1.1754944e-38, %v2773_v48 }
 0x3de   :  { %v2700_v55 = vpop.f32.mrf.mxu2  ;;  %v2713_v40 = vpop.f32.mrf.mxu3  ;;  %5029 = vrcp.f32 %v2804_v43  ;;  %v6277_v54 = vadd.f32 %v2778_v46, %v2777_v5  ;;  %vm2772_vm3 = vcmp.eq.f32.partialorder %v2771_v21, 8.507059e+37  ;;  %v2816_v34 = vand.u32 2147483648, %v2804_v43 }
 0x3df   :  { %v2766_v50 = vadd.f32 %v5018_v32, %v2765_v39  ;;  %v2797_v41 = vand.u32 2147483648, %v2785_v38  ;;  %v2795_v57 = vand.u32 2147483647, %v2785_v38  ;;  %v2814_v55 = vand.u32 2147483647, %v2804_v43 }
 0x3e0   :  { %5031 = vtanh.f32 %v6277_v54  ;;  %vm2791_vm6 = vweird.f32 %v2785_v38  ;;  %vm2810_vm7 = vweird.f32 %v2804_v43 }
 0x3e1   :  { %v5026_v18 = vpop.eup %5025  ;;  %v2770_v61 = vsel %vm2769_vm2, %v5018_v32, %v2766_v50  ;;  %v2798_v48 = vor.u32 1.1754944e-38, %v2797_v41  ;;  %vm2796_vm10 = vcmp.eq.f32.partialorder %v2795_v57, 8.507059e+37  ;;  %vm2815_vm11 = vcmp.eq.f32.partialorder %v2814_v55, 8.507059e+37  ;;  %v2851_v57 = vld [vmem:[#allocation3 + $0x48] sm:$0xff]  ;;  %v6969_v55 = vld [vmem:[#allocation42_spill] sm:$0xff] }
 0x3e2   :  { %v6281_v19 = vadd.f32 1.0, %v5026_v18  ;;  %v2775_v28 = vsel %vm2772_vm3, %v2774_v62, %v2770_v61 }
 0x3e3   :  { %v5028_v24 = vpop.eup %5027 }
 0x3e4   :  { %5033 = vrcp.f32 %v6281_v19  ;;  %v5030_v40 = vpop.eup %5029  ;;  %v2787_v20 = vmul.f32 %v5028_v24, %v2785_v38  ;;  %vm2792_vm4 = vweird.f32 %v5028_v24  ;;  %vm2830_vm13 = vweird.f32 %v6281_v19 }
 0x3e5   :  { %v2806_v16 = vmul.f32 %v5030_v40, %v2804_v43  ;;  %5035 = vtanh.f32 %v2717_v58  ;;  %vm2811_vm5 = vweird.f32 %v5030_v40  ;;  %vm2793_vm8 = vmor %vm2791_vm6, %vm2792_vm4 }
 0x3e6   :  { %v2788_v60 = vsub.f32 1.0, %v2787_v20  ;;  %v5032_v15 = vpop.eup %5031  ;;  %vm2812_vm9 = vmor %vm2810_vm7, %vm2811_vm5  ;;  %v2817_v20 = vor.u32 1.1754944e-38, %v2816_v34  ;;  %v2836_v34 = vand.u32 2147483648, %v6281_v19 }
 0x3e7   :  { %v2807_v42 = vsub.f32 1.0, %v2806_v16  ;;  %v2781_v46 = vmul.f32 %v5032_v15, %v2775_v28 }
 0x3e8   :  { %v2789_v6 = vmul.f32 %v5028_v24, %v2788_v60  ;;  %v2837_v28 = vor.u32 1.1754944e-38, %v2836_v34  ;;  %v6987_v34 = vld [vmem:[#allocation66_spill] sm:$0xff] }
 0x3e9   :  { %v2808_v39 = vmul.f32 %v5030_v40, %v2807_v42  ;;  %v2847_v50 = vadd.f32 %v2846_v51, %v2781_v46  ;;  %v2859_v36 = vpack.c.bf16 %v2781_v46, %v2781_v46 }
 0x3ea   :  { %v5034_v5 = vpop.eup %5033  ;;  %v2790_v32 = vadd.f32 %v5028_v24, %v2789_v6 }
 0x3eb   :  { %v2826_v18 = vmul.f32 %v5034_v5, %v6281_v19  ;;  %v2809_v21 = vadd.f32 %v5030_v40, %v2808_v39  ;;  %v5036_v58 = vpop.eup %5035  ;;  %2849 = vst [vmem:[#allocation12 + $0x30] sm:$0xff] %v2847_v50  ;;  %2868 = vmatmul.bf16.vlgmr.msra.gmra.mxu0 %v2859_v36  ;;  %2881 = vmatmul.bf16.vlgmr.msra.gmra.mxu1 %v2859_v36  ;;  %vm2831_vm12 = vweird.f32 %v5034_v5  ;;  %v6968_v39 = vld [vmem:[#allocation41_spill] sm:$0xff] }
 0x3ec   :  { %v2794_v61 = vsel %vm2793_vm8, %v5028_v24, %v2790_v32  ;;  %2894 = vmatmul.bf16.vlgmr.msra.gmra.mxu2 %v2859_v36  ;;  %2907 = vmatmul.bf16.vlgmr.msra.gmra.mxu3 %v2859_v36  ;;  %vm2832_vm14 = vmor %vm2830_vm13, %vm2831_vm12  ;;  %v6970_v32 = vld [vmem:[#allocation43_spill] sm:$0xff]  ;;  %v6972_v50 = vld [vmem:[#allocation45_spill] sm:$0xff] }
 0x3ed   :  { %v2827_v62 = vsub.f32 1.0, %v2826_v18  ;;  %v2799_v16 = vsel %vm2796_vm10, %v2798_v48, %v2794_v61  ;;  %v2813_v60 = vsel %vm2812_vm9, %v5030_v40, %v2809_v21  ;;  %3114 = vmatpush.bf16.msra.mxu0 %v5480_v47  ;;  %3127 = vmatpush.bf16.msra.mxu1 %v5482_v53  ;;  %v6971_v18 = vld [vmem:[#allocation44_spill] sm:$0xff]  ;;  %v6973_v48 = vld [vmem:[#allocation47_spill] sm:$0xff]  ;;  %v6975_v36 = vld [vmem:[#allocation50_spill] sm:$0xff] }
 0x3ee   :  { %v2818_v38 = vsel %vm2815_vm11, %v2817_v20, %v2813_v60  ;;  %v2841_v15 = vmul.f32 %v5036_v58, %v2799_v16  ;;  %3140 = vmatpush.bf16.msra.mxu2 %v5513_v27  ;;  %3153 = vmatpush.bf16.msra.mxu3 %v5492_v2  ;;  %v6974_v21 = vld [vmem:[#allocation48_spill] sm:$0xff]  ;;  %v6976_v58 = vld [vmem:[#allocation51_spill] sm:$0xff]  ;;  %v6978_v61 = vld [vmem:[#allocation53_spill] sm:$0xff] }
 0x3ef   :  { %v2828_v42 = vmul.f32 %v5034_v5, %v2827_v62  ;;  %v2840_v43 = vmul.f32 %v2818_v38, %v6199_v37  ;;  %v2834_v37 = vand.u32 2147483647, %v6281_v19  ;;  %v6977_v20 = vld [vmem:[#allocation52_spill] sm:$0xff]  ;;  %v6979_v62 = vld [vmem:[#allocation54_spill] sm:$0xff]  ;;  %v6981_v60 = vld [vmem:[#allocation57_spill] sm:$0xff] }
 0x3f0   :  { %v6980_v16 = vld [vmem:[#allocation56_spill] sm:$0xff]  ;;  %v6982_v38 = vld [vmem:[#allocation59_spill] sm:$0xff] }
 0x3f1   :  { %v6293_v24 = vadd.f32 %v2841_v15, %v2840_v43  ;;  %v2829_v40 = vadd.f32 %v5034_v5, %v2828_v42  ;;  %3115 = vmatpush.bf16.msra.mxu0 %v5494_v8  ;;  %3128 = vmatpush.bf16.msra.mxu1 %v5496_v9  ;;  %vm2835_vm15 = vcmp.eq.f32.partialorder %v2834_v37, 8.507059e+37  ;;  %v6983_v15 = vld [vmem:[#allocation60_spill] sm:$0xff]  ;;  %v6984_v42 = vld [vmem:[#allocation61_spill] sm:$0xff]  ;;  %v6985_v43 = vld [vmem:[#allocation62_spill] sm:$0xff] }
 0x3f2   :  { %3141 = vmatpush.bf16.msra.mxu2 %v5529_v0  ;;  %3154 = vmatpush.bf16.msra.mxu3 %v5510_v25  ;;  %v6988_v37 = vld [vmem:[#allocation68_spill] sm:$0xff] }
 0x3f3   :  { %5037 = vtanh.f32 %v6293_v24  ;;  %v2833_v41 = vsel %vm2832_vm14, %v5034_v5, %v2829_v40  ;;  %v6986_v40 = vld [vmem:[#allocation63_spill] sm:$0xff] }
 0x3f4   :  { %v2838_v6 = vsel %vm2835_vm15, %v2837_v28, %v2833_v41  ;;  %v6989_v41 = vld [vmem:[#allocation69_spill] sm:$0xff]  ;;  %v6990_v28 = vld [vmem:[#allocation70_spill] sm:$0xff] }
 0x3f5   :  { %3116 = vmatpush.bf16.msra.mxu0 %v5516_v31  ;;  %3129 = vmatpush.bf16.msra.mxu1 %v5519_v35 }
 0x3f6   :  { %3142 = vmatpush.bf16.msra.mxu2 %v5544_v22  ;;  %3155 = vmatpush.bf16.msra.mxu3 %v5531_v3 }
 0x3f9   :  { %v5038_v51 = vpop.eup %5037  ;;  %3117 = vmatpush.bf16.msra.mxu0 %v5537_v11  ;;  %3130 = vmatpush.bf16.msra.mxu1 %v5539_v12 }
 0x3fa   :  { %v2844_v19 = vmul.f32 %v5038_v51, %v2838_v6  ;;  %3143 = vmatpush.bf16.msra.mxu2 %v5561_v52  ;;  %3156 = vmatpush.bf16.msra.mxu3 %v5554_v45  ;;  %v6991_v51 = vld [vmem:[#allocation71_spill] sm:$0xff]  ;;  %v6992_v6 = vld [vmem:[#allocation72_spill] sm:$0xff] }
 0x3fc   :  { %v2852_v46 = vadd.f32 %v2851_v57, %v2844_v19  ;;  %v2920_v5 = vpack.c.bf16 %v2844_v19, %v2844_v19  ;;  %v6993_v57 = vld [vmem:[#allocation73_spill] sm:$0xff]  ;;  %v6994_v19 = vld [vmem:[#allocation75_spill] sm:$0xff] }
 0x3fd   :  { %3118 = vmatpush.bf16.msra.mxu0 %v5565_v63  ;;  %3131 = vmatpush.bf16.msra.mxu1 %v5568_v10 }
 0x3fe   :  { %2854 = vst [vmem:[#allocation12 + $0x48] sm:$0xff] %v2852_v46  ;;  %2929 = vmatmul.bf16.vlgmr.msrb.gmra.mxu0 %v2920_v5  ;;  %2942 = vmatmul.bf16.vlgmr.msrb.gmra.mxu1 %v2920_v5  ;;  %v6995_v46 = vld [vmem:[#allocation77_spill] sm:$0xff] }
 0x3ff   :  { %2955 = vmatmul.bf16.vlgmr.msrb.gmra.mxu2 %v2920_v5  ;;  %2968 = vmatmul.bf16.vlgmr.msrb.gmra.mxu3 %v2920_v5  ;;  %v6996_v5 = vld [vmem:[#allocation78_spill] sm:$0xff] }
 0x400   :  { %3144 = vmatpush.bf16.msra.mxu2 %v5570_v13  ;;  %3157 = vmatpush.bf16.msra.mxu3 %v5574_v26 }
 0x401   :  { %3119 = vmatpush.bf16.msra.mxu0 %v5584_v56  ;;  %3132 = vmatpush.bf16.msra.mxu1 %v5586_v7 }
 0x404   :  { %3145 = vmatpush.bf16.msra.mxu2 %v5588_v44  ;;  %3158 = vmatpush.bf16.msra.mxu3 %v5591_v49 }
 0x405   :  { %3120 = vmatpush.bf16.msra.mxu0 %v5596_v33  ;;  %3133 = vmatpush.bf16.msra.mxu1 %v5599_v17 }
 0x408   :  { %3146 = vmatpush.bf16.msra.mxu2 %v5601_v30  ;;  %3159 = vmatpush.bf16.msra.mxu3 %v5605_v23 }
 0x409   :  { %3121 = vmatpush.bf16.msra.mxu0 %v5615_v59  ;;  %3134 = vmatpush.bf16.msra.mxu1 %v5619_v1 }
 0x40c   :  { %3147 = vmatpush.bf16.msra.mxu2 %v5621_v4  ;;  %3160 = vmatpush.bf16.msra.mxu3 %v5625_v29 }
 0x40d   :  { %3175 = vmatpush.bf16.msrb.mxu0 %v6928_v14  ;;  %3188 = vmatpush.bf16.msrb.mxu1 %v6968_v39 }
 0x410   :  { %3201 = vmatpush.bf16.msrb.mxu2 %v6969_v55  ;;  %3214 = vmatpush.bf16.msrb.mxu3 %v6970_v32 }
 0x411   :  { %3176 = vmatpush.bf16.msrb.mxu0 %v6971_v18  ;;  %3189 = vmatpush.bf16.msrb.mxu1 %v6972_v50 }
 0x414   :  { %3202 = vmatpush.bf16.msrb.mxu2 %v6973_v48  ;;  %3215 = vmatpush.bf16.msrb.mxu3 %v6974_v21  ;;  %v7009_v48 = vld [vmem:[#allocation111_spill] sm:$0xff] }
 0x415   :  { %3177 = vmatpush.bf16.msrb.mxu0 %v6975_v36  ;;  %3190 = vmatpush.bf16.msrb.mxu1 %v6976_v58  ;;  %v7004_v58 = vld [vmem:[#allocation89_spill] sm:$0xff]  ;;  %v7008_v36 = vld [vmem:[#allocation58_spill] sm:$0xff] }
 0x418   :  { %3203 = vmatpush.bf16.msrb.mxu2 %v6977_v20  ;;  %3216 = vmatpush.bf16.msrb.mxu3 %v6978_v61  ;;  %v7003_v61 = vld [vmem:[#allocation96_spill] sm:$0xff] }
 0x419   :  { %3178 = vmatpush.bf16.msrb.mxu0 %v6979_v62  ;;  %3191 = vmatpush.bf16.msrb.mxu1 %v6980_v16 }
 0x41c   :  { %3204 = vmatpush.bf16.msrb.mxu2 %v6981_v60  ;;  %3217 = vmatpush.bf16.msrb.mxu3 %v6982_v38  ;;  %v7001_v38 = vld [vmem:[#allocation67_spill] sm:$0xff] }
 0x41d   :  { %3179 = vmatpush.bf16.msrb.mxu0 %v6983_v15  ;;  %3192 = vmatpush.bf16.msrb.mxu1 %v6984_v42  ;;  %v7000_v42 = vld [vmem:[#allocation26_spill] sm:$0xff] }
 0x420   :  { %3205 = vmatpush.bf16.msrb.mxu2 %v6985_v43  ;;  %3218 = vmatpush.bf16.msrb.mxu3 %v6986_v40  ;;  %v6997_v40 = vld [vmem:[#allocation79_spill] sm:$0xff]  ;;  %v6999_v43 = vld [vmem:[#allocation25_spill] sm:$0xff] }
 0x421   :  { %3180 = vmatpush.bf16.msrb.mxu0 %v6987_v34  ;;  %3193 = vmatpush.bf16.msrb.mxu1 %v6988_v37  ;;  %v6998_v34 = vld [vmem:[#allocation81_spill] sm:$0xff] }
 0x424   :  { %3206 = vmatpush.bf16.msrb.mxu2 %v6989_v41  ;;  %3219 = vmatpush.bf16.msrb.mxu3 %v6990_v28 }
 0x425   :  { %3181 = vmatpush.bf16.msrb.mxu0 %v6991_v51  ;;  %3194 = vmatpush.bf16.msrb.mxu1 %v6992_v6 }
 0x428   :  { %3207 = vmatpush.bf16.msrb.mxu2 %v6993_v57  ;;  %3220 = vmatpush.bf16.msrb.mxu3 %v6994_v19 }
 0x429   :  { %3182 = vmatpush.bf16.msrb.mxu0 %v6995_v46  ;;  %3195 = vmatpush.bf16.msrb.mxu1 %v6996_v5 }
 0x42c   :  { %3208 = vmatpush.bf16.msrb.mxu2 %v6997_v40  ;;  %3221 = vmatpush.bf16.msrb.mxu3 %v6998_v34  ;;  %v7002_v34 = vld [vmem:[#allocation85_spill] sm:$0xff] }
 0x42d   :  { %v1157_v20 = vadd.f32 %v7003_v61, %v7002_v34 }
 0x468   :  { %v2869_v37 = vpop.f32.mrf.mxu0  ;;  %v2882_v41 = vpop.f32.mrf.mxu1 }
 0x469   :  { %v2912_v28 = vadd.f32 %v2869_v37, %v6999_v43  ;;  %v2913_v51 = vadd.f32 %v2882_v41, %v7000_v42  ;;  %v7005_v43 = vld [vmem:[#allocation99_spill] sm:$0xff] }
 0x46a   :  { %v1215_v37 = vadd.f32 %v7005_v43, %v7004_v58  ;;  %v7010_v43 = vld [vmem:[#allocation121_spill] sm:$0xff] }
 0x46b   :  { %v4684_v15 = vmul.f32 -1.442695, %v2912_v28  ;;  %v4685_v6 = vmul.f32 -1.442695, %v2913_v51  ;;  %v7006_v51 = vld [vmem:[#allocation97_spill] sm:$0xff] }
 0x46d   :  { %5039 = vpow2.f32 %v4684_v15 }
 0x46e   :  { %5041 = vpow2.f32 %v4685_v6 }
 0x46f   :  { %v2895_v57 = vpop.f32.mrf.mxu2  ;;  %v2908_v19 = vpop.f32.mrf.mxu3 }
 0x470   :  { %v2915_v46 = vadd.f32 %v2908_v19, %v7001_v38  ;;  %v2871_v60 = vpop.f32.mrf.mxu0  ;;  %v2884_v5 = vpop.f32.mrf.mxu1  ;;  %v1186_v38 = vadd.f32 %v7006_v51, %v1157_v20  ;;  %v2914_v21 = vadd.f32 %v2895_v57, %v7008_v36 }
 0x471   :  { %v7007_v60 = vld [vmem:[#allocation100_spill] sm:$0xff] }
 0x472   :  { %v4686_v16 = vmul.f32 -1.442695, %v2915_v46  ;;  %v1244_v6 = vadd.f32 %v7007_v60, %v1215_v37  ;;  %v7011_v37 = vld [vmem:[#allocation122_spill] sm:$0xff] }
 0x473   :  { %v5040_v40 = vpop.eup %5039 }
 0x474   :  { %v5042_v62 = vpop.eup %5041  ;;  %v2980_v42 = vadd.f32 1.0, %v5040_v40  ;;  %5043 = vpow2.f32 %v4686_v16  ;;  %v1331_v40 = vadd.f32 %v7010_v43, %v7009_v48 }
 0x475   :  { %v2999_v41 = vadd.f32 1.0, %v5042_v62 }
 0x476   :  { %5045 = vrcp.f32 %v2980_v42  ;;  %v1360_v51 = vadd.f32 %v7011_v37, %v1331_v40  ;;  %v2990_v36 = vand.u32 2147483647, %v2980_v42  ;;  %vm2986_vm3 = vweird.f32 %v2980_v42 }
 0x477   :  { %5047 = vrcp.f32 %v2999_v41  ;;  %v2897_v15 = vpop.f32.mrf.mxu2  ;;  %v2910_v28 = vpop.f32.mrf.mxu3  ;;  %vm3005_vm2 = vweird.f32 %v2999_v41 }
 0x478   :  { %vm2991_vm5 = vcmp.eq.f32.partialorder %v2990_v36, 8.507059e+37 }
 0x47a   :  { %v5044_v5 = vpop.eup %5043 }
 0x47b   :  { %v2930_v19 = vpop.f32.mrf.mxu0  ;;  %v2943_v46 = vpop.f32.mrf.mxu1  ;;  %v6371_v16 = vadd.f32 1.0, %v5044_v5 }
 0x47c   :  { %v2973_v61 = vadd.f32 %v2930_v19, %v1186_v38  ;;  %v2974_v34 = vadd.f32 %v2943_v46, %v1244_v6  ;;  %v5046_v62 = vpop.eup %5045  ;;  %v3011_v38 = vand.u32 2147483648, %v2999_v41  ;;  %v2992_v6 = vand.u32 2147483648, %v2980_v42 }
 0x47d   :  { %v5048_v28 = vpop.eup %5047  ;;  %v2982_v50 = vmul.f32 %v5046_v62, %v2980_v42  ;;  %5049 = vrcp.f32 %v6371_v16  ;;  %vm2987_vm0 = vweird.f32 %v5046_v62  ;;  %v7012_v42 = vld [vmem:[#allocation109_spill] sm:$0xff]  ;;  %vm3025_vm9 = vweird.f32 %v6371_v16 }
 0x47e   :  { %v4687_v58 = vmul.f32 -1.442695, %v2973_v61  ;;  %v4688_v15 = vmul.f32 -1.442695, %v2974_v34  ;;  %v3001_v20 = vmul.f32 %v5048_v28, %v2999_v41  ;;  %5051 = vtanh.f32 %v2914_v21  ;;  %vm2988_vm4 = vmor %vm2986_vm3, %vm2987_vm0 }
 0x47f   :  { %v2983_v60 = vsub.f32 1.0, %v2982_v50  ;;  %v3009_v34 = vand.u32 2147483647, %v2999_v41  ;;  %vm3006_vm1 = vweird.f32 %v5048_v28  ;;  %v3012_v32 = vor.u32 1.1754944e-38, %v3011_v38 }
 0x480   :  { %5053 = vpow2.f32 %v4687_v58  ;;  %v3002_v57 = vsub.f32 1.0, %v3001_v20  ;;  %v2993_v20 = vor.u32 1.1754944e-38, %v2992_v6  ;;  %vm3007_vm6 = vmor %vm3005_vm2, %vm3006_vm1 }
 0x481   :  { %5055 = vpow2.f32 %v4688_v15  ;;  %v2984_v5 = vmul.f32 %v5046_v62, %v2983_v60  ;;  %vm3010_vm7 = vcmp.eq.f32.partialorder %v3009_v34, 8.507059e+37 }
 0x482   :  { %v2956_v19 = vpop.f32.mrf.mxu2  ;;  %v2969_v46 = vpop.f32.mrf.mxu3  ;;  %v3003_v18 = vmul.f32 %v5048_v28, %v3002_v57 }
 0x483   :  { %v2976_v61 = vadd.f32 %v2969_v46, %v1360_v51  ;;  %v2932_v43 = vpop.f32.mrf.mxu0  ;;  %v2945_v48 = vpop.f32.mrf.mxu1  ;;  %v2985_v40 = vadd.f32 %v5046_v62, %v2984_v5 }
 0x484   :  { %v5050_v21 = vpop.eup %5049  ;;  %v3004_v15 = vadd.f32 %v5048_v28, %v3003_v18 }
 0x485   :  { %v4689_v50 = vmul.f32 -1.442695, %v2976_v61  ;;  %v5052_v58 = vpop.eup %5051  ;;  %v3021_v37 = vmul.f32 %v5050_v21, %v6371_v16  ;;  %v2989_v51 = vsel %vm2988_vm4, %v5046_v62, %v2985_v40  ;;  %v7013_v61 = vld [vmem:[#allocation118_spill] sm:$0xff]  ;;  %v7014_v40 = vld [vmem:[#allocation119_spill] sm:$0xff]  ;;  %vm3026_vm8 = vweird.f32 %v5050_v21 }
 0x486   :  { %v5054_v60 = vpop.eup %5053  ;;  %v2994_v57 = vsel %vm2991_vm5, %v2993_v20, %v2989_v51  ;;  %v3008_v46 = vsel %vm3007_vm6, %v5048_v28, %v3004_v15  ;;  %v1273_v43 = vadd.f32 %v7013_v61, %v7012_v42  ;;  %vm3027_vm10 = vmor %vm3025_vm9, %vm3026_vm8  ;;  %v7044_v42 = vld [vmem:[#allocation78_spill] sm:$0xff] }
 0x487   :  { %5057 = vpow2.f32 %v4689_v50  ;;  %v5056_v48 = vpop.eup %5055  ;;  %v3022_v41 = vsub.f32 1.0, %v3021_v37  ;;  %v3043_v5 = vadd.f32 1.0, %v5054_v60  ;;  %v3013_v55 = vsel %vm3010_vm7, %v3012_v32, %v3008_v46 }
 0x488   :  { %v3036_v36 = vmul.f32 %v5052_v58, %v2994_v57  ;;  %v3062_v6 = vadd.f32 1.0, %v5056_v48  ;;  %v3035_v18 = vmul.f32 %v3013_v55, %v6277_v54  ;;  %v1302_v28 = vadd.f32 %v7014_v40, %v1273_v43  ;;  %v3103_v43 = vld [vmem:[#allocation3 + $0x40] sm:$0xff] }
 0x489   :  { %v3023_v39 = vmul.f32 %v5050_v21, %v3022_v41  ;;  %5059 = vrcp.f32 %v3043_v5  ;;  %v3031_v32 = vand.u32 2147483648, %v6371_v16  ;;  %v3029_v54 = vand.u32 2147483647, %v6371_v16 }
 0x48a   :  { %v2958_v14 = vpop.f32.mrf.mxu2  ;;  %v2971_v38 = vpop.f32.mrf.mxu3  ;;  %5061 = vrcp.f32 %v3062_v6  ;;  %v6379_v62 = vadd.f32 %v3036_v36, %v3035_v18  ;;  %v3074_v46 = vand.u32 2147483648, %v3062_v6  ;;  %v3055_v41 = vand.u32 2147483648, %v3043_v5 }
 0x48b   :  { %v3024_v50 = vadd.f32 %v5050_v21, %v3023_v39  ;;  %v2975_v14 = vadd.f32 %v2956_v19, %v1302_v28  ;;  %v3032_v39 = vor.u32 1.1754944e-38, %v3031_v32  ;;  %vm3030_vm11 = vcmp.eq.f32.partialorder %v3029_v54, 8.507059e+37 }
 0x48c   :  { %5063 = vtanh.f32 %v6379_v62  ;;  %v3053_v19 = vand.u32 2147483647, %v3043_v5  ;;  %vm3049_vm14 = vweird.f32 %v3043_v5  ;;  %vm3068_vm15 = vweird.f32 %v3062_v6 }
 0x48d   :  { %v5058_v34 = vpop.eup %5057  ;;  %v3028_v37 = vsel %vm3027_vm10, %v5050_v21, %v3024_v50  ;;  %v3056_v50 = vor.u32 1.1754944e-38, %v3055_v41 }
 0x48e   :  { %v6384_v58 = vadd.f32 1.0, %v5058_v34  ;;  %v3033_v61 = vsel %vm3030_vm11, %v3032_v39, %v3028_v37  ;;  %v3072_v34 = vand.u32 2147483647, %v3062_v6  ;;  %vm3054_vm2 = vcmp.eq.f32.partialorder %v3053_v19, 8.507059e+37  ;;  %v3106_v19 = vld [vmem:[#allocation3 + $0x38] sm:$0xff] }
 0x48f   :  { %v5060_v55 = vpop.eup %5059 }
 0x490   :  { %5065 = vrcp.f32 %v6384_v58  ;;  %v5062_v20 = vpop.eup %5061  ;;  %v3045_v15 = vmul.f32 %v5060_v55, %v3043_v5  ;;  %vm3050_vm12 = vweird.f32 %v5060_v55  ;;  %vm3073_vm3 = vcmp.eq.f32.partialorder %v3072_v34, 8.507059e+37  ;;  %v7016_v34 = vld [vmem:[#allocation41_spill] sm:$0xff] }
 0x491   :  { %v3064_v60 = vmul.f32 %v5062_v20, %v3062_v6  ;;  %5067 = vtanh.f32 %v2975_v14  ;;  %vm3069_vm13 = vweird.f32 %v5062_v20  ;;  %vm3051_vm0 = vmor %vm3049_vm14, %vm3050_vm12  ;;  %vm3088_vm5 = vweird.f32 %v6384_v58 }
 0x492   :  { %v3046_v51 = vsub.f32 1.0, %v3045_v15  ;;  %v5064_v48 = vpop.eup %5063  ;;  %vm3070_vm1 = vmor %vm3068_vm15, %vm3069_vm13  ;;  %v3075_v15 = vor.u32 1.1754944e-38, %v3074_v46  ;;  %v3094_v46 = vand.u32 2147483648, %v6384_v58 }
 0x493   :  { %v3065_v57 = vsub.f32 1.0, %v3064_v60  ;;  %v3039_v36 = vmul.f32 %v5064_v48, %v3033_v61 }
 0x494   :  { %v3047_v16 = vmul.f32 %v5060_v55, %v3046_v51  ;;  %v3095_v61 = vor.u32 1.1754944e-38, %v3094_v46  ;;  %v7034_v46 = vld [vmem:[#allocation63_spill] sm:$0xff] }
 0x495   :  { %v3066_v38 = vmul.f32 %v5062_v20, %v3065_v57  ;;  %v3104_v28 = vadd.f32 %v3103_v43, %v3039_v36  ;;  %v3113_v54 = vpack.c.bf16 %v3039_v36, %v3039_v36 }
 0x496   :  { %v5066_v18 = vpop.eup %5065  ;;  %v3048_v21 = vadd.f32 %v5060_v55, %v3047_v16 }
 0x497   :  { %v3084_v40 = vmul.f32 %v5066_v18, %v6384_v58  ;;  %v3067_v32 = vadd.f32 %v5062_v20, %v3066_v38  ;;  %v5068_v14 = vpop.eup %5067  ;;  %3105 = vst [vmem:[#allocation12 + $0x40] sm:$0xff] %v3104_v28  ;;  %3122 = vmatmul.bf16.vlgmr.msra.gmra.mxu0 %v3113_v54  ;;  %3135 = vmatmul.bf16.vlgmr.msra.gmra.mxu1 %v3113_v54  ;;  %vm3089_vm4 = vweird.f32 %v5066_v18  ;;  %v7015_v38 = vld [vmem:[#allocation40_spill] sm:$0xff] }
 0x498   :  { %v3052_v37 = vsel %vm3051_vm0, %v5060_v55, %v3048_v21  ;;  %3148 = vmatmul.bf16.vlgmr.msra.gmra.mxu2 %v3113_v54  ;;  %3161 = vmatmul.bf16.vlgmr.msra.gmra.mxu3 %v3113_v54  ;;  %vm3090_vm6 = vmor %vm3088_vm5, %vm3089_vm4  ;;  %v7017_v21 = vld [vmem:[#allocation42_spill] sm:$0xff]  ;;  %v7019_v28 = vld [vmem:[#allocation44_spill] sm:$0xff] }
 0x499   :  { %v3085_v39 = vsub.f32 1.0, %v3084_v40  ;;  %v3057_v60 = vsel %vm3054_vm2, %v3056_v50, %v3052_v37  ;;  %v3071_v51 = vsel %vm3070_vm1, %v5062_v20, %v3067_v32  ;;  %3368 = vmatpush.bf16.msra.mxu0 %v5480_v47  ;;  %3381 = vmatpush.bf16.msra.mxu1 %v5482_v53  ;;  %v7018_v40 = vld [vmem:[#allocation43_spill] sm:$0xff]  ;;  %v7020_v50 = vld [vmem:[#allocation45_spill] sm:$0xff]  ;;  %v7022_v54 = vld [vmem:[#allocation48_spill] sm:$0xff] }
 0x49a   :  { %v3076_v5 = vsel %vm3073_vm3, %v3075_v15, %v3071_v51  ;;  %v3099_v48 = vmul.f32 %v5068_v14, %v3057_v60  ;;  %3394 = vmatpush.bf16.msra.mxu2 %v5513_v27  ;;  %3407 = vmatpush.bf16.msra.mxu3 %v5492_v2  ;;  %v7021_v32 = vld [vmem:[#allocation47_spill] sm:$0xff]  ;;  %v7023_v14 = vld [vmem:[#allocation50_spill] sm:$0xff]  ;;  %v7025_v37 = vld [vmem:[#allocation52_spill] sm:$0xff] }
 0x49b   :  { %v3086_v57 = vmul.f32 %v5066_v18, %v3085_v39  ;;  %v3098_v6 = vmul.f32 %v3076_v5, %v6293_v24  ;;  %v3092_v24 = vand.u32 2147483647, %v6384_v58  ;;  %v7024_v15 = vld [vmem:[#allocation51_spill] sm:$0xff]  ;;  %v7026_v39 = vld [vmem:[#allocation53_spill] sm:$0xff]  ;;  %v7027_v60 = vld [vmem:[#allocation54_spill] sm:$0xff] }
 0x49c   :  { %v7028_v51 = vld [vmem:[#allocation56_spill] sm:$0xff]  ;;  %v7029_v5 = vld [vmem:[#allocation57_spill] sm:$0xff] }
 0x49d   :  { %v6395_v55 = vadd.f32 %v3099_v48, %v3098_v6  ;;  %v3087_v20 = vadd.f32 %v5066_v18, %v3086_v57  ;;  %3369 = vmatpush.bf16.msra.mxu0 %v5494_v8  ;;  %3382 = vmatpush.bf16.msra.mxu1 %v5496_v9  ;;  %vm3093_vm7 = vcmp.eq.f32.partialorder %v3092_v24, 8.507059e+37  ;;  %v7030_v48 = vld [vmem:[#allocation59_spill] sm:$0xff]  ;;  %v7031_v57 = vld [vmem:[#allocation60_spill] sm:$0xff]  ;;  %v7032_v6 = vld [vmem:[#allocation61_spill] sm:$0xff] }
 0x49e   :  { %3395 = vmatpush.bf16.msra.mxu2 %v5529_v0  ;;  %3408 = vmatpush.bf16.msra.mxu3 %v5510_v25  ;;  %v7035_v24 = vld [vmem:[#allocation66_spill] sm:$0xff] }
 0x49f   :  { %5069 = vtanh.f32 %v6395_v55  ;;  %v3091_v41 = vsel %vm3090_vm6, %v5066_v18, %v3087_v20  ;;  %v7033_v20 = vld [vmem:[#allocation62_spill] sm:$0xff] }
 0x4a0   :  { %v3096_v16 = vsel %vm3093_vm7, %v3095_v61, %v3091_v41  ;;  %v7036_v41 = vld [vmem:[#allocation68_spill] sm:$0xff]  ;;  %v7037_v61 = vld [vmem:[#allocation69_spill] sm:$0xff] }
 0x4a1   :  { %3370 = vmatpush.bf16.msra.mxu0 %v5516_v31  ;;  %3383 = vmatpush.bf16.msra.mxu1 %v5519_v35 }
 0x4a2   :  { %3396 = vmatpush.bf16.msra.mxu2 %v5544_v22  ;;  %3409 = vmatpush.bf16.msra.mxu3 %v5531_v3 }
 0x4a5   :  { %v5070_v43 = vpop.eup %5069  ;;  %3371 = vmatpush.bf16.msra.mxu0 %v5537_v11  ;;  %3384 = vmatpush.bf16.msra.mxu1 %v5539_v12 }
 0x4a6   :  { %v3102_v58 = vmul.f32 %v5070_v43, %v3096_v16  ;;  %3397 = vmatpush.bf16.msra.mxu2 %v5561_v52  ;;  %3410 = vmatpush.bf16.msra.mxu3 %v5554_v45  ;;  %v7038_v43 = vld [vmem:[#allocation70_spill] sm:$0xff]  ;;  %v7039_v16 = vld [vmem:[#allocation71_spill] sm:$0xff] }
 0x4a8   :  { %v3107_v36 = vadd.f32 %v3106_v19, %v3102_v58  ;;  %v3174_v18 = vpack.c.bf16 %v3102_v58, %v3102_v58  ;;  %v7040_v19 = vld [vmem:[#allocation72_spill] sm:$0xff]  ;;  %v7041_v58 = vld [vmem:[#allocation73_spill] sm:$0xff] }
 0x4a9   :  { %3372 = vmatpush.bf16.msra.mxu0 %v5565_v63  ;;  %3385 = vmatpush.bf16.msra.mxu1 %v5568_v10 }
 0x4aa   :  { %3108 = vst [vmem:[#allocation12 + $0x38] sm:$0xff] %v3107_v36  ;;  %3183 = vmatmul.bf16.vlgmr.msrb.gmra.mxu0 %v3174_v18  ;;  %3196 = vmatmul.bf16.vlgmr.msrb.gmra.mxu1 %v3174_v18  ;;  %v7042_v36 = vld [vmem:[#allocation75_spill] sm:$0xff] }
 0x4ab   :  { %3209 = vmatmul.bf16.vlgmr.msrb.gmra.mxu2 %v3174_v18  ;;  %3222 = vmatmul.bf16.vlgmr.msrb.gmra.mxu3 %v3174_v18  ;;  %v7043_v18 = vld [vmem:[#allocation77_spill] sm:$0xff] }
 0x4ac   :  { %3398 = vmatpush.bf16.msra.mxu2 %v5570_v13  ;;  %3411 = vmatpush.bf16.msra.mxu3 %v5574_v26 }
 0x4ad   :  { %3373 = vmatpush.bf16.msra.mxu0 %v5584_v56  ;;  %3386 = vmatpush.bf16.msra.mxu1 %v5586_v7 }
 0x4b0   :  { %3399 = vmatpush.bf16.msra.mxu2 %v5588_v44  ;;  %3412 = vmatpush.bf16.msra.mxu3 %v5591_v49 }
 0x4b1   :  { %3374 = vmatpush.bf16.msra.mxu0 %v5596_v33  ;;  %3387 = vmatpush.bf16.msra.mxu1 %v5599_v17 }
 0x4b4   :  { %3400 = vmatpush.bf16.msra.mxu2 %v5601_v30  ;;  %3413 = vmatpush.bf16.msra.mxu3 %v5605_v23 }
 0x4b5   :  { %3375 = vmatpush.bf16.msra.mxu0 %v5615_v59  ;;  %3388 = vmatpush.bf16.msra.mxu1 %v5619_v1 }
 0x4b8   :  { %3401 = vmatpush.bf16.msra.mxu2 %v5621_v4  ;;  %3414 = vmatpush.bf16.msra.mxu3 %v5625_v29 }
 0x4b9   :  { %3429 = vmatpush.bf16.msrb.mxu0 %v7015_v38  ;;  %3442 = vmatpush.bf16.msrb.mxu1 %v7016_v34 }
 0x4bc   :  { %3455 = vmatpush.bf16.msrb.mxu2 %v7017_v21  ;;  %3468 = vmatpush.bf16.msrb.mxu3 %v7018_v40 }
 0x4bd   :  { %3430 = vmatpush.bf16.msrb.mxu0 %v7019_v28  ;;  %3443 = vmatpush.bf16.msrb.mxu1 %v7020_v50 }
 0x4c0   :  { %3456 = vmatpush.bf16.msrb.mxu2 %v7021_v32  ;;  %3469 = vmatpush.bf16.msrb.mxu3 %v7022_v54 }
 0x4c1   :  { %3431 = vmatpush.bf16.msrb.mxu0 %v7023_v14  ;;  %3444 = vmatpush.bf16.msrb.mxu1 %v7024_v15 }
 0x4c4   :  { %3457 = vmatpush.bf16.msrb.mxu2 %v7025_v37  ;;  %3470 = vmatpush.bf16.msrb.mxu3 %v7026_v39 }
 0x4c5   :  { %3432 = vmatpush.bf16.msrb.mxu0 %v7027_v60  ;;  %3445 = vmatpush.bf16.msrb.mxu1 %v7028_v51 }
 0x4c8   :  { %3458 = vmatpush.bf16.msrb.mxu2 %v7029_v5  ;;  %3471 = vmatpush.bf16.msrb.mxu3 %v7030_v48 }
 0x4c9   :  { %3433 = vmatpush.bf16.msrb.mxu0 %v7031_v57  ;;  %3446 = vmatpush.bf16.msrb.mxu1 %v7032_v6  ;;  %v7048_v6 = vld [vmem:[#allocation28_spill] sm:$0xff]  ;;  %v7049_v57 = vld [vmem:[#allocation35_spill] sm:$0xff] }
 0x4cc   :  { %3459 = vmatpush.bf16.msrb.mxu2 %v7033_v20  ;;  %3472 = vmatpush.bf16.msrb.mxu3 %v7034_v46  ;;  %v7045_v46 = vld [vmem:[#allocation79_spill] sm:$0xff] }
 0x4cd   :  { %3434 = vmatpush.bf16.msrb.mxu0 %v7035_v24  ;;  %3447 = vmatpush.bf16.msrb.mxu1 %v7036_v41  ;;  %v7046_v24 = vld [vmem:[#allocation81_spill] sm:$0xff]  ;;  %v7047_v20 = vld [vmem:[#allocation27_spill] sm:$0xff] }
 0x4d0   :  { %3460 = vmatpush.bf16.msrb.mxu2 %v7037_v61  ;;  %3473 = vmatpush.bf16.msrb.mxu3 %v7038_v43 }
 0x4d1   :  { %3435 = vmatpush.bf16.msrb.mxu0 %v7039_v16  ;;  %3448 = vmatpush.bf16.msrb.mxu1 %v7040_v19  ;;  %v7050_v19 = vld [vmem:[#allocation74_spill] sm:$0xff] }
 0x4d2   :  { %v1104_v48 = vadd.f32 %v7050_v19, %v7049_v57 }
 0x4d4   :  { %3461 = vmatpush.bf16.msrb.mxu2 %v7041_v58  ;;  %3474 = vmatpush.bf16.msrb.mxu3 %v7042_v36  ;;  %v7051_v36 = vld [vmem:[#allocation76_spill] sm:$0xff] }
 0x4d5   :  { %3436 = vmatpush.bf16.msrb.mxu0 %v7043_v18  ;;  %3449 = vmatpush.bf16.msrb.mxu1 %v7044_v42  ;;  %v1133_v18 = vadd.f32 %v7051_v36, %v1104_v48  ;;  %v7054_v48 = vld [vmem:[#allocation65_spill] sm:$0xff] }
 0x4d8   :  { %3462 = vmatpush.bf16.msrb.mxu2 %v7045_v46  ;;  %3475 = vmatpush.bf16.msrb.mxu3 %v7046_v24 }
 0x514   :  { %v3123_v41 = vpop.f32.mrf.mxu0  ;;  %v3136_v61 = vpop.f32.mrf.mxu1 }
 0x515   :  { %v3166_v43 = vadd.f32 %v3123_v41, %v7047_v20  ;;  %v3167_v16 = vadd.f32 %v3136_v61, %v7048_v6  ;;  %v7052_v20 = vld [vmem:[#allocation32_spill] sm:$0xff] }
 0x516   :  { %v7053_v41 = vld [vmem:[#allocation64_spill] sm:$0xff] }
 0x517   :  { %v4690_v58 = vmul.f32 -1.442695, %v3166_v43  ;;  %v4691_v5 = vmul.f32 -1.442695, %v3167_v16  ;;  %v1046_v6 = vadd.f32 %v7053_v41, %v7052_v20 }
 0x519   :  { %5071 = vpow2.f32 %v4690_v58 }
 0x51a   :  { %5073 = vpow2.f32 %v4691_v5  ;;  %v1075_v5 = vadd.f32 %v7054_v48, %v1046_v6 }
 0x51b   :  { %v3149_v42 = vpop.f32.mrf.mxu2  ;;  %v3162_v51 = vpop.f32.mrf.mxu3 }
 0x51c   :  { %v3169_v46 = vadd.f32 %v3162_v51, %v1133_v18  ;;  %v3125_v60 = vpop.f32.mrf.mxu0  ;;  %v3138_v24 = vpop.f32.mrf.mxu1  ;;  %v7056_v18 = vld [vmem:[#allocation98_spill] sm:$0xff] }
 0x51d   :  { %v3168_v60 = vadd.f32 %v3149_v42, %v1075_v5  ;;  %v7055_v24 = vld [vmem:[#allocation95_spill] sm:$0xff] }
 0x51e   :  { %v4692_v39 = vmul.f32 -1.442695, %v3169_v46 }
 0x51f   :  { %v5072_v37 = vpop.eup %5071 }
 0x520   :  { %v5074_v15 = vpop.eup %5073  ;;  %v3234_v61 = vadd.f32 1.0, %v5072_v37  ;;  %5075 = vpow2.f32 %v4692_v39 }
 0x521   :  { %v3253_v19 = vadd.f32 1.0, %v5074_v15 }
 0x522   :  { %5077 = vrcp.f32 %v3234_v61  ;;  %v3246_v5 = vand.u32 2147483648, %v3234_v61  ;;  %vm3240_vm11 = vweird.f32 %v3234_v61 }
 0x523   :  { %5079 = vrcp.f32 %v3253_v19  ;;  %v3151_v43 = vpop.f32.mrf.mxu2  ;;  %v3164_v16 = vpop.f32.mrf.mxu3  ;;  %v3265_v42 = vand.u32 2147483648, %v3253_v19  ;;  %vm3259_vm10 = vweird.f32 %v3253_v19 }
 0x524   :  { %v3244_v16 = vand.u32 2147483647, %v3234_v61 }
 0x525   :  { %v3266_v40 = vor.u32 1.1754944e-38, %v3265_v42 }
 0x526   :  { %v5076_v51 = vpop.eup %5075  ;;  %vm3245_vm13 = vcmp.eq.f32.partialorder %v3244_v16, 8.507059e+37 }
 0x527   :  { %v3184_v58 = vpop.f32.mrf.mxu0  ;;  %v3197_v36 = vpop.f32.mrf.mxu1  ;;  %v6471_v14 = vadd.f32 1.0, %v5076_v51 }
 0x528   :  { %v3227_v46 = vadd.f32 %v3184_v58, %v7055_v24  ;;  %v3228_v57 = vadd.f32 %v3197_v36, %v7056_v18  ;;  %v5078_v41 = vpop.eup %5077  ;;  %v3263_v24 = vand.u32 2147483647, %v3253_v19 }
 0x529   :  { %v5080_v15 = vpop.eup %5079  ;;  %v3236_v20 = vmul.f32 %v5078_v41, %v3234_v61  ;;  %5081 = vrcp.f32 %v6471_v14  ;;  %vm3241_vm8 = vweird.f32 %v5078_v41  ;;  %vm3279_vm1 = vweird.f32 %v6471_v14 }
 0x52a   :  { %v4693_v37 = vmul.f32 -1.442695, %v3227_v46  ;;  %v4694_v39 = vmul.f32 -1.442695, %v3228_v57  ;;  %v3255_v43 = vmul.f32 %v5080_v15, %v3253_v19  ;;  %5083 = vtanh.f32 %v3168_v60  ;;  %v7057_v46 = vld [vmem:[#allocation120_spill] sm:$0xff]  ;;  %vm3242_vm12 = vmor %vm3240_vm11, %vm3241_vm8 }
 0x52b   :  { %v3237_v6 = vsub.f32 1.0, %v3236_v20  ;;  %vm3260_vm9 = vweird.f32 %v5080_v15  ;;  %vm3264_vm15 = vcmp.eq.f32.partialorder %v3263_v24, 8.507059e+37 }
 0x52c   :  { %5085 = vpow2.f32 %v4693_v37  ;;  %v3256_v48 = vsub.f32 1.0, %v3255_v43  ;;  %vm3261_vm14 = vmor %vm3259_vm10, %vm3260_vm9 }
 0x52d   :  { %5087 = vpow2.f32 %v4694_v39  ;;  %v3238_v51 = vmul.f32 %v5078_v41, %v3237_v6  ;;  %v3247_v39 = vor.u32 1.1754944e-38, %v3246_v5 }
 0x52e   :  { %v3210_v58 = vpop.f32.mrf.mxu2  ;;  %v3223_v36 = vpop.f32.mrf.mxu3  ;;  %v3257_v32 = vmul.f32 %v5080_v15, %v3256_v48 }
 0x52f   :  { %v3230_v57 = vadd.f32 %v3223_v36, %v7057_v46  ;;  %v3186_v18 = vpop.f32.mrf.mxu0  ;;  %v3199_v54 = vpop.f32.mrf.mxu1  ;;  %v3239_v20 = vadd.f32 %v5078_v41, %v3238_v51 }
 0x530   :  { %v5082_v50 = vpop.eup %5081  ;;  %v3258_v43 = vadd.f32 %v5080_v15, %v3257_v32 }
 0x531   :  { %v4695_v60 = vmul.f32 -1.442695, %v3230_v57  ;;  %v5084_v37 = vpop.eup %5083  ;;  %v3275_v6 = vmul.f32 %v5082_v50, %v6471_v14  ;;  %v3243_v36 = vsel %vm3242_vm12, %v5078_v41, %v3239_v20  ;;  %vm3280_vm0 = vweird.f32 %v5082_v50 }
 0x532   :  { %v5086_v28 = vpop.eup %5085  ;;  %v3248_v48 = vsel %vm3245_vm13, %v3247_v39, %v3243_v36  ;;  %v3262_v46 = vsel %vm3261_vm14, %v5080_v15, %v3258_v43  ;;  %v3285_v15 = vand.u32 2147483648, %v6471_v14  ;;  %vm3281_vm2 = vmor %vm3279_vm1, %vm3280_vm0 }
 0x533   :  { %5089 = vpow2.f32 %v4695_v60  ;;  %v5088_v54 = vpop.eup %5087  ;;  %v3276_v19 = vsub.f32 1.0, %v3275_v6  ;;  %v3297_v51 = vadd.f32 1.0, %v5086_v28  ;;  %v3267_v61 = vsel %vm3264_vm15, %v3266_v40, %v3262_v46  ;;  %v7058_v40 = vld [vmem:[#allocation117_spill] sm:$0xff] }
 0x534   :  { %v3290_v57 = vmul.f32 %v5084_v37, %v3248_v48  ;;  %v3316_v18 = vadd.f32 1.0, %v5088_v54  ;;  %v3289_v16 = vmul.f32 %v3267_v61, %v6379_v62  ;;  %v3283_v62 = vand.u32 2147483647, %v6471_v14  ;;  %v3357_v14 = vld [vmem:[#allocation3 + $0x50] sm:$0xff] }
 0x535   :  { %v3277_v5 = vmul.f32 %v5082_v50, %v3276_v19  ;;  %5091 = vrcp.f32 %v3297_v51  ;;  %v3229_v24 = vadd.f32 %v3210_v58, %v7058_v40  ;;  %v3286_v39 = vor.u32 1.1754944e-38, %v3285_v15 }
 0x536   :  { %v3212_v32 = vpop.f32.mrf.mxu2  ;;  %v3225_v21 = vpop.f32.mrf.mxu3  ;;  %5093 = vrcp.f32 %v3316_v18  ;;  %v6477_v34 = vadd.f32 %v3290_v57, %v3289_v16  ;;  %vm3284_vm3 = vcmp.eq.f32.partialorder %v3283_v62, 8.507059e+37  ;;  %v3328_v48 = vand.u32 2147483648, %v3316_v18 }
 0x537   :  { %v3278_v42 = vadd.f32 %v5082_v50, %v3277_v5  ;;  %v3309_v46 = vand.u32 2147483648, %v3297_v51  ;;  %v3307_v58 = vand.u32 2147483647, %v3297_v51  ;;  %v3326_v32 = vand.u32 2147483647, %v3316_v18 }
 0x538   :  { %5095 = vtanh.f32 %v6477_v34  ;;  %vm3303_vm6 = vweird.f32 %v3297_v51  ;;  %vm3322_vm7 = vweird.f32 %v3316_v18 }
 0x539   :  { %v5090_v41 = vpop.eup %5089  ;;  %v3282_v37 = vsel %vm3281_vm2, %v5082_v50, %v3278_v42  ;;  %v3310_v15 = vor.u32 1.1754944e-38, %v3309_v46  ;;  %vm3308_vm10 = vcmp.eq.f32.partialorder %v3307_v58, 8.507059e+37  ;;  %vm3327_vm11 = vcmp.eq.f32.partialorder %v3326_v32, 8.507059e+37  ;;  %v7085_v46 = vld [vmem:[#allocation75_spill] sm:$0xff]  ;;  %v7089_v58 = vld [vmem:[#allocation81_spill] sm:$0xff] }
 0x53a   :  { %v6481_v28 = vadd.f32 1.0, %v5090_v41  ;;  %v3287_v19 = vsel %vm3284_vm3, %v3286_v39, %v3282_v37 }
 0x53b   :  { %v5092_v20 = vpop.eup %5091 }
 0x53c   :  { %5097 = vrcp.f32 %v6481_v28  ;;  %v5094_v21 = vpop.eup %5093  ;;  %v3299_v60 = vmul.f32 %v5092_v20, %v3297_v51  ;;  %vm3304_vm4 = vweird.f32 %v5092_v20  ;;  %vm3342_vm13 = vweird.f32 %v6481_v28 }
 0x53d   :  { %v3318_v43 = vmul.f32 %v5094_v21, %v3316_v18  ;;  %5099 = vtanh.f32 %v3229_v24  ;;  %vm3323_vm5 = vweird.f32 %v5094_v21  ;;  %vm3305_vm8 = vmor %vm3303_vm6, %vm3304_vm4 }
 0x53e   :  { %v3300_v6 = vsub.f32 1.0, %v3299_v60  ;;  %v5096_v36 = vpop.eup %5095  ;;  %vm3324_vm9 = vmor %vm3322_vm7, %vm3323_vm5  ;;  %v3329_v60 = vor.u32 1.1754944e-38, %v3328_v48  ;;  %v3348_v48 = vand.u32 2147483648, %v6481_v28 }
 0x53f   :  { %v3319_v54 = vsub.f32 1.0, %v3318_v43  ;;  %v3293_v57 = vmul.f32 %v5096_v36, %v3287_v19  ;;  %v7086_v19 = vld [vmem:[#allocation77_spill] sm:$0xff] }
 0x540   :  { %v3301_v61 = vmul.f32 %v5092_v20, %v3300_v6 }
 0x541   :  { %v3320_v5 = vmul.f32 %v5094_v21, %v3319_v54  ;;  %v3358_v42 = vadd.f32 %v3357_v14, %v3293_v57  ;;  %v3367_v40 = vpack.c.bf16 %v3293_v57, %v3293_v57  ;;  %v7087_v14 = vld [vmem:[#allocation78_spill] sm:$0xff] }
 0x542   :  { %v5098_v16 = vpop.eup %5097  ;;  %v3302_v50 = vadd.f32 %v5092_v20, %v3301_v61  ;;  %v7088_v61 = vld [vmem:[#allocation79_spill] sm:$0xff] }
 0x543   :  { %v3338_v41 = vmul.f32 %v5098_v16, %v6481_v28  ;;  %v3321_v62 = vadd.f32 %v5094_v21, %v3320_v5  ;;  %v5100_v24 = vpop.eup %5099  ;;  %3359 = vst [vmem:[#allocation12 + $0x50] sm:$0xff] %v3358_v42  ;;  %3376 = vmatmul.bf16.vlgmr.msra.gmra.mxu0 %v3367_v40  ;;  %3389 = vmatmul.bf16.vlgmr.msra.gmra.mxu1 %v3367_v40  ;;  %vm3343_vm12 = vweird.f32 %v5098_v16  ;;  %v7090_v5 = vld [vmem:[#allocation29_spill] sm:$0xff] }
 0x544   :  { %v3306_v37 = vsel %vm3305_vm8, %v5092_v20, %v3302_v50  ;;  %3402 = vmatmul.bf16.vlgmr.msra.gmra.mxu2 %v3367_v40  ;;  %3415 = vmatmul.bf16.vlgmr.msra.gmra.mxu3 %v3367_v40  ;;  %vm3344_vm14 = vmor %vm3342_vm13, %vm3343_vm12  ;;  %v7091_v50 = vld [vmem:[#allocation30_spill] sm:$0xff] }
 0x545   :  { %v3339_v39 = vsub.f32 1.0, %v3338_v41  ;;  %v3311_v43 = vsel %vm3308_vm10, %v3310_v15, %v3306_v37  ;;  %v3325_v6 = vsel %vm3324_vm9, %v5094_v21, %v3321_v62  ;;  %3622 = vmatpush.bf16.msra.mxu0 %v5480_v47  ;;  %3635 = vmatpush.bf16.msra.mxu1 %v5482_v53  ;;  %v3346_v47 = vand.u32 2147483647, %v6481_v28  ;;  %v7084_v28 = vld [vmem:[#allocation73_spill] sm:$0xff] }
 0x546   :  { %v3330_v51 = vsel %vm3327_vm11, %v3329_v60, %v3325_v6  ;;  %v3353_v36 = vmul.f32 %v5100_v24, %v3311_v43  ;;  %3648 = vmatpush.bf16.msra.mxu2 %v5513_v27  ;;  %3661 = vmatpush.bf16.msra.mxu3 %v5492_v2  ;;  %v3349_v2 = vor.u32 1.1754944e-38, %v3348_v48  ;;  %v3360_v27 = vld [vmem:[#allocation3 + $0x28] sm:$0xff]  ;;  %v7092_v24 = vld [vmem:[#allocation84_spill] sm:$0xff] }
 0x547   :  { %v3340_v54 = vmul.f32 %v5098_v16, %v3339_v39  ;;  %v3352_v18 = vmul.f32 %v3330_v51, %v6395_v55  ;;  %vm3347_vm15 = vcmp.eq.f32.partialorder %v3346_v47, 8.507059e+37  ;;  %v7096_v48 = vld [vmem:[#allocation93_spill] sm:$0xff] }
 0x549   :  { %v6493_v20 = vadd.f32 %v3353_v36, %v3352_v18  ;;  %v3341_v21 = vadd.f32 %v5098_v16, %v3340_v54  ;;  %3623 = vmatpush.bf16.msra.mxu0 %v5494_v8  ;;  %3636 = vmatpush.bf16.msra.mxu1 %v5496_v9  ;;  %v7093_v36 = vld [vmem:[#allocation85_spill] sm:$0xff]  ;;  %v7094_v54 = vld [vmem:[#allocation90_spill] sm:$0xff] }
 0x54a   :  { %3649 = vmatpush.bf16.msra.mxu2 %v5529_v0  ;;  %3662 = vmatpush.bf16.msra.mxu3 %v5510_v25  ;;  %v1152_v18 = vadd.f32 %v7094_v54, %v7093_v36  ;;  %v7104_v36 = vld [vmem:[#allocation112_spill] sm:$0xff] }
 0x54b   :  { %5101 = vtanh.f32 %v6493_v20  ;;  %v3345_v53 = vsel %vm3344_vm14, %v5098_v16, %v3341_v21  ;;  %v7095_v21 = vld [vmem:[#allocation89_spill] sm:$0xff] }
 0x54c   :  { %v3350_v9 = vsel %vm3347_vm15, %v3349_v2, %v3345_v53  ;;  %v1210_v47 = vadd.f32 %v7096_v48, %v7095_v21 }
 0x54d   :  { %3624 = vmatpush.bf16.msra.mxu0 %v5516_v31  ;;  %3637 = vmatpush.bf16.msra.mxu1 %v5519_v35  ;;  %v7059_v31 = vld [vmem:[#allocation41_spill] sm:$0xff]  ;;  %v7060_v35 = vld [vmem:[#allocation42_spill] sm:$0xff] }
 0x54e   :  { %3650 = vmatpush.bf16.msra.mxu2 %v5544_v22  ;;  %3663 = vmatpush.bf16.msra.mxu3 %v5531_v3  ;;  %v7061_v3 = vld [vmem:[#allocation43_spill] sm:$0xff] }
 0x54f   :  { %v7064_v22 = vld [vmem:[#allocation47_spill] sm:$0xff] }
 0x551   :  { %v5102_v8 = vpop.eup %5101  ;;  %3625 = vmatpush.bf16.msra.mxu0 %v5537_v11  ;;  %3638 = vmatpush.bf16.msra.mxu1 %v5539_v12  ;;  %v7062_v11 = vld [vmem:[#allocation44_spill] sm:$0xff]  ;;  %v7063_v12 = vld [vmem:[#allocation45_spill] sm:$0xff] }
 0x552   :  { %v3356_v55 = vmul.f32 %v5102_v8, %v3350_v9  ;;  %3651 = vmatpush.bf16.msra.mxu2 %v5561_v52  ;;  %3664 = vmatpush.bf16.msra.mxu3 %v5554_v45  ;;  %v7066_v45 = vld [vmem:[#allocation50_spill] sm:$0xff]  ;;  %v7067_v52 = vld [vmem:[#allocation51_spill] sm:$0xff] }
 0x554   :  { %v3361_v25 = vadd.f32 %v3360_v27, %v3356_v55  ;;  %v3428_v0 = vpack.c.bf16 %v3356_v55, %v3356_v55  ;;  %v7097_v27 = vld [vmem:[#allocation91_spill] sm:$0xff] }
 0x555   :  { %3626 = vmatpush.bf16.msra.mxu0 %v5565_v63  ;;  %3639 = vmatpush.bf16.msra.mxu1 %v5568_v10  ;;  %v7068_v63 = vld [vmem:[#allocation52_spill] sm:$0xff]  ;;  %v7069_v10 = vld [vmem:[#allocation53_spill] sm:$0xff]  ;;  %v1181_v55 = vadd.f32 %v7097_v27, %v1152_v18 }
 0x556   :  { %3362 = vst [vmem:[#allocation12 + $0x28] sm:$0xff] %v3361_v25  ;;  %3437 = vmatmul.bf16.vlgmr.msrb.gmra.mxu0 %v3428_v0  ;;  %3450 = vmatmul.bf16.vlgmr.msrb.gmra.mxu1 %v3428_v0  ;;  %v7098_v25 = vld [vmem:[#allocation94_spill] sm:$0xff] }
 0x557   :  { %3463 = vmatmul.bf16.vlgmr.msrb.gmra.mxu2 %v3428_v0  ;;  %3476 = vmatmul.bf16.vlgmr.msrb.gmra.mxu3 %v3428_v0  ;;  %v1239_v0 = vadd.f32 %v7098_v25, %v1210_v47 }
 0x558   :  { %3652 = vmatpush.bf16.msra.mxu2 %v5570_v13  ;;  %3665 = vmatpush.bf16.msra.mxu3 %v5574_v26  ;;  %v7070_v13 = vld [vmem:[#allocation54_spill] sm:$0xff]  ;;  %v7071_v26 = vld [vmem:[#allocation56_spill] sm:$0xff] }
 0x559   :  { %3627 = vmatpush.bf16.msra.mxu0 %v5584_v56  ;;  %3640 = vmatpush.bf16.msra.mxu1 %v5586_v7  ;;  %v7072_v56 = vld [vmem:[#allocation57_spill] sm:$0xff]  ;;  %v7073_v7 = vld [vmem:[#allocation59_spill] sm:$0xff] }
 0x55c   :  { %3653 = vmatpush.bf16.msra.mxu2 %v5588_v44  ;;  %3666 = vmatpush.bf16.msra.mxu3 %v5591_v49  ;;  %v7074_v44 = vld [vmem:[#allocation60_spill] sm:$0xff]  ;;  %v7075_v49 = vld [vmem:[#allocation61_spill] sm:$0xff] }
 0x55d   :  { %3628 = vmatpush.bf16.msra.mxu0 %v5596_v33  ;;  %3641 = vmatpush.bf16.msra.mxu1 %v5599_v17  ;;  %v7076_v33 = vld [vmem:[#allocation62_spill] sm:$0xff]  ;;  %v7077_v17 = vld [vmem:[#allocation63_spill] sm:$0xff] }
 0x560   :  { %3654 = vmatpush.bf16.msra.mxu2 %v5601_v30  ;;  %3667 = vmatpush.bf16.msra.mxu3 %v5605_v23  ;;  %v7065_v30 = vld [vmem:[#allocation48_spill] sm:$0xff]  ;;  %v7078_v23 = vld [vmem:[#allocation66_spill] sm:$0xff] }
 0x561   :  { %3629 = vmatpush.bf16.msra.mxu0 %v5615_v59  ;;  %3642 = vmatpush.bf16.msra.mxu1 %v5619_v1  ;;  %v7079_v59 = vld [vmem:[#allocation68_spill] sm:$0xff]  ;;  %v7080_v1 = vld [vmem:[#allocation69_spill] sm:$0xff] }
 0x564   :  { %3655 = vmatpush.bf16.msra.mxu2 %v5621_v4  ;;  %3668 = vmatpush.bf16.msra.mxu3 %v5625_v29  ;;  %v7081_v4 = vld [vmem:[#allocation70_spill] sm:$0xff]  ;;  %v7082_v29 = vld [vmem:[#allocation71_spill] sm:$0xff] }
 0x565   :  { %3683 = vmatpush.bf16.msrb.mxu0 %v7015_v38  ;;  %3696 = vmatpush.bf16.msrb.mxu1 %v7059_v31  ;;  %v7083_v38 = vld [vmem:[#allocation72_spill] sm:$0xff] }
 0x568   :  { %3709 = vmatpush.bf16.msrb.mxu2 %v7060_v35  ;;  %3722 = vmatpush.bf16.msrb.mxu3 %v7061_v3 }
 0x569   :  { %3684 = vmatpush.bf16.msrb.mxu0 %v7062_v11  ;;  %3697 = vmatpush.bf16.msrb.mxu1 %v7063_v12  ;;  %v7099_v11 = vld [vmem:[#allocation80_spill] sm:$0xff] }
 0x56c   :  { %3710 = vmatpush.bf16.msrb.mxu2 %v7064_v22  ;;  %3723 = vmatpush.bf16.msrb.mxu3 %v7065_v30 }
 0x56d   :  { %3685 = vmatpush.bf16.msrb.mxu0 %v7066_v45  ;;  %3698 = vmatpush.bf16.msrb.mxu1 %v7067_v52  ;;  %v7100_v45 = vld [vmem:[#allocation111_spill] sm:$0xff] }
 0x56e   :  { %v7101_v52 = vld [vmem:[#allocation115_spill] sm:$0xff] }
 0x570   :  { %3711 = vmatpush.bf16.msrb.mxu2 %v7068_v63  ;;  %3724 = vmatpush.bf16.msrb.mxu3 %v7069_v10  ;;  %v1326_v63 = vadd.f32 %v7101_v52, %v7100_v45 }
 0x571   :  { %3686 = vmatpush.bf16.msrb.mxu0 %v7070_v13  ;;  %3699 = vmatpush.bf16.msrb.mxu1 %v7071_v26 }
 0x574   :  { %3712 = vmatpush.bf16.msrb.mxu2 %v7072_v56  ;;  %3725 = vmatpush.bf16.msrb.mxu3 %v7073_v7 }
 0x575   :  { %3687 = vmatpush.bf16.msrb.mxu0 %v7074_v44  ;;  %3700 = vmatpush.bf16.msrb.mxu1 %v7075_v49 }
 0x578   :  { %3713 = vmatpush.bf16.msrb.mxu2 %v7076_v33  ;;  %3726 = vmatpush.bf16.msrb.mxu3 %v7077_v17  ;;  %v7102_v33 = vld [vmem:[#allocation116_spill] sm:$0xff] }
 0x579   :  { %3688 = vmatpush.bf16.msrb.mxu0 %v7078_v23  ;;  %3701 = vmatpush.bf16.msrb.mxu1 %v7079_v59  ;;  %v1355_v17 = vadd.f32 %v7102_v33, %v1326_v63 }
 0x57c   :  { %3714 = vmatpush.bf16.msrb.mxu2 %v7080_v1  ;;  %3727 = vmatpush.bf16.msrb.mxu3 %v7081_v4 }
 0x57d   :  { %3689 = vmatpush.bf16.msrb.mxu0 %v7082_v29  ;;  %3702 = vmatpush.bf16.msrb.mxu1 %v7083_v38 }
 0x580   :  { %3715 = vmatpush.bf16.msrb.mxu2 %v7084_v28  ;;  %3728 = vmatpush.bf16.msrb.mxu3 %v7085_v46 }
 0x581   :  { %3690 = vmatpush.bf16.msrb.mxu0 %v7086_v19  ;;  %3703 = vmatpush.bf16.msrb.mxu1 %v7087_v14 }
 0x584   :  { %3716 = vmatpush.bf16.msrb.mxu2 %v7088_v61  ;;  %3729 = vmatpush.bf16.msrb.mxu3 %v7089_v58 }
 0x5c0   :  { %v3377_v57 = vpop.f32.mrf.mxu0  ;;  %v3390_v16 = vpop.f32.mrf.mxu1 }
 0x5c1   :  { %v3420_v32 = vadd.f32 %v3377_v57, %v7090_v5  ;;  %v3421_v41 = vadd.f32 %v3390_v16, %v7091_v50 }
 0x5c3   :  { %v4696_v42 = vmul.f32 -1.442695, %v3420_v32  ;;  %v4697_v15 = vmul.f32 -1.442695, %v3421_v41 }
 0x5c5   :  { %5103 = vpow2.f32 %v4696_v42 }
 0x5c6   :  { %5105 = vpow2.f32 %v4697_v15 }
 0x5c7   :  { %v3403_v62 = vpop.f32.mrf.mxu2  ;;  %v3416_v40 = vpop.f32.mrf.mxu3 }
 0x5c8   :  { %v3423_v60 = vadd.f32 %v3416_v40, %v7092_v24  ;;  %v3379_v37 = vpop.f32.mrf.mxu0  ;;  %v3392_v39 = vpop.f32.mrf.mxu1  ;;  %v3422_v12 = vadd.f32 %v3403_v62, %v7099_v11 }
 0x5ca   :  { %v4698_v43 = vmul.f32 -1.442695, %v3423_v60 }
 0x5cb   :  { %v5104_v6 = vpop.eup %5103 }
 0x5cc   :  { %v5106_v51 = vpop.eup %5105  ;;  %v3488_v53 = vadd.f32 1.0, %v5104_v6  ;;  %5107 = vpow2.f32 %v4698_v43 }
 0x5cd   :  { %v3507_v2 = vadd.f32 1.0, %v5106_v51  ;;  %v7103_v51 = vld [vmem:[#allocation109_spill] sm:$0xff] }
 0x5ce   :  { %5109 = vrcp.f32 %v3488_v53  ;;  %v3498_v59 = vand.u32 2147483647, %v3488_v53  ;;  %v3500_v29 = vand.u32 2147483648, %v3488_v53  ;;  %vm3494_vm3 = vweird.f32 %v3488_v53 }
 0x5cf   :  { %5111 = vrcp.f32 %v3507_v2  ;;  %v3405_v8 = vpop.f32.mrf.mxu2  ;;  %v3418_v9 = vpop.f32.mrf.mxu3  ;;  %v3519_v4 = vand.u32 2147483648, %v3507_v2  ;;  %v3517_v19 = vand.u32 2147483647, %v3507_v2  ;;  %vm3513_vm2 = vweird.f32 %v3507_v2 }
 0x5d0   :  { %vm3499_vm5 = vcmp.eq.f32.partialorder %v3498_v59, 8.507059e+37  ;;  %v3501_v41 = vor.u32 1.1754944e-38, %v3500_v29  ;;  %v1268_v54 = vadd.f32 %v7104_v36, %v7103_v51 }
 0x5d1   :  { %v3520_v40 = vor.u32 1.1754944e-38, %v3519_v4  ;;  %vm3518_vm7 = vcmp.eq.f32.partialorder %v3517_v19, 8.507059e+37 }
 0x5d2   :  { %v5108_v3 = vpop.eup %5107 }
 0x5d3   :  { %v3438_v31 = vpop.f32.mrf.mxu0  ;;  %v3451_v35 = vpop.f32.mrf.mxu1  ;;  %v6571_v10 = vadd.f32 1.0, %v5108_v3 }
 0x5d4   :  { %v3481_v22 = vadd.f32 %v3438_v31, %v1181_v55  ;;  %v3482_v30 = vadd.f32 %v3451_v35, %v1239_v0  ;;  %v5110_v13 = vpop.eup %5109  ;;  %v7105_v55 = vld [vmem:[#allocation113_spill] sm:$0xff] }
 0x5d5   :  { %v5112_v7 = vpop.eup %5111  ;;  %v3490_v44 = vmul.f32 %v5110_v13, %v3488_v53  ;;  %5113 = vrcp.f32 %v6571_v10  ;;  %vm3495_vm0 = vweird.f32 %v5110_v13  ;;  %v1297_v25 = vadd.f32 %v7105_v55, %v1268_v54 }
 0x5d6   :  { %v4699_v26 = vmul.f32 -1.442695, %v3481_v22  ;;  %v4700_v56 = vmul.f32 -1.442695, %v3482_v30  ;;  %v3509_v49 = vmul.f32 %v5112_v7, %v3507_v2  ;;  %5115 = vtanh.f32 %v3422_v12  ;;  %vm3496_vm4 = vmor %vm3494_vm3, %vm3495_vm0 }
 0x5d7   :  { %v3491_v23 = vsub.f32 1.0, %v3490_v44  ;;  %vm3514_vm1 = vweird.f32 %v5112_v7  ;;  %v3539_v31 = vand.u32 2147483648, %v6571_v10  ;;  %vm3533_vm9 = vweird.f32 %v6571_v10 }
 0x5d8   :  { %5117 = vpow2.f32 %v4699_v26  ;;  %v3510_v1 = vsub.f32 1.0, %v3509_v49  ;;  %vm3515_vm6 = vmor %vm3513_vm2, %vm3514_vm1  ;;  %v3611_v49 = vld [vmem:[#allocation3 + $0x60] sm:$0xff] }
 0x5d9   :  { %5119 = vpow2.f32 %v4700_v56  ;;  %v3492_v46 = vmul.f32 %v5110_v13, %v3491_v23  ;;  %v3540_v45 = vor.u32 1.1754944e-38, %v3539_v31 }
 0x5da   :  { %v3464_v38 = vpop.f32.mrf.mxu2  ;;  %v3477_v28 = vpop.f32.mrf.mxu3  ;;  %v3511_v57 = vmul.f32 %v5112_v7, %v3510_v1 }
 0x5db   :  { %v3484_v14 = vadd.f32 %v3477_v28, %v1355_v17  ;;  %v3440_v61 = vpop.f32.mrf.mxu0  ;;  %v3453_v58 = vpop.f32.mrf.mxu1  ;;  %v3493_v5 = vadd.f32 %v5110_v13, %v3492_v46  ;;  %v3483_v3 = vadd.f32 %v3464_v38, %v1297_v25 }
 0x5dc   :  { %v5114_v16 = vpop.eup %5113  ;;  %v3512_v42 = vadd.f32 %v5112_v7, %v3511_v57 }
 0x5dd   :  { %v4701_v32 = vmul.f32 -1.442695, %v3484_v14  ;;  %v5116_v50 = vpop.eup %5115  ;;  %v3529_v15 = vmul.f32 %v5114_v16, %v6571_v10  ;;  %v3497_v24 = vsel %vm3496_vm4, %v5110_v13, %v3493_v5  ;;  %vm3534_vm8 = vweird.f32 %v5114_v16 }
 0x5de   :  { %v5118_v62 = vpop.eup %5117  ;;  %v3502_v37 = vsel %vm3499_vm5, %v3501_v41, %v3497_v24  ;;  %v3516_v39 = vsel %vm3515_vm6, %v5112_v7, %v3512_v42  ;;  %vm3535_vm10 = vmor %vm3533_vm9, %vm3534_vm8 }
 0x5df   :  { %5121 = vpow2.f32 %v4701_v32  ;;  %v5120_v60 = vpop.eup %5119  ;;  %v3530_v43 = vsub.f32 1.0, %v3529_v15  ;;  %v3551_v6 = vadd.f32 1.0, %v5118_v62  ;;  %v3521_v18 = vsel %vm3518_vm7, %v3520_v40, %v3516_v39 }
 0x5e0   :  { %v3544_v21 = vmul.f32 %v5116_v50, %v3502_v37  ;;  %v3570_v48 = vadd.f32 1.0, %v5120_v60  ;;  %v3543_v47 = vmul.f32 %v3521_v18, %v6477_v34  ;;  %v3537_v34 = vand.u32 2147483647, %v6571_v10 }
 0x5e1   :  { %v3531_v53 = vmul.f32 %v5114_v16, %v3530_v43  ;;  %5123 = vrcp.f32 %v3551_v6  ;;  %v3563_v7 = vand.u32 2147483648, %v3551_v6  ;;  %v3561_v33 = vand.u32 2147483647, %v3551_v6 }
 0x5e2   :  { %v3466_v2 = vpop.f32.mrf.mxu2  ;;  %v3479_v8 = vpop.f32.mrf.mxu3  ;;  %5125 = vrcp.f32 %v3570_v48  ;;  %v6579_v9 = vadd.f32 %v3544_v21, %v3543_v47  ;;  %vm3538_vm11 = vcmp.eq.f32.partialorder %v3537_v34, 8.507059e+37  ;;  %v3582_v56 = vand.u32 2147483648, %v3570_v48  ;;  %v7106_v21 = vld [vmem:[#allocation31_spill] sm:$0xff]  ;;  %v7107_v47 = vld [vmem:[#allocation33_spill] sm:$0xff] }
 0x5e3   :  { %v3532_v0 = vadd.f32 %v5114_v16, %v3531_v53  ;;  %v3580_v1 = vand.u32 2147483647, %v3570_v48  ;;  %vm3557_vm14 = vweird.f32 %v3551_v6  ;;  %vm3576_vm15 = vweird.f32 %v3570_v48  ;;  %v7108_v2 = vld [vmem:[#allocation35_spill] sm:$0xff]  ;;  %v7109_v8 = vld [vmem:[#allocation86_spill] sm:$0xff] }
 0x5e4   :  { %5127 = vtanh.f32 %v6579_v9  ;;  %v3564_v28 = vor.u32 1.1754944e-38, %v3563_v7  ;;  %v3583_v61 = vor.u32 1.1754944e-38, %v3582_v56  ;;  %vm3562_vm2 = vcmp.eq.f32.partialorder %v3561_v33, 8.507059e+37 }
 0x5e5   :  { %v5122_v27 = vpop.eup %5121  ;;  %v3536_v30 = vsel %vm3535_vm10, %v5114_v16, %v3532_v0  ;;  %vm3581_vm3 = vcmp.eq.f32.partialorder %v3580_v1, 8.507059e+37  ;;  %v7110_v0 = vld [vmem:[#allocation87_spill] sm:$0xff]  ;;  %v7114_v1 = vld [vmem:[#allocation88_spill] sm:$0xff] }
 0x5e6   :  { %v6584_v35 = vadd.f32 1.0, %v5122_v27  ;;  %v3541_v44 = vsel %vm3538_vm11, %v3540_v45, %v3536_v30  ;;  %v1109_v27 = vadd.f32 %v7109_v8, %v7108_v2 }
 0x5e7   :  { %v5124_v11 = vpop.eup %5123 }
 0x5e8   :  { %5129 = vrcp.f32 %v6584_v35  ;;  %v5126_v12 = vpop.eup %5125  ;;  %v3553_v22 = vmul.f32 %v5124_v11, %v3551_v6  ;;  %vm3558_vm12 = vweird.f32 %v5124_v11  ;;  %v3602_v40 = vand.u32 2147483648, %v6584_v35  ;;  %v3614_v6 = vld [vmem:[#allocation3 + $0x18] sm:$0xff] }
 0x5e9   :  { %v3572_v52 = vmul.f32 %v5126_v12, %v3570_v48  ;;  %5131 = vtanh.f32 %v3483_v3  ;;  %vm3577_vm13 = vweird.f32 %v5126_v12  ;;  %vm3559_vm0 = vmor %vm3557_vm14, %vm3558_vm12  ;;  %vm3596_vm5 = vweird.f32 %v6584_v35 }
 0x5ea   :  { %v3554_v63 = vsub.f32 1.0, %v3553_v22  ;;  %v5128_v13 = vpop.eup %5127  ;;  %vm3578_vm1 = vmor %vm3576_vm15, %vm3577_vm13  ;;  %v3600_v24 = vand.u32 2147483647, %v6584_v35  ;;  %v3603_v37 = vor.u32 1.1754944e-38, %v3602_v40  ;;  %v1138_v31 = vadd.f32 %v7110_v0, %v1109_v27 }
 0x5eb   :  { %v3573_v26 = vsub.f32 1.0, %v3572_v52  ;;  %v3547_v17 = vmul.f32 %v5128_v13, %v3541_v44  ;;  %v7111_v52 = vld [vmem:[#allocation32_spill] sm:$0xff] }
 0x5ec   :  { %v3555_v10 = vmul.f32 %v5124_v11, %v3554_v63  ;;  %vm3601_vm7 = vcmp.eq.f32.partialorder %v3600_v24, 8.507059e+37  ;;  %v7112_v63 = vld [vmem:[#allocation82_spill] sm:$0xff] }
 0x5ed   :  { %v3574_v59 = vmul.f32 %v5126_v12, %v3573_v26  ;;  %v3612_v38 = vadd.f32 %v3611_v49, %v3547_v17  ;;  %v3621_v19 = vpack.c.bf16 %v3547_v17, %v3547_v17  ;;  %v1051_v13 = vadd.f32 %v7112_v63, %v7111_v52  ;;  %v7113_v49 = vld [vmem:[#allocation83_spill] sm:$0xff] }
 0x5ee   :  { %v5130_v23 = vpop.eup %5129  ;;  %v3556_v4 = vadd.f32 %v5124_v11, %v3555_v10 }
 0x5ef   :  { %v3592_v29 = vmul.f32 %v5130_v23, %v6584_v35  ;;  %v3575_v46 = vadd.f32 %v5126_v12, %v3574_v59  ;;  %v5132_v14 = vpop.eup %5131  ;;  %3613 = vst [vmem:[#allocation12 + $0x60] sm:$0xff] %v3612_v38  ;;  %3630 = vmatmul.bf16.vlgmr.msra.gmra.mxu0 %v3621_v19  ;;  %3643 = vmatmul.bf16.vlgmr.msra.gmra.mxu1 %v3621_v19  ;;  %vm3597_vm4 = vweird.f32 %v5130_v23 }
 0x5f0   :  { %v3560_v58 = vsel %vm3559_vm0, %v5124_v11, %v3556_v4  ;;  %3656 = vmatmul.bf16.vlgmr.msra.gmra.mxu2 %v3621_v19  ;;  %3669 = vmatmul.bf16.vlgmr.msra.gmra.mxu3 %v3621_v19  ;;  %vm3598_vm6 = vmor %vm3596_vm5, %vm3597_vm4  ;;  %v1080_v10 = vadd.f32 %v7113_v49, %v1051_v13 }
 0x5f1   :  { %v3593_v57 = vsub.f32 1.0, %v3592_v29  ;;  %v3565_v16 = vsel %vm3562_vm2, %v3564_v28, %v3560_v58  ;;  %v3579_v5 = vsel %vm3578_vm1, %v5126_v12, %v3575_v46  ;;  %v7115_v29 = vld [vmem:[#allocation92_spill] sm:$0xff] }
 0x5f2   :  { %v3584_v32 = vsel %vm3581_vm3, %v3583_v61, %v3579_v5  ;;  %v3607_v50 = vmul.f32 %v5132_v14, %v3565_v16 }
 0x5f3   :  { %v3594_v41 = vmul.f32 %v5130_v23, %v3593_v57  ;;  %v3606_v42 = vmul.f32 %v3584_v32, %v6493_v20 }
 0x5f5   :  { %v6591_v15 = vadd.f32 %v3607_v50, %v3606_v42  ;;  %v3595_v62 = vadd.f32 %v5130_v23, %v3594_v41 }
 0x5f7   :  { %5133 = vtanh.f32 %v6591_v15  ;;  %v3599_v60 = vsel %vm3598_vm6, %v5130_v23, %v3595_v62 }
 0x5f8   :  { %v3604_v43 = vsel %vm3601_vm7, %v3603_v37, %v3599_v60  ;;  %v7116_v60 = vld [vmem:[#allocation114_spill] sm:$0xff] }
 0x5fd   :  { %v5134_v39 = vpop.eup %5133 }
 0x5fe   :  { %v3610_v20 = vmul.f32 %v5134_v39, %v3604_v43 }
 0x600   :  { %v3615_v51 = vadd.f32 %v3614_v6, %v3610_v20  ;;  %v3682_v36 = vpack.c.bf16 %v3610_v20, %v3610_v20 }
 0x602   :  { %3616 = vst [vmem:[#allocation12 + $0x18] sm:$0xff] %v3615_v51  ;;  %3691 = vmatmul.bf16.vlgmr.msrb.gmra.mxu0 %v3682_v36  ;;  %3704 = vmatmul.bf16.vlgmr.msrb.gmra.mxu1 %v3682_v36 }
 0x603   :  { %3717 = vmatmul.bf16.vlgmr.msrb.gmra.mxu2 %v3682_v36  ;;  %3730 = vmatmul.bf16.vlgmr.msrb.gmra.mxu3 %v3682_v36 }
 0x66c   :  { %v3631_v54 = vpop.f32.mrf.mxu0  ;;  %v3644_v18 = vpop.f32.mrf.mxu1 }
 0x66d   :  { %v3674_v48 = vadd.f32 %v3631_v54, %v7106_v21  ;;  %v3675_v53 = vadd.f32 %v3644_v18, %v7107_v47 }
 0x66f   :  { %v4702_v55 = vmul.f32 -1.442695, %v3674_v48  ;;  %v4703_v25 = vmul.f32 -1.442695, %v3675_v53 }
 0x671   :  { %5135 = vpow2.f32 %v4702_v55 }
 0x672   :  { %5137 = vpow2.f32 %v4703_v25 }
 0x673   :  { %v3657_v35 = vpop.f32.mrf.mxu2  ;;  %v3670_v34 = vpop.f32.mrf.mxu3 }
 0x674   :  { %v3677_v3 = vadd.f32 %v3670_v34, %v1138_v31  ;;  %v3633_v11 = vpop.f32.mrf.mxu0  ;;  %v3646_v12 = vpop.f32.mrf.mxu1  ;;  %v3676_v59 = vadd.f32 %v3657_v35, %v1080_v10 }
 0x676   :  { %v4704_v22 = vmul.f32 -1.442695, %v3677_v3 }
 0x677   :  { %v5136_v30 = vpop.eup %5135 }
 0x678   :  { %v5138_v45 = vpop.eup %5137  ;;  %v3742_v26 = vadd.f32 1.0, %v5136_v30  ;;  %5139 = vpow2.f32 %v4704_v22 }
 0x679   :  { %v3761_v56 = vadd.f32 1.0, %v5138_v45 }
 0x67a   :  { %5141 = vrcp.f32 %v3742_v26  ;;  %v3752_v5 = vand.u32 2147483647, %v3742_v26  ;;  %v3754_v41 = vand.u32 2147483648, %v3742_v26  ;;  %vm3748_vm11 = vweird.f32 %v3742_v26 }
 0x67b   :  { %5143 = vrcp.f32 %v3761_v56  ;;  %v3659_v7 = vpop.f32.mrf.mxu2  ;;  %v3672_v44 = vpop.f32.mrf.mxu3  ;;  %v3773_v50 = vand.u32 2147483648, %v3761_v56  ;;  %v3771_v24 = vand.u32 2147483647, %v3761_v56  ;;  %vm3767_vm10 = vweird.f32 %v3761_v56 }
 0x67c   :  { %vm3753_vm13 = vcmp.eq.f32.partialorder %v3752_v5, 8.507059e+37  ;;  %v3755_v18 = vor.u32 1.1754944e-38, %v3754_v41 }
 0x67d   :  { %v3774_v53 = vor.u32 1.1754944e-38, %v3773_v50  ;;  %vm3772_vm15 = vcmp.eq.f32.partialorder %v3771_v24, 8.507059e+37 }
 0x67e   :  { %v5140_v23 = vpop.eup %5139 }
 0x67f   :  { %v3692_v33 = vpop.f32.mrf.mxu0  ;;  %v3705_v17 = vpop.f32.mrf.mxu1  ;;  %v6607_v28 = vadd.f32 1.0, %v5140_v23 }
 0x680   :  { %v3735_v4 = vadd.f32 %v3692_v33, %v7114_v1  ;;  %v3736_v38 = vadd.f32 %v3705_v17, %v7115_v29  ;;  %v5142_v46 = vpop.eup %5141 }
 0x681   :  { %v5144_v61 = vpop.eup %5143  ;;  %v3744_v58 = vmul.f32 %v5142_v46, %v3742_v26  ;;  %5145 = vrcp.f32 %v6607_v28  ;;  %vm3749_vm8 = vweird.f32 %v5142_v46  ;;  %v3793_v63 = vand.u32 2147483648, %v6607_v28  ;;  %v7117_v26 = vld [vmem:[#allocation110_spill] sm:$0xff] }
 0x682   :  { %v4705_v19 = vmul.f32 -1.442695, %v3735_v4  ;;  %v4706_v14 = vmul.f32 -1.442695, %v3736_v38  ;;  %v3763_v57 = vmul.f32 %v5144_v61, %v3761_v56  ;;  %5147 = vtanh.f32 %v3676_v59  ;;  %vm3750_vm12 = vmor %vm3748_vm11, %vm3749_vm8  ;;  %v3865_v4 = vld [vmem:[#allocation3 + $0x70] sm:$0xff] }
 0x683   :  { %v3745_v16 = vsub.f32 1.0, %v3744_v58  ;;  %vm3768_vm9 = vweird.f32 %v5144_v61  ;;  %vm3787_vm1 = vweird.f32 %v6607_v28  ;;  %v3791_v13 = vand.u32 2147483647, %v6607_v28 }
 0x684   :  { %5149 = vpow2.f32 %v4705_v19  ;;  %v3764_v32 = vsub.f32 1.0, %v3763_v57  ;;  %vm3769_vm14 = vmor %vm3767_vm10, %vm3768_vm9  ;;  %v3794_v33 = vor.u32 1.1754944e-38, %v3793_v63 }
 0x685   :  { %5151 = vpow2.f32 %v4706_v14  ;;  %v3746_v40 = vmul.f32 %v5142_v46, %v3745_v16  ;;  %vm3792_vm3 = vcmp.eq.f32.partialorder %v3791_v13, 8.507059e+37 }
 0x686   :  { %v3718_v42 = vpop.f32.mrf.mxu2  ;;  %v3731_v62 = vpop.f32.mrf.mxu3  ;;  %v3765_v6 = vmul.f32 %v5144_v61, %v3764_v32 }
 0x687   :  { %v3738_v37 = vadd.f32 %v3731_v62, %v7116_v60  ;;  %v3694_v39 = vpop.f32.mrf.mxu0  ;;  %v3707_v43 = vpop.f32.mrf.mxu1  ;;  %v3747_v51 = vadd.f32 %v5142_v46, %v3746_v40  ;;  %v3737_v56 = vadd.f32 %v3718_v42, %v7117_v26 }
 0x688   :  { %v5146_v20 = vpop.eup %5145  ;;  %v3766_v21 = vadd.f32 %v5144_v61, %v3765_v6 }
 0x689   :  { %v4707_v36 = vmul.f32 -1.442695, %v3738_v37  ;;  %v5148_v54 = vpop.eup %5147  ;;  %v3783_v48 = vmul.f32 %v5146_v20, %v6607_v28  ;;  %v3751_v2 = vsel %vm3750_vm12, %v5142_v46, %v3747_v51  ;;  %vm3788_vm0 = vweird.f32 %v5146_v20 }
 0x68a   :  { %v5150_v47 = vpop.eup %5149  ;;  %v3756_v27 = vsel %vm3753_vm13, %v3755_v18, %v3751_v2  ;;  %v3770_v55 = vsel %vm3769_vm14, %v5144_v61, %v3766_v21  ;;  %vm3789_vm2 = vmor %vm3787_vm1, %vm3788_vm0  ;;  %v3868_v2 = vld [vmem:[#allocation3 + $0x8] sm:$0xff] }
 0x68b   :  { %5153 = vpow2.f32 %v4707_v36  ;;  %v5152_v8 = vpop.eup %5151  ;;  %v3784_v25 = vsub.f32 1.0, %v3783_v48  ;;  %v3805_v0 = vadd.f32 1.0, %v5150_v47  ;;  %v3775_v31 = vsel %vm3772_vm15, %v3774_v53, %v3770_v55 }
 0x68c   :  { %v3798_v35 = vmul.f32 %v5148_v54, %v3756_v27  ;;  %v3824_v34 = vadd.f32 1.0, %v5152_v8  ;;  %v3797_v3 = vmul.f32 %v3775_v31, %v6579_v9 }
 0x68d   :  { %v3785_v11 = vmul.f32 %v5146_v20, %v3784_v25  ;;  %5155 = vrcp.f32 %v3805_v0  ;;  %v3817_v28 = vand.u32 2147483648, %v3805_v0  ;;  %v3815_v14 = vand.u32 2147483647, %v3805_v0 }
 0x68e   :  { %v3720_v12 = vpop.f32.mrf.mxu2  ;;  %v3733_v22 = vpop.f32.mrf.mxu3  ;;  %5157 = vrcp.f32 %v3824_v34  ;;  %v3799_v30 = vadd.f32 %v3798_v35, %v3797_v3  ;;  %v3836_v38 = vand.u32 2147483648, %v3824_v34  ;;  %v3834_v58 = vand.u32 2147483647, %v3824_v34 }
 0x68f   :  { %v3786_v52 = vadd.f32 %v5146_v20, %v3785_v11  ;;  %vm3811_vm6 = vweird.f32 %v3805_v0  ;;  %vm3830_vm7 = vweird.f32 %v3824_v34  ;;  %v3818_v32 = vor.u32 1.1754944e-38, %v3817_v28 }
 0x690   :  { %5159 = vtanh.f32 %v3799_v30  ;;  %v3837_v62 = vor.u32 1.1754944e-38, %v3836_v38  ;;  %vm3816_vm10 = vcmp.eq.f32.partialorder %v3815_v14, 8.507059e+37  ;;  %vm3835_vm11 = vcmp.eq.f32.partialorder %v3834_v58, 8.507059e+37 }
 0x691   :  { %v5154_v45 = vpop.eup %5153  ;;  %v3790_v49 = vsel %vm3789_vm2, %v5146_v20, %v3786_v52 }
 0x692   :  { %v3844_v7 = vadd.f32 1.0, %v5154_v45  ;;  %v3795_v1 = vsel %vm3792_vm3, %v3794_v33, %v3790_v49 }
 0x693   :  { %v5156_v9 = vpop.eup %5155 }
 0x694   :  { %v5158_v44 = vpop.eup %5157  ;;  %v3807_v10 = vmul.f32 %v5156_v9, %v3805_v0  ;;  %5161 = vrcp.f32 %v3844_v7  ;;  %vm3812_vm4 = vweird.f32 %v5156_v9  ;;  %v3856_v54 = vand.u32 2147483648, %v3844_v7 }
 0x695   :  { %v3826_v17 = vmul.f32 %v5158_v44, %v3824_v34  ;;  %5163 = vtanh.f32 %v3737_v56  ;;  %vm3831_vm5 = vweird.f32 %v5158_v44  ;;  %vm3813_vm8 = vmor %vm3811_vm6, %vm3812_vm4  ;;  %vm3850_vm13 = vweird.f32 %v3844_v7 }
 0x696   :  { %v3808_v23 = vsub.f32 1.0, %v3807_v10  ;;  %v5160_v59 = vpop.eup %5159  ;;  %vm3832_vm9 = vmor %vm3830_vm7, %vm3831_vm5  ;;  %v3854_v18 = vand.u32 2147483647, %v3844_v7  ;;  %v3857_v48 = vor.u32 1.1754944e-38, %v3856_v54 }
 0x697   :  { %v3827_v29 = vsub.f32 1.0, %v3826_v17  ;;  %v3801_v46 = vmul.f32 %v5160_v59, %v3795_v1 }
 0x698   :  { %v3809_v19 = vmul.f32 %v5156_v9, %v3808_v23  ;;  %vm3855_vm15 = vcmp.eq.f32.partialorder %v3854_v18, 8.507059e+37 }
 0x699   :  { %v3828_v61 = vmul.f32 %v5158_v44, %v3827_v29  ;;  %v3866_v16 = vadd.f32 %v3865_v4, %v3801_v46 }
 0x69a   :  { %v5162_v57 = vpop.eup %5161  ;;  %v3810_v5 = vadd.f32 %v5156_v9, %v3809_v19 }
 0x69b   :  { %v3829_v50 = vadd.f32 %v5158_v44, %v3828_v61  ;;  %v3846_v41 = vmul.f32 %v5162_v57, %v3844_v7  ;;  %v5164_v42 = vpop.eup %5163  ;;  %3867 = vst [vmem:[#allocation12 + $0x70] sm:$0xff] %v3866_v16  ;;  %vm3851_vm12 = vweird.f32 %v5162_v57 }
 0x69c   :  { %v3814_v40 = vsel %vm3813_vm8, %v5156_v9, %v3810_v5  ;;  %vm3852_vm14 = vmor %vm3850_vm13, %vm3851_vm12 }
 0x69d   :  { %v3819_v24 = vsel %vm3816_vm10, %v3818_v32, %v3814_v40  ;;  %v3833_v60 = vsel %vm3832_vm9, %v5158_v44, %v3829_v50  ;;  %v3847_v37 = vsub.f32 1.0, %v3846_v41 }
 0x69e   :  { %v3838_v39 = vsel %vm3835_vm11, %v3837_v62, %v3833_v60  ;;  %v3861_v43 = vmul.f32 %v5164_v42, %v3819_v24 }
 0x69f   :  { %v3860_v6 = vmul.f32 %v3838_v39, %v6591_v15  ;;  %v3848_v20 = vmul.f32 %v5162_v57, %v3847_v37 }
 0x6a1   :  { %v3862_v51 = vadd.f32 %v3861_v43, %v3860_v6  ;;  %v3849_v36 = vadd.f32 %v5162_v57, %v3848_v20 }
 0x6a3   :  { %5165 = vtanh.f32 %v3862_v51  ;;  %v3853_v21 = vsel %vm3852_vm14, %v5162_v57, %v3849_v36 }
 0x6a4   :  { %v3858_v53 = vsel %vm3855_vm15, %v3857_v48, %v3853_v21 }
 0x6a9   :  { %v5166_v47 = vpop.eup %5165 }
 0x6aa   :  { %v3864_v15 = vmul.f32 %v5166_v47, %v3858_v53 }
 0x6ac   :  { %v3869_v8 = vadd.f32 %v3868_v2, %v3864_v15 }
 0x6ae   :  { %3870 = vst [vmem:[#allocation12 + $0x8] sm:$0xff] %v3869_v8 }
 0x6af   :  { %3883 = dma.vmem_to_hbm [thread:$0]  %s3876_s18, 2048, %s3878_s21, [#allocation5], %s5324_s1, %s5324_s1, %s5325_s8  }
 0x6b0   :  { %5318 = dma.done.wait [#allocation5], 2048  }
 0x6b1   :  { %5319 = vsyncadd [#allocation5], 4294965248 }
 0x6b2   :  { %3888 = vsyncpa [#allocation4], 1 }
 0x6b3   :  { %3889 = vsyncpa [#allocation7], 1 }
 0x6b4   :  { %3890 = vsyncpa [#allocation10], 1 }
 0x6b5   :  { %3891 = vsyncpa [#allocation5], 1 }

</bundles_post_ra>
